<compile_context>
chip_gen: v5e
topology: v5e:2x2
jax: 0.10.0
libtpu: 0.0.40
codegen_flags: <defaults>
</compile_context>

<pallas_src>
import numpy as np
import jax
import jax.numpy as jnp
from jax.experimental import pallas as pl
from jax.experimental.pallas import tpu as pltpu


NUM_SKILLS = 4
N_ACTIONS = 7
IMG_H = IMG_W = 7
IMG_C = 3
C1, C2, C3 = 16, 32, 64
OUT_W = N_ACTIONS + 1            # 7 log-probs + 1 value per row, single store
POOL = 9 * C1                    # 144 pooled features per skill
CONV1_N = NUM_SKILLS * POOL      # 576 columns per pool tap (tap-major layout)

_TAPS = [(0, 0), (0, 1), (1, 0), (1, 1)]   # pool tap k = dph*2 + dpw


def _round_up(x, m):
    return (x + m - 1) // m * m


# ----------------------------------------------------------------------------
# Host-side weight fusion (glue).  Call ONCE per parameter set and reuse.
# Column layouts:
#   image      : (r*7 + c)*3 + ci                                  -> 147
#   conv1 (W1) : [tap k (4)] [skill s (4)] [(pi*3+pj)*16 + co]     -> 2304
#   pooled     : [skill s]   [(pi*3+pj)*16 + co]                   -> 576
#   conv2      : [skill s]   [(oi*2+oj)*32 + co]                   -> 512
#   conv3      : [skill s]   [co]                                  -> 256
#   head1      : [skill s]   [actor hidden 64 | critic hidden 64]  -> 512
#   head2      : [skill s]   [7 logits | 1 value]                  -> 32
# ----------------------------------------------------------------------------
def fuse_params(params):
    S = params["c1w"].shape[0]
    H, W, C = IMG_H, IMG_W, IMG_C

    c1w = np.asarray(params["c1w"]).reshape(S, 2, 2, C, C1)
    c2w = np.asarray(params["c2w"]).reshape(S, 2, 2, C1, C2)
    c1b = np.asarray(params["c1b"]).reshape(S, C1)
    c2b = np.asarray(params["c2b"]).reshape(S, C2)
    c3b = np.asarray(params["c3b"]).reshape(S, C3)

    # conv1, all taps x all skills fused along N (tap-major): X(B,147)@W1 -> (B,2304)
    W1 = np.zeros((H * W * C, 4 * S * POOL), np.float32)
    for kp, (dph, dpw) in enumerate(_TAPS):
        for s in range(S):
            for pi in range(3):
                for pj in range(3):
                    i, j = 2 * pi + dph, 2 * pj + dpw          # conv1 output position
                    col0 = kp * (S * POOL) + s * POOL + (pi * 3 + pj) * C1
                    for kh in range(2):
                        for kw in range(2):
                            r, c = i + kh, j + kw              # input pixel
                            for ci in range(C):
                                row = (r * W + c) * C + ci
                                W1[row, col0:col0 + C1] = c1w[s, kh, kw, ci, :]
    # conv1 bias (added AFTER the pool max; bias is identical across taps and
    # ReLU/max commute), shape (1, 576) in pooled layout.
    b1 = np.tile(c1b.reshape(S, 1, C1), (1, 9, 1)).reshape(1, S * POOL)

    # conv2, block-diagonal across skills: pooled(B,576) -> (B, 512)
    W2 = np.zeros((S * POOL, S * 4 * C2), np.float32)
    for s in range(S):
        for oi in range(2):
            for oj in range(2):
                for kh in range(2):
                    for kw in range(2):
                        pr, pc = oi + kh, oj + kw
                        for ci in range(C1):
                            row = s * POOL + (pr * 3 + pc) * C1 + ci
                            col = s * 4 * C2 + (oi * 2 + oj) * C2
                            W2[row, col:col + C2] = c2w[s, kh, kw, ci, :]
    b2 = np.tile(c2b.reshape(S, 1, C2), (1, 4, 1)).reshape(1, S * 4 * C2)

    # conv3, block-diagonal: (B,512) -> (B,256); tap-major rows already match.
    c3w_r = np.asarray(params["c3w"]).reshape(S, 4 * C2, C3).astype(np.float32)
    W3 = np.zeros((S * 4 * C2, S * C3), np.float32)
    for s in range(S):
        W3[s * 4 * C2:(s + 1) * 4 * C2, s * C3:(s + 1) * C3] = c3w_r[s]
    b3 = c3b.reshape(1, S * C3)

    # fused actor|critic heads, block-diagonal across skills.
    a1w = np.asarray(params["a1w"]); a1b = np.asarray(params["a1b"])
    a2w = np.asarray(params["a2w"]); a2b = np.asarray(params["a2b"])
    v1w = np.asarray(params["v1w"]); v1b = np.asarray(params["v1b"])
    v2w = np.asarray(params["v2w"]); v2b = np.asarray(params["v2b"])

    Wh1 = np.zeros((S * C3, S * 128), np.float32)             # (256, 512)
    for s in range(S):
        Wh1[s * C3:(s + 1) * C3, s * 128:s * 128 + 64] = a1w[s]
        Wh1[s * C3:(s + 1) * C3, s * 128 + 64:(s + 1) * 128] = v1w[s]
    bh1 = np.concatenate([a1b, v1b], axis=-1).reshape(1, S * 128)

    Wh2 = np.zeros((S * 128, S * OUT_W), np.float32)          # (512, 32)
    for s in range(S):
        Wh2[s * 128:s * 128 + 64, s * OUT_W:s * OUT_W + N_ACTIONS] = a2w[s]
        Wh2[s * 128 + 64:(s + 1) * 128, s * OUT_W + N_ACTIONS:(s + 1) * OUT_W] = v2w[s]
    bh2 = np.concatenate([a2b, v2b], axis=-1).reshape(1, S * OUT_W)

    to_w = lambda a: jnp.asarray(a, jnp.bfloat16)   # weights resident in bf16
    to_b = lambda a: jnp.asarray(a, jnp.float32)    # biases stay f32 (VPU work)
    return dict(w1=to_w(W1), b1=to_b(b1), w2=to_w(W2), b2=to_b(b2),
                w3=to_w(W3), b3=to_b(b3), wh1=to_w(Wh1), bh1=to_b(bh1),
                wh2=to_w(Wh2), bh2=to_b(bh2))


# ----------------------------------------------------------------------------
# Pallas kernel: one grid step = one batch tile of TB rows.  All fused weights
# are VMEM-resident (constant block index); skills selected by a one-hot mix.
# ----------------------------------------------------------------------------
def planner_kernel(img_ref, sk_ref,
                   w1_ref, b1_ref, w2_ref, b2_ref, w3_ref, b3_ref,
                   wh1_ref, bh1_ref, wh2_ref, bh2_ref,
                   out_ref):
    f32 = jnp.float32
    bf16 = jnp.bfloat16
    x = img_ref[...]                      # (TB, 147) f32
    sk = sk_ref[...]                      # (TB, 1)   int32
    tb = x.shape[0]

    # conv1: one wide matmul over all 4 pool taps x 4 skills.
    h = jnp.dot(x.astype(bf16), w1_ref[...], preferred_element_type=f32)   # (TB, 2304)
    # 2x2 max-pool = elementwise max over the 4 tap chunks (tap-major layout),
    # then a single bias+ReLU on the pooled activations (pure VPU).
    m = jnp.maximum(jnp.maximum(h[:, 0 * CONV1_N:1 * CONV1_N],
                                h[:, 1 * CONV1_N:2 * CONV1_N]),
                    jnp.maximum(h[:, 2 * CONV1_N:3 * CONV1_N],
                                h[:, 3 * CONV1_N:4 * CONV1_N]))
    m = jnp.maximum(m + b1_ref[...], 0.0)                                   # (TB, 576)

    # conv2 / conv3 / head1 / head2: block-diagonal across skills.
    z2 = jnp.maximum(jnp.dot(m.astype(bf16), w2_ref[...],
                             preferred_element_type=f32) + b2_ref[...], 0.0)   # (TB, 512)
    emb = jnp.maximum(jnp.dot(z2.astype(bf16), w3_ref[...],
                              preferred_element_type=f32) + b3_ref[...], 0.0)  # (TB, 256)
    hh = jnp.tanh(jnp.dot(emb.astype(bf16), wh1_ref[...],
                          preferred_element_type=f32) + bh1_ref[...])          # (TB, 512)
    y = jnp.dot(hh.astype(bf16), wh2_ref[...],
                preferred_element_type=f32) + bh2_ref[...]                     # (TB, 32)

    # Per-row skill selection: one-hot mix of the 4 per-skill (TB,8) chunks.
    # NOTE: skill ids outside [0, NUM_SKILLS) yield zeros here (see wrapper note).
    y_mix = jnp.zeros((tb, OUT_W), f32)
    for s in range(NUM_SKILLS):
        y_mix = y_mix + (sk == s).astype(f32) * y[:, s * OUT_W:(s + 1) * OUT_W]

    # log-softmax over the 7 logit columns; column 7 (value) passes through.
    col = jax.lax.broadcasted_iota(jnp.int32, (tb, OUT_W), 1)
    is_logit = col < N_ACTIONS
    masked = jnp.where(is_logit, y_mix, jnp.float32(-1e30))
    mmax = jnp.max(masked, axis=-1, keepdims=True)
    p = jnp.exp(masked - mmax)            # value column -> exp(-1e30 - mmax) == 0
    lse = jnp.log(jnp.sum(p, axis=-1, keepdims=True)) + mmax
    out_ref[...] = jnp.where(is_logit, y_mix - lse, y_mix)


# ----------------------------------------------------------------------------
# Wrapper (glue: batch padding/tiling, spec construction).
# `fused` must come from fuse_params(params) — hoisted so the numpy fusion and
# the host->device weight upload happen once per parameter set, not per call.
# ----------------------------------------------------------------------------
def _choose_batch_tile(B, tile):
    B8 = _round_up(B, 8)
    if B8 <= 8:
        return 8
    # Keep at least 2 grid steps (so the "parallel" batch axis can shard across
    # v7x's 2 TensorCores) while still amortizing per-step overhead on v5e/v6e.
    half = _round_up((B8 + 1) // 2, 8)
    return max(8, min(tile, half))


def planner_forward(fused, obs_image, memory, skills, tile=512):
    B, H, W, C = obs_image.shape
    assert (H, W, C) == (IMG_H, IMG_W, IMG_C)

    TB = _choose_batch_tile(B, tile)
    B_pad = _round_up(B, TB)

    x = obs_image.reshape(B, H * W * C).astype(jnp.float32)
    sk = skills.astype(jnp.int32).reshape(B, 1)
    if B_pad != B:
        x = jnp.pad(x, ((0, B_pad - B), (0, 0)))
        sk = jnp.pad(sk, ((0, B_pad - B), (0, 0)), constant_values=-1)  # padded rows inert

    def tile_spec(last):
        return pl.BlockSpec((TB, last), lambda b: (b, 0))

    def resident_spec(arr):
        # Full-array block with a constant index map: fetched once, stays in VMEM.
        return pl.BlockSpec(arr.shape, lambda b: (0, 0))

    in_specs = [
        tile_spec(H * W * C),                      # image tile (the only streamed input)
        tile_spec(1),                              # per-row skill ids
        resident_spec(fused["w1"]), resident_spec(fused["b1"]),
        resident_spec(fused["w2"]), resident_spec(fused["b2"]),
        resident_spec(fused["w3"]), resident_spec(fused["b3"]),
        resident_spec(fused["wh1"]), resident_spec(fused["bh1"]),
        resident_spec(fused["wh2"]), resident_spec(fused["bh2"]),
    ]

    out = pl.pallas_call(
        planner_kernel,
        out_shape=jax.ShapeDtypeStruct((B_pad, OUT_W), jnp.float32),
        grid=(B_pad // TB,),
        in_specs=in_specs,
        out_specs=pl.BlockSpec((TB, OUT_W), lambda b: (b, 0)),
        compiler_params=pltpu.CompilerParams(
            dimension_semantics=("parallel",),
            vmem_limit_bytes=48 * 1024 * 1024),
    )(x, sk, fused["w1"], fused["b1"], fused["w2"], fused["b2"],
      fused["w3"], fused["b3"], fused["wh1"], fused["bh1"],
      fused["wh2"], fused["bh2"])

    logits = out[:B, :N_ACTIONS]
    values = out[:B, N_ACTIONS]
    # use_memory=False / use_text=False: memories are passed through unchanged.
    return logits, values, memory


# ----------------------------------------------------------------------------
# Deterministic synthetic parameters for the 4 skill ACModels.
# ----------------------------------------------------------------------------
def init_params(key):
    def dense(k, shape, fan_in):
        return jax.random.normal(k, shape, jnp.float32) / np.sqrt(fan_in)

    ks = jax.random.split(key, 14)
    S, A = NUM_SKILLS, N_ACTIONS
    return {
        "c1w": dense(ks[0], (S, 4, IMG_C, 16), 4 * IMG_C),
        "c1b": dense(ks[1], (S, 1, 16), 4 * IMG_C),
        "c2w": dense(ks[2], (S, 4, 16, 32), 4 * 16),
        "c2b": dense(ks[3], (S, 1, 32), 4 * 16),
        "c3w": dense(ks[4], (S, 4, 32, 64), 4 * 32),
        "c3b": dense(ks[5], (S, 1, 64), 4 * 32),
        "a1w": dense(ks[6], (S, 64, 64), 64),
        "a1b": dense(ks[7], (S, 1, 64), 64),
        "a2w": dense(ks[8], (S, 64, A), 64),
        "a2b": dense(ks[9], (S, 1, A), 64),
        "v1w": dense(ks[10], (S, 64, 64), 64),
        "v1b": dense(ks[11], (S, 1, 64), 64),
        "v2w": dense(ks[12], (S, 64, 1), 64),
        "v2b": dense(ks[13], (S, 1, 1), 64),
    }


# ----------------------------------------------------------------------------
# Pure-JAX reference (per-element, matches PyTorch ACModel semantics).
# ----------------------------------------------------------------------------
def ref_forward(params, obs_image, skills):
    B = obs_image.shape[0]
    skills_np = np.asarray(skills)
    logits_all, values_all = [], []

    def conv(x, w4, bias):
        # w4: (4, Cin, Cout), tap k = kh*2 + kw  ->  HWIO weight (2,2,Cin,Cout)
        w = w4.reshape(2, 2, w4.shape[1], w4.shape[2])
        y = jax.lax.conv_general_dilated(
            x, w, (1, 1), "VALID", dimension_numbers=("NHWC", "HWIO", "NHWC"))
        return jax.nn.relu(y + bias.reshape(1, 1, 1, -1))

    for b in range(B):
        s = int(skills_np[b])
        x = obs_image[b:b + 1].astype(jnp.float32)            # (1,7,7,3)
        h = conv(x, params["c1w"][s], params["c1b"][s])        # (1,6,6,16)
        h = h.reshape(1, 3, 2, 3, 2, 16).max(axis=(2, 4))      # (1,3,3,16)
        h = conv(h, params["c2w"][s], params["c2b"][s])        # (1,2,2,32)
        h = conv(h, params["c3w"][s], params["c3b"][s])        # (1,1,1,64)
        emb = h.reshape(1, 64)
        a = jnp.tanh(emb @ params["a1w"][s] + params["a1b"][s])
        lg = jax.nn.log_softmax(a @ params["a2w"][s] + params["a2b"][s], axis=-1)
        c = jnp.tanh(emb @ params["v1w"][s] + params["v1b"][s])
        v = (c @ params["v2w"][s] + params["v2b"][s])[:, 0]
        logits_all.append(lg)
        values_all.append(v)
    return jnp.concatenate(logits_all, 0), jnp.concatenate(values_all, 0)


# ----------------------------------------------------------------------------
if __name__ == "__main__":
    key = jax.random.PRNGKey(0)
    k_img, k_sk, k_par = jax.random.split(key, 3)

    num_envs, n_steps = 2, 2
    B = num_envs * n_steps                                    # flattened obs batch
    obs_image = jax.random.uniform(k_img, (B, IMG_H, IMG_W, IMG_C),
                                   jnp.float32, 0.0, 1.0)
    # TODO(synk): skill routing normally comes from gpt/llama/human planning +
    # vocab validation + cooldown timer; here it is a deterministic synthetic int array.
    skills = jax.random.randint(k_sk, (B,), 0, NUM_SKILLS, jnp.int32)
    memory = jnp.zeros((B, 2 * 64), jnp.float32)              # memory_size = 2*64

    params = init_params(k_par)
    fused = fuse_params(params)       # hoisted: fuse + upload once per param set

    logits, values, mem_out = planner_forward(fused, obs_image, memory, skills)
    jax.block_until_ready((logits, values, mem_out))

    ref_logits, ref_values = ref_forward(params, obs_image, skills)
    # Tolerance reflects bf16 MXU passes (explicit bf16 weights in the kernel;
    # default TPU matmul precision in the reference), not a kernel approximation.
    assert np.allclose(np.asarray(logits), np.asarray(ref_logits),
                       atol=5e-2, rtol=5e-2), "logits mismatch vs reference"
    assert np.allclose(np.asarray(values), np.asarray(ref_values),
                       atol=5e-2, rtol=5e-2), "values mismatch vs reference"
    assert mem_out.shape == memory.shape

    print("KERNEL_OK")
</pallas_src>

<mosaic_0001>
module attributes {stable_mosaic.version = 11 : i64} {
  func.func @planner_kernel(%arg0: i32, %arg1: memref<8x147xf32, #tpu.memory_space<vmem>>, %arg2: memref<8x1xi32, #tpu.memory_space<vmem>>, %arg3: memref<147x2304xbf16, #tpu.memory_space<vmem>>, %arg4: memref<1x576xf32, #tpu.memory_space<vmem>>, %arg5: memref<576x512xbf16, #tpu.memory_space<vmem>>, %arg6: memref<1x512xf32, #tpu.memory_space<vmem>>, %arg7: memref<512x256xbf16, #tpu.memory_space<vmem>>, %arg8: memref<1x256xf32, #tpu.memory_space<vmem>>, %arg9: memref<256x512xbf16, #tpu.memory_space<vmem>>, %arg10: memref<1x512xf32, #tpu.memory_space<vmem>>, %arg11: memref<512x32xbf16, #tpu.memory_space<vmem>>, %arg12: memref<1x32xf32, #tpu.memory_space<vmem>>, %arg13: memref<8x8xf32, #tpu.memory_space<vmem>>) attributes {dimension_semantics = [#tpu.dimension_semantics<parallel>], iteration_bounds = array<i64: 1>, scalar_prefetch = 0 : i64, scratch_operands = 0 : i64, tpu.core_type = #tpu.core_type<tc>, window_params = [{transform_indices = @transform_0, window_bounds = array<i64: 8, 147>}, {transform_indices = @transform_1, window_bounds = array<i64: 8, 1>}, {pipeline_mode = #tpu.pipeline_mode<synchronous>, transform_indices = @transform_2, window_bounds = array<i64: 147, 2304>}, {pipeline_mode = #tpu.pipeline_mode<synchronous>, transform_indices = @transform_3, window_bounds = array<i64: 1, 576>}, {pipeline_mode = #tpu.pipeline_mode<synchronous>, transform_indices = @transform_4, window_bounds = array<i64: 576, 512>}, {pipeline_mode = #tpu.pipeline_mode<synchronous>, transform_indices = @transform_5, window_bounds = array<i64: 1, 512>}, {pipeline_mode = #tpu.pipeline_mode<synchronous>, transform_indices = @transform_6, window_bounds = array<i64: 512, 256>}, {pipeline_mode = #tpu.pipeline_mode<synchronous>, transform_indices = @transform_7, window_bounds = array<i64: 1, 256>}, {pipeline_mode = #tpu.pipeline_mode<synchronous>, transform_indices = @transform_8, window_bounds = array<i64: 256, 512>}, {pipeline_mode = #tpu.pipeline_mode<synchronous>, transform_indices = @transform_9, window_bounds = array<i64: 1, 512>}, {pipeline_mode = #tpu.pipeline_mode<synchronous>, transform_indices = @transform_10, window_bounds = array<i64: 512, 32>}, {pipeline_mode = #tpu.pipeline_mode<synchronous>, transform_indices = @transform_11, window_bounds = array<i64: 1, 32>}, {transform_indices = @transform_12, window_bounds = array<i64: 8, 8>}]} {
    %c0 = arith.constant 0 : index
    %c0_0 = arith.constant 0 : index
    %0 = vector.load %arg1[%c0, %c0_0] : memref<8x147xf32, #tpu.memory_space<vmem>>, vector<8x147xf32>
    %c0_1 = arith.constant 0 : index
    %c0_2 = arith.constant 0 : index
    %1 = vector.load %arg2[%c0_1, %c0_2] : memref<8x1xi32, #tpu.memory_space<vmem>>, vector<8x1xi32>
    %2 = arith.truncf %0 : vector<8x147xf32> to vector<8x147xbf16>
    %c0_3 = arith.constant 0 : index
    %c0_4 = arith.constant 0 : index
    %3 = vector.load %arg3[%c0_3, %c0_4] : memref<147x2304xbf16, #tpu.memory_space<vmem>>, vector<147x2304xbf16>
    %cst = arith.constant dense<0.000000e+00> : vector<8x2304xf32>
    %4 = tpu.matmul %2, %3, %cst {dimension_numbers = #tpu.dot_dimension_numbers<[1], [0], [0], [1], [0, 0, 1, 1], [], []>} : vector<8x147xbf16>, vector<147x2304xbf16>, vector<8x2304xf32> -> vector<8x2304xf32>
    %5 = vector.extract_strided_slice %4 {offsets = [0, 0], sizes = [8, 576], strides = [1, 1]} : vector<8x2304xf32> to vector<8x576xf32>
    %6 = vector.extract_strided_slice %4 {offsets = [0, 576], sizes = [8, 576], strides = [1, 1]} : vector<8x2304xf32> to vector<8x576xf32>
    %7 = arith.maximumf %5, %6 : vector<8x576xf32>
    %8 = vector.extract_strided_slice %4 {offsets = [0, 1152], sizes = [8, 576], strides = [1, 1]} : vector<8x2304xf32> to vector<8x576xf32>
    %9 = vector.extract_strided_slice %4 {offsets = [0, 1728], sizes = [8, 576], strides = [1, 1]} : vector<8x2304xf32> to vector<8x576xf32>
    %10 = arith.maximumf %8, %9 : vector<8x576xf32>
    %11 = arith.maximumf %7, %10 : vector<8x576xf32>
    %c0_5 = arith.constant 0 : index
    %c0_6 = arith.constant 0 : index
    %12 = vector.load %arg4[%c0_5, %c0_6] : memref<1x576xf32, #tpu.memory_space<vmem>>, vector<1x576xf32>
    %13 = vector.broadcast %12 : vector<1x576xf32> to vector<8x576xf32>
    %14 = arith.addf %11, %13 : vector<8x576xf32>
    %cst_7 = arith.constant 0.000000e+00 : f32
    %15 = vector.broadcast %cst_7 : f32 to vector<8x576xf32>
    %16 = arith.maximumf %14, %15 : vector<8x576xf32>
    %17 = arith.truncf %16 : vector<8x576xf32> to vector<8x576xbf16>
    %c0_8 = arith.constant 0 : index
    %c0_9 = arith.constant 0 : index
    %18 = vector.load %arg5[%c0_8, %c0_9] : memref<576x512xbf16, #tpu.memory_space<vmem>>, vector<576x512xbf16>
    %cst_10 = arith.constant dense<0.000000e+00> : vector<8x512xf32>
    %19 = tpu.matmul %17, %18, %cst_10 {dimension_numbers = #tpu.dot_dimension_numbers<[1], [0], [0], [1], [0, 0, 1, 1], [], []>} : vector<8x576xbf16>, vector<576x512xbf16>, vector<8x512xf32> -> vector<8x512xf32>
    %c0_11 = arith.constant 0 : index
    %c0_12 = arith.constant 0 : index
    %20 = vector.load %arg6[%c0_11, %c0_12] : memref<1x512xf32, #tpu.memory_space<vmem>>, vector<1x512xf32>
    %21 = vector.broadcast %20 : vector<1x512xf32> to vector<8x512xf32>
    %22 = arith.addf %19, %21 : vector<8x512xf32>
    %cst_13 = arith.constant 0.000000e+00 : f32
    %23 = vector.broadcast %cst_13 : f32 to vector<8x512xf32>
    %24 = arith.maximumf %22, %23 : vector<8x512xf32>
    %25 = arith.truncf %24 : vector<8x512xf32> to vector<8x512xbf16>
    %c0_14 = arith.constant 0 : index
    %c0_15 = arith.constant 0 : index
    %26 = vector.load %arg7[%c0_14, %c0_15] : memref<512x256xbf16, #tpu.memory_space<vmem>>, vector<512x256xbf16>
    %cst_16 = arith.constant dense<0.000000e+00> : vector<8x256xf32>
    %27 = tpu.matmul %25, %26, %cst_16 {dimension_numbers = #tpu.dot_dimension_numbers<[1], [0], [0], [1], [0, 0, 1, 1], [], []>} : vector<8x512xbf16>, vector<512x256xbf16>, vector<8x256xf32> -> vector<8x256xf32>
    %c0_17 = arith.constant 0 : index
    %c0_18 = arith.constant 0 : index
    %28 = vector.load %arg8[%c0_17, %c0_18] : memref<1x256xf32, #tpu.memory_space<vmem>>, vector<1x256xf32>
    %29 = vector.broadcast %28 : vector<1x256xf32> to vector<8x256xf32>
    %30 = arith.addf %27, %29 : vector<8x256xf32>
    %cst_19 = arith.constant 0.000000e+00 : f32
    %31 = vector.broadcast %cst_19 : f32 to vector<8x256xf32>
    %32 = arith.maximumf %30, %31 : vector<8x256xf32>
    %33 = arith.truncf %32 : vector<8x256xf32> to vector<8x256xbf16>
    %c0_20 = arith.constant 0 : index
    %c0_21 = arith.constant 0 : index
    %34 = vector.load %arg9[%c0_20, %c0_21] : memref<256x512xbf16, #tpu.memory_space<vmem>>, vector<256x512xbf16>
    %cst_22 = arith.constant dense<0.000000e+00> : vector<8x512xf32>
    %35 = tpu.matmul %33, %34, %cst_22 {dimension_numbers = #tpu.dot_dimension_numbers<[1], [0], [0], [1], [0, 0, 1, 1], [], []>} : vector<8x256xbf16>, vector<256x512xbf16>, vector<8x512xf32> -> vector<8x512xf32>
    %c0_23 = arith.constant 0 : index
    %c0_24 = arith.constant 0 : index
    %36 = vector.load %arg10[%c0_23, %c0_24] : memref<1x512xf32, #tpu.memory_space<vmem>>, vector<1x512xf32>
    %37 = vector.broadcast %36 : vector<1x512xf32> to vector<8x512xf32>
    %38 = arith.addf %35, %37 : vector<8x512xf32>
    %39 = math.tanh %38 : vector<8x512xf32>
    %40 = arith.truncf %39 : vector<8x512xf32> to vector<8x512xbf16>
    %c0_25 = arith.constant 0 : index
    %c0_26 = arith.constant 0 : index
    %41 = vector.load %arg11[%c0_25, %c0_26] : memref<512x32xbf16, #tpu.memory_space<vmem>>, vector<512x32xbf16>
    %cst_27 = arith.constant dense<0.000000e+00> : vector<8x32xf32>
    %42 = tpu.matmul %40, %41, %cst_27 {dimension_numbers = #tpu.dot_dimension_numbers<[1], [0], [0], [1], [0, 0, 1, 1], [], []>} : vector<8x512xbf16>, vector<512x32xbf16>, vector<8x32xf32> -> vector<8x32xf32>
    %c0_28 = arith.constant 0 : index
    %c0_29 = arith.constant 0 : index
    %43 = vector.load %arg12[%c0_28, %c0_29] : memref<1x32xf32, #tpu.memory_space<vmem>>, vector<1x32xf32>
    %44 = vector.broadcast %43 : vector<1x32xf32> to vector<8x32xf32>
    %45 = arith.addf %42, %44 : vector<8x32xf32>
    %cst_30 = arith.constant 0.000000e+00 : f32
    %46 = vector.broadcast %cst_30 : f32 to vector<8x8xf32>
    %c0_i32 = arith.constant 0 : i32
    %47 = vector.broadcast %c0_i32 : i32 to vector<8x1xi32>
    %48 = arith.cmpi eq, %1, %47 : vector<8x1xi32>
    %49 = arith.extui %48 : vector<8x1xi1> to vector<8x1xi32>
    %50 = arith.sitofp %49 : vector<8x1xi32> to vector<8x1xf32>
    %51 = vector.extract_strided_slice %45 {offsets = [0, 0], sizes = [8, 8], strides = [1, 1]} : vector<8x32xf32> to vector<8x8xf32>
    %52 = vector.broadcast %50 : vector<8x1xf32> to vector<8x8xf32>
    %53 = arith.mulf %52, %51 : vector<8x8xf32>
    %54 = arith.addf %46, %53 : vector<8x8xf32>
    %c1_i32 = arith.constant 1 : i32
    %55 = vector.broadcast %c1_i32 : i32 to vector<8x1xi32>
    %56 = arith.cmpi eq, %1, %55 : vector<8x1xi32>
    %57 = arith.extui %56 : vector<8x1xi1> to vector<8x1xi32>
    %58 = arith.sitofp %57 : vector<8x1xi32> to vector<8x1xf32>
    %59 = vector.extract_strided_slice %45 {offsets = [0, 8], sizes = [8, 8], strides = [1, 1]} : vector<8x32xf32> to vector<8x8xf32>
    %60 = vector.broadcast %58 : vector<8x1xf32> to vector<8x8xf32>
    %61 = arith.mulf %60, %59 : vector<8x8xf32>
    %62 = arith.addf %54, %61 : vector<8x8xf32>
    %c2_i32 = arith.constant 2 : i32
    %63 = vector.broadcast %c2_i32 : i32 to vector<8x1xi32>
    %64 = arith.cmpi eq, %1, %63 : vector<8x1xi32>
    %65 = arith.extui %64 : vector<8x1xi1> to vector<8x1xi32>
    %66 = arith.sitofp %65 : vector<8x1xi32> to vector<8x1xf32>
    %67 = vector.extract_strided_slice %45 {offsets = [0, 16], sizes = [8, 8], strides = [1, 1]} : vector<8x32xf32> to vector<8x8xf32>
    %68 = vector.broadcast %66 : vector<8x1xf32> to vector<8x8xf32>
    %69 = arith.mulf %68, %67 : vector<8x8xf32>
    %70 = arith.addf %62, %69 : vector<8x8xf32>
    %c3_i32 = arith.constant 3 : i32
    %71 = vector.broadcast %c3_i32 : i32 to vector<8x1xi32>
    %72 = arith.cmpi eq, %1, %71 : vector<8x1xi32>
    %73 = arith.extui %72 : vector<8x1xi1> to vector<8x1xi32>
    %74 = arith.sitofp %73 : vector<8x1xi32> to vector<8x1xf32>
    %75 = vector.extract_strided_slice %45 {offsets = [0, 24], sizes = [8, 8], strides = [1, 1]} : vector<8x32xf32> to vector<8x8xf32>
    %76 = vector.broadcast %74 : vector<8x1xf32> to vector<8x8xf32>
    %77 = arith.mulf %76, %75 : vector<8x8xf32>
    %78 = arith.addf %70, %77 : vector<8x8xf32>
    %79 = tpu.iota {dimensions = array<i32: 1>} : vector<8x8xi32>
    %c7_i32 = arith.constant 7 : i32
    %80 = vector.broadcast %c7_i32 : i32 to vector<8x8xi32>
    %81 = arith.cmpi slt, %79, %80 : vector<8x8xi32>
    %cst_31 = arith.constant -1.000000e+30 : f32
    %82 = vector.broadcast %cst_31 : f32 to vector<8x8xf32>
    %83 = arith.select %81, %78, %82 : vector<8x8xi1>, vector<8x8xf32>
    %cst_32 = arith.constant dense<0xFF800000> : vector<8xf32>
    %84 = vector.multi_reduction <maximumf>, %83, %cst_32 [1] : vector<8x8xf32> to vector<8xf32>
    %85 = vector.shape_cast %84 : vector<8xf32> to vector<8x1xf32>
    %86 = vector.broadcast %85 : vector<8x1xf32> to vector<8x8xf32>
    %87 = arith.subf %83, %86 : vector<8x8xf32>
    %88 = math.exp %87 : vector<8x8xf32>
    %cst_33 = arith.constant dense<0.000000e+00> : vector<8xf32>
    %89 = vector.multi_reduction <add>, %88, %cst_33 [1] : vector<8x8xf32> to vector<8xf32>
    %90 = vector.shape_cast %89 : vector<8xf32> to vector<8x1xf32>
    %91 = math.log %90 : vector<8x1xf32>
    %92 = arith.addf %91, %85 : vector<8x1xf32>
    %93 = vector.broadcast %92 : vector<8x1xf32> to vector<8x8xf32>
    %94 = arith.subf %78, %93 : vector<8x8xf32>
    %95 = arith.select %81, %94, %78 : vector<8x8xi1>, vector<8x8xf32>
    %c0_34 = arith.constant 0 : index
    %c0_35 = arith.constant 0 : index
    %96 = vector.load %arg13[%c0_34, %c0_35] : memref<8x8xf32, #tpu.memory_space<vmem>>, vector<8x8xf32>
    tpu.vector_store %arg13[%c0_34, %c0_35], %95 {strides = array<i32>} : memref<8x8xf32, #tpu.memory_space<vmem>>, vector<8x8xf32>,
    return
  }
  func.func @transform_0(%arg0: i32) -> (i32, i32) {
    %c0_i32 = arith.constant 0 : i32
    %c0_i32_0 = arith.constant 0 : i32
    return %arg0, %c0_i32 : i32, i32
  }
  func.func @transform_1(%arg0: i32) -> (i32, i32) {
    %c0_i32 = arith.constant 0 : i32
    %c0_i32_0 = arith.constant 0 : i32
    return %arg0, %c0_i32 : i32, i32
  }
  func.func @transform_2(%arg0: i32) -> (i32, i32) {
    %c0_i32 = arith.constant 0 : i32
    %c0_i32_0 = arith.constant 0 : i32
    %c0_i32_1 = arith.constant 0 : i32
    return %c0_i32, %c0_i32_0 : i32, i32
  }
  func.func @transform_3(%arg0: i32) -> (i32, i32) {
    %c0_i32 = arith.constant 0 : i32
    %c0_i32_0 = arith.constant 0 : i32
    %c0_i32_1 = arith.constant 0 : i32
    return %c0_i32, %c0_i32_0 : i32, i32
  }
  func.func @transform_4(%arg0: i32) -> (i32, i32) {
    %c0_i32 = arith.constant 0 : i32
    %c0_i32_0 = arith.constant 0 : i32
    %c0_i32_1 = arith.constant 0 : i32
    return %c0_i32, %c0_i32_0 : i32, i32
  }
  func.func @transform_5(%arg0: i32) -> (i32, i32) {
    %c0_i32 = arith.constant 0 : i32
    %c0_i32_0 = arith.constant 0 : i32
    %c0_i32_1 = arith.constant 0 : i32
    return %c0_i32, %c0_i32_0 : i32, i32
  }
  func.func @transform_6(%arg0: i32) -> (i32, i32) {
    %c0_i32 = arith.constant 0 : i32
    %c0_i32_0 = arith.constant 0 : i32
    %c0_i32_1 = arith.constant 0 : i32
    return %c0_i32, %c0_i32_0 : i32, i32
  }
  func.func @transform_7(%arg0: i32) -> (i32, i32) {
    %c0_i32 = arith.constant 0 : i32
    %c0_i32_0 = arith.constant 0 : i32
    %c0_i32_1 = arith.constant 0 : i32
    return %c0_i32, %c0_i32_0 : i32, i32
  }
  func.func @transform_8(%arg0: i32) -> (i32, i32) {
    %c0_i32 = arith.constant 0 : i32
    %c0_i32_0 = arith.constant 0 : i32
    %c0_i32_1 = arith.constant 0 : i32
    return %c0_i32, %c0_i32_0 : i32, i32
  }
  func.func @transform_9(%arg0: i32) -> (i32, i32) {
    %c0_i32 = arith.constant 0 : i32
    %c0_i32_0 = arith.constant 0 : i32
    %c0_i32_1 = arith.constant 0 : i32
    return %c0_i32, %c0_i32_0 : i32, i32
  }
  func.func @transform_10(%arg0: i32) -> (i32, i32) {
    %c0_i32 = arith.constant 0 : i32
    %c0_i32_0 = arith.constant 0 : i32
    %c0_i32_1 = arith.constant 0 : i32
    return %c0_i32, %c0_i32_0 : i32, i32
  }
  func.func @transform_11(%arg0: i32) -> (i32, i32) {
    %c0_i32 = arith.constant 0 : i32
    %c0_i32_0 = arith.constant 0 : i32
    %c0_i32_1 = arith.constant 0 : i32
    return %c0_i32, %c0_i32_0 : i32, i32
  }
  func.func @transform_12(%arg0: i32) -> (i32, i32) {
    %c0_i32 = arith.constant 0 : i32
    %c0_i32_0 = arith.constant 0 : i32
    return %arg0, %c0_i32 : i32, i32
  }
}

</mosaic_0001>

<bundles_post_ra>
// kernel: tpu_custom_call.1
= control target key start
LH: loop header
LB: loop body
LE: loop exit
PB: predicated region body
PF: predicated region fallthrough
CT: control target
= control target key end

     0   :  { %17 = vsyncpa [#allocation3], 0  ;;  %s7284_s0 = inlined_call_operand.vmem [shape: f32[8,147], index: 0, kind: input, shape index: {}]   ;;  %s7285_s1 = inlined_call_operand.vmem [shape: s32[8,1], index: 1, kind: input, shape index: {}]   ;;  %s7286_s2 = inlined_call_operand.hbm [shape: bf16[147,2304], index: 2, kind: input, shape index: {}]   ;;  %s7287_s3 = inlined_call_operand.vmem [shape: f32[1,576], index: 3, kind: input, shape index: {}]   ;;  %s7288_s4 = inlined_call_operand.hbm [shape: bf16[576,512], index: 4, kind: input, shape index: {}]   ;;  %s7289_s5 = inlined_call_operand.vmem [shape: f32[1,512], index: 5, kind: input, shape index: {}]   ;;  %s7290_s6 = inlined_call_operand.hbm [shape: bf16[512,256], index: 6, kind: input, shape index: {}]   ;;  %s7291_s7 = inlined_call_operand.vmem [shape: f32[1,256], index: 7, kind: input, shape index: {}]   ;;  %s7292_s8 = inlined_call_operand.hbm [shape: bf16[256,512], index: 8, kind: input, shape index: {}]   ;;  %s7293_s9 = inlined_call_operand.vmem [shape: f32[1,512], index: 9, kind: input, shape index: {}]   ;;  %s7294_s10 = inlined_call_operand.vmem [shape: bf16[512,32], index: 10, kind: input, shape index: {}]   ;;  %s7295_s11 = inlined_call_operand.vmem [shape: f32[1,32], index: 11, kind: input, shape index: {}]   ;;  %s7296_s12 = inlined_call_operand.hbm [shape: f32[8,8], index: 12, kind: output, shape index: {}]  }
   0x1   :  { %18 = vsyncpa [#allocation6], 0 }
   0x2   :  { %19 = vsyncpa [#allocation9], 0  ;;  %s44_s23 = sshll.u32 %s7288_s4, 4  ;;  %s45_s23 = int_to_ptr.hbm [resolvable:$true] %s44_s23 }
   0x3   :  { %20 = vsyncpa [#allocation4], 0  ;;  %s6833_s24 = smov [#allocation5]   ;;  %s29_s28 = sshll.u32 %s7286_s2, 4  ;;  %s30_s28 = int_to_ptr.hbm [resolvable:$true] %s29_s28 }
   0x4   :  { %s46_s25 = sshll.u32 %s6833_s24, 4  ;;  %s6834_s29 = smov 256   ;;  %s47_s25 = int_to_ptr.vmem [resolvable:$true] %s46_s25 }
   0x5   :  { %s6835_s30 = smov 16   ;;  %s6836_s13 = smov [#allocation2]  }
   0x6   :  { %52 = dma.hbm_to_vmem [thread:$0]  %s45_s23, 18432, %s47_s25, [#allocation6], %s6834_s29, %s6834_s29, %s6835_s30  }
   0x7   :  { %s31_s14 = sshll.u32 %s6836_s13, 4  ;;  %s6837_s15 = smov 1152   ;;  %s32_s14 = int_to_ptr.vmem [resolvable:$true] %s31_s14 }
   0x8   :  { %s6838_s16 = smov 72   ;;  %s59_s18 = sshll.u32 %s7290_s6, 4  ;;  %s60_s18 = int_to_ptr.hbm [resolvable:$true] %s59_s18 }
   0x9   :  { %37 = dma.hbm_to_vmem [thread:$0]  %s30_s28, 21888, %s32_s14, [#allocation3], %s6837_s15, %s6837_s15, %s6838_s16  }
   0xa   :  { %s6839_s19 = smov [#allocation7]   ;;  %s74_s22 = sshll.u32 %s7292_s8, 4  ;;  %s75_s22 = int_to_ptr.hbm [resolvable:$true] %s74_s22 }
   0xb   :  { %s61_s20 = sshll.u32 %s6839_s19, 4  ;;  %s6840_s23 = smov 128   ;;  %s62_s20 = int_to_ptr.vmem [resolvable:$true] %s61_s20 }
   0xc   :  { %s6841_s24 = smov 8   ;;  %s6842_s25 = smov [#allocation8]  }
   0xd   :  { %67 = dma.hbm_to_vmem [thread:$0]  %s60_s18, 8192, %s62_s20, [#allocation6], %s6840_s23, %s6840_s23, %s6841_s24  }
   0xe   :  { %s76_s26 = sshll.u32 %s6842_s25, 4  ;;  %s77_s26 = int_to_ptr.vmem [resolvable:$true] %s76_s26 }
   0xf   :  { %82 = dma.hbm_to_vmem [thread:$0]  %s75_s22, 8192, %s77_s26, [#allocation9], %s6834_s29, %s6834_s29, %s6835_s30  }
  0x10   :  { %6825 = dma.done.wait [#allocation3], 21888  }
  0x11   :  { %6826 = vsyncadd [#allocation3], 4294945408 }
  0x12   :  { %6827 = dma.done.wait [#allocation6], 26624  }
  0x13   :  { %6828 = vsyncadd [#allocation6], 4294940672 }
  0x14   :  { %6829 = dma.done.wait [#allocation9], 8192  }
  0x15   :  { %6830 = vsyncadd [#allocation9], 4294959104  ;;  %vm1141_vm0 = vcmask 1040384   ;;  %vm1142_vm1 = vcmask 1041408   ;;  %v6843_v0 = vmov 65535   ;;  %v107_v41 = vld [vmem:[%s7284_s0 + $0x8] sm:$0xff] }
  0x16   :  { %v1143_v1 = vsel %vm1141_vm0, 4294967295, %v6843_v0  ;;  %v4816_v2 = vld [vmem:[#allocation2 + $0x3f0] sm:$0xf]  ;;  %v6335_v3 = vld [vmem:[#allocation2 + $0x434] sm:$0xf0]  ;;  %v6940_v52 = vpack.c.bf16 %v107_v41, %v107_v41  ;;  %vm1137_vm2 = vcmask 154624  }
  0x17   :  { %v6326_v4 = vld [vmem:[#allocation2 + $0x3f4] sm:$0xf]  ;;  %v4817_v5 = vor.u32 %v6335_v3, %v4816_v2  ;;  %v4818_v6 = vld [vmem:[#allocation2 + $0x438] sm:$0xf0]  ;;  %v4744_v7 = vld [vmem:[#allocation2 + $0x360] sm:$0xf] }
  0x18   :  { %v6317_v8 = vld [vmem:[#allocation2 + $0x3a4] sm:$0xf0]  ;;  %v4821_v9 = vor.u32 %v6326_v4, %v4818_v6  ;;  %v273_v10 = vld [vmem:[#allocation2 + $0x510] sm:$0x33]  ;;  %v6308_v11 = vld [vmem:[#allocation2 + $0x364] sm:$0xf] }
  0x19   :  { %v4746_v12 = vld [vmem:[#allocation2 + $0x3a8] sm:$0xf0]  ;;  %1199 = vmatpush.bf16.msra.mxu0 %v4817_v5  ;;  %v4745_v13 = vor.u32 %v6317_v8, %v4744_v7  ;;  %v777_v14 = vunpack.c.l.b16 %v273_v10  ;;  %v6929_v15 = vsel %vm1142_vm1, %v1143_v1, 0  ;;  %v778_v16 = vunpack.c.h.b16 %v273_v10  ;;  %v4672_v18 = vld [vmem:[#allocation2 + $0x2d0] sm:$0xf]  ;;  %s6847_s6 = smov 112  }
  0x1a   :  { %1225 = vmatpush.bf16.msra.mxu2 %v4821_v9  ;;  %v4749_v17 = vor.u32 %v6308_v11, %v4746_v12  ;;  %v6299_v19 = vld [vmem:[#allocation2 + $0x314] sm:$0xf0]  ;;  %v4888_v20 = vld [vmem:[#allocation2 + $0x480] sm:$0xf]  ;;  %v6353_v23 = vld [vmem:[#allocation2 + $0x4c4] sm:$0xf0] }
  0x1b   :  { %v957_v21 = vpack.c.b16 %v777_v14, %v777_v14  ;;  %v958_v22 = vpack.c.b16 %v778_v16, %v778_v16  ;;  %v6290_v24 = vld [vmem:[#allocation2 + $0x2d4] sm:$0xf]  ;;  %v4674_v25 = vld [vmem:[#allocation2 + $0x318] sm:$0xf0]  ;;  %v6344_v26 = vld [vmem:[#allocation2 + $0x484] sm:$0xf]  ;;  %v4673_v31 = vor.u32 %v6299_v19, %v4672_v18  ;;  %v4889_v38 = vor.u32 %v6353_v23, %v4888_v20 }
  0x1c   :  { %v4890_v27 = vld [vmem:[#allocation2 + $0x4c8] sm:$0xf0]  ;;  %v6931_v28 = vld [vmem:[#allocation2 + $0x518] sm:$0x33]  ;;  %v6336_v33 = vld [vmem:[#allocation2 + $0x43c] sm:$0xf0]  ;;  %v4677_v35 = vor.u32 %v6290_v24, %v4674_v25 }
  0x1d   :  { %1200 = vmatpush.bf16.msra.mxu0 %v4745_v13  ;;  %v1146_v29 = vand.u32 %v6929_v15, %v957_v21  ;;  %v1149_v30 = vand.u32 %v6929_v15, %v958_v22  ;;  %v4824_v32 = vld [vmem:[#allocation2 + $0x3f8] sm:$0xf]  ;;  %v779_v34 = vunpack.c.l.b16 %v6931_v28  ;;  %v4600_v36 = vld [vmem:[#allocation2 + $0x240] sm:$0xf]  ;;  %v6281_v37 = vld [vmem:[#allocation2 + $0x284] sm:$0xf0]  ;;  %v4893_v39 = vor.u32 %v6344_v26, %v4890_v27 }
  0x1e   :  { %1226 = vmatpush.bf16.msra.mxu2 %v4749_v17  ;;  %v6272_v42 = vld [vmem:[#allocation2 + $0x244] sm:$0xf]  ;;  %v4602_v43 = vld [vmem:[#allocation2 + $0x288] sm:$0xf0]  ;;  %v4825_v44 = vor.u32 %v6336_v33, %v4824_v32  ;;  %v4752_v45 = vld [vmem:[#allocation2 + $0x368] sm:$0xf]  ;;  %v4601_v48 = vor.u32 %v6281_v37, %v4600_v36  ;;  %v780_v19 = vunpack.c.h.b16 %v6931_v28 }
  0x1f   :  { %1218 = vmatpush.bf16.msra.mxu1 %v1146_v29  ;;  %1244 = vmatpush.bf16.msra.mxu3 %v1149_v30  ;;  %v959_v40 = vpack.c.b16 %v779_v34, %v779_v34  ;;  %v6318_v46 = vld [vmem:[#allocation2 + $0x3ac] sm:$0xf0]  ;;  %v4896_v49 = vld [vmem:[#allocation2 + $0x488] sm:$0xf]  ;;  %v6327_v51 = vld [vmem:[#allocation2 + $0x3fc] sm:$0xf]  ;;  %v4605_v53 = vor.u32 %v6272_v42, %v4602_v43 }
  0x20   :  { %v6354_v50 = vld [vmem:[#allocation2 + $0x4cc] sm:$0xf0]  ;;  %v4826_v54 = vld [vmem:[#allocation2 + $0x440] sm:$0xf0]  ;;  %v6263_v56 = vld [vmem:[#allocation2 + $0x1f4] sm:$0xf0]  ;;  %v4753_v59 = vor.u32 %v6318_v46, %v4752_v45  ;;  %v960_v33 = vpack.c.b16 %v780_v19, %v780_v19 }
  0x21   :  { %1201 = vmatpush.bf16.msra.mxu0 %v4673_v31  ;;  %v1152_v47 = vand.u32 %v6929_v15, %v959_v40  ;;  %v4528_v55 = vld [vmem:[#allocation2 + $0x1b0] sm:$0xf]  ;;  %v6254_v57 = vld [vmem:[#allocation2 + $0x1b4] sm:$0xf]  ;;  %v4530_v58 = vld [vmem:[#allocation2 + $0x1f8] sm:$0xf0]  ;;  %v4897_v60 = vor.u32 %v6354_v50, %v4896_v49  ;;  %v4829_v61 = vor.u32 %v6327_v51, %v4826_v54 }
  0x22   :  { %1227 = vmatpush.bf16.msra.mxu2 %v4677_v35  ;;  %v4529_v62 = vor.u32 %v6263_v56, %v4528_v55  ;;  %v4680_v63 = vld [vmem:[#allocation2 + $0x2d8] sm:$0xf]  ;;  %v6300_v0 = vld [vmem:[#allocation2 + $0x31c] sm:$0xf0]  ;;  %v6309_v1 = vld [vmem:[#allocation2 + $0x36c] sm:$0xf]  ;;  %v4533_v2 = vor.u32 %v6254_v57, %v4530_v58  ;;  %v1155_v46 = vand.u32 %v6929_v15, %v960_v33 }
  0x23   :  { %1219 = vmatpush.bf16.msra.mxu1 %v4889_v38  ;;  %1245 = vmatpush.bf16.msra.mxu3 %v4893_v39  ;;  %v4754_v3 = vld [vmem:[#allocation2 + $0x3b0] sm:$0xf0]  ;;  %v4456_v4 = vld [vmem:[#allocation2 + $0x120] sm:$0xf]  ;;  %v6245_v5 = vld [vmem:[#allocation2 + $0x164] sm:$0xf0]  ;;  %v4681_v8 = vor.u32 %v6300_v0, %v4680_v63 }
  0x24   :  { %v6236_v6 = vld [vmem:[#allocation2 + $0x124] sm:$0xf]  ;;  %v4458_v7 = vld [vmem:[#allocation2 + $0x168] sm:$0xf0]  ;;  %v4757_v9 = vor.u32 %v6309_v1, %v4754_v3  ;;  %v4457_v10 = vor.u32 %v6245_v5, %v4456_v4  ;;  %v4608_v11 = vld [vmem:[#allocation2 + $0x248] sm:$0xf] }
  0x25   :  { %1202 = vmatpush.bf16.msra.mxu0 %v4601_v48  ;;  %v6282_v12 = vld [vmem:[#allocation2 + $0x28c] sm:$0xf0]  ;;  %v6291_v13 = vld [vmem:[#allocation2 + $0x2dc] sm:$0xf]  ;;  %v4461_v14 = vor.u32 %v6236_v6, %v4458_v7  ;;  %v4682_v16 = vld [vmem:[#allocation2 + $0x320] sm:$0xf0] }
  0x26   :  { %4959 = vmatmul.msk.bf16.vlgmr.msra.gmra.mxu3 %vm1137_vm2, %v6940_v52  ;;  %1228 = vmatpush.bf16.msra.mxu2 %v4605_v53  ;;  %v4384_v17 = vld [vmem:[#allocation2 + $0x90] sm:$0xf]  ;;  %v6227_v18 = vld [vmem:[#allocation2 + $0xd4] sm:$0xf0]  ;;  %v6218_v20 = vld [vmem:[#allocation2 + $0x94] sm:$0xf]  ;;  %v4609_v22 = vor.u32 %v6282_v12, %v4608_v11  ;;  %v4685_v23 = vor.u32 %v6291_v13, %v4682_v16 }
  0x27   :  { %1251 = vmatpush.bf16.msrb.mxu1 %v4825_v44  ;;  %1270 = vmatpush.bf16.msrb.mxu3 %v1152_v47  ;;  %v4386_v21 = vld [vmem:[#allocation2 + $0xd8] sm:$0xf0]  ;;  %v4385_v24 = vor.u32 %v6227_v18, %v4384_v17  ;;  %v4536_v25 = vld [vmem:[#allocation2 + $0x1b8] sm:$0xf]  ;;  %v6264_v26 = vld [vmem:[#allocation2 + $0x1fc] sm:$0xf0] }
  0x28   :  { %4958 = vmatmul.msk.bf16.vlgmr.msra.gmra.mxu1 %vm1137_vm2, %v6940_v52  ;;  %v6273_v27 = vld [vmem:[#allocation2 + $0x24c] sm:$0xf]  ;;  %v4389_v29 = vor.u32 %v6218_v20, %v4386_v21  ;;  %v4610_v30 = vld [vmem:[#allocation2 + $0x290] sm:$0xf0]  ;;  %v4312_v31 = vld [vmem:[#allocation2] sm:$0xf]  ;;  %v4537_v28 = vor.u32 %v6264_v26, %v4536_v25 }
  0x29   :  { %1203 = vmatpush.bf16.msra.mxu0 %v4529_v62  ;;  %v6209_v32 = vld [vmem:[#allocation2 + $0x44] sm:$0xf0]  ;;  %v6200_v34 = vld [vmem:[#allocation2 + $0x4] sm:$0xf]  ;;  %v4314_v35 = vld [vmem:[#allocation2 + $0x48] sm:$0xf0]  ;;  %v4613_v38 = vor.u32 %v6273_v27, %v4610_v30 }
  0x2a   :  { %1229 = vmatpush.bf16.msra.mxu2 %v4533_v2  ;;  %v4832_v36 = vld [vmem:[#allocation2 + $0x400] sm:$0xf]  ;;  %v6337_v37 = vld [vmem:[#allocation2 + $0x444] sm:$0xf0]  ;;  %v4313_v39 = vor.u32 %v6209_v32, %v4312_v31  ;;  %v6246_v41 = vld [vmem:[#allocation2 + $0x16c] sm:$0xf0]  ;;  %v4317_v43 = vor.u32 %v6200_v34, %v4314_v35 }
  0x2b   :  { %1252 = vmatpush.bf16.msrb.mxu1 %v4753_v59  ;;  %1271 = vmatpush.bf16.msrb.mxu3 %v4897_v60  ;;  %v4464_v40 = vld [vmem:[#allocation2 + $0x128] sm:$0xf]  ;;  %v106_v42 = vld [vmem:[%s7284_s0] sm:$0xff]  ;;  %v6255_v44 = vld [vmem:[#allocation2 + $0x1bc] sm:$0xf]  ;;  %v4833_v47 = vor.u32 %v6337_v37, %v4832_v36  ;;  %s6844_s0 = smov 64  }
  0x2c   :  { %v4538_v45 = vld [vmem:[#allocation2 + $0x200] sm:$0xf0]  ;;  %v4760_v48 = vld [vmem:[#allocation2 + $0x370] sm:$0xf]  ;;  %v6345_v49 = vld [vmem:[#allocation2 + $0x48c] sm:$0xf]  ;;  %v4465_v51 = vor.u32 %v6246_v41, %v4464_v40  ;;  %v6951_v53 = vpack.c.bf16 %v106_v42, %v106_v42 }
  0x2d   :  { %1204 = vmatpush.bf16.msra.mxu0 %v4457_v10  ;;  %v4898_v50 = vld [vmem:[#allocation2 + $0x4d0] sm:$0xf0]  ;;  %v6319_v54 = vld [vmem:[#allocation2 + $0x3b4] sm:$0xf0]  ;;  %v6328_v55 = vld [vmem:[#allocation2 + $0x404] sm:$0xf]  ;;  %v4541_v57 = vor.u32 %v6255_v44, %v4538_v45 }
  0x2e   :  { %1230 = vmatpush.bf16.msra.mxu2 %v4461_v14  ;;  %v4834_v56 = vld [vmem:[#allocation2 + $0x448] sm:$0xf0]  ;;  %v4392_v58 = vld [vmem:[#allocation2 + $0x98] sm:$0xf]  ;;  %v6228_v59 = vld [vmem:[#allocation2 + $0xdc] sm:$0xf0]  ;;  %v4901_v63 = vor.u32 %v6345_v49, %v4898_v50  ;;  %v4761_v1 = vor.u32 %v6319_v54, %v4760_v48 }
  0x2f   :  { %1277 = vmatpush.bf16.msra.mxu3 %v4829_v61  ;;  %1253 = vmatpush.bf16.msrb.mxu1 %v4681_v8  ;;  %v275_v60 = vld [vmem:[#allocation2 + $0x520] sm:$0x33]  ;;  %v6237_v61 = vld [vmem:[#allocation2 + $0x12c] sm:$0xf]  ;;  %v4466_v62 = vld [vmem:[#allocation2 + $0x170] sm:$0xf0]  ;;  %v4837_v2 = vor.u32 %v6328_v55, %v4834_v56  ;;  %v4393_v4 = vor.u32 %v6228_v59, %v4392_v58 }
  0x30   :  { %v781_v0 = vunpack.c.l.b16 %v275_v60  ;;  %v4688_v3 = vld [vmem:[#allocation2 + $0x2e0] sm:$0xf]  ;;  %v6301_v5 = vld [vmem:[#allocation2 + $0x324] sm:$0xf0]  ;;  %v6310_v6 = vld [vmem:[#allocation2 + $0x374] sm:$0xf]  ;;  %v4469_v8 = vor.u32 %v6237_v61, %v4466_v62  ;;  %v782_v14 = vunpack.c.h.b16 %v275_v60 }
  0x31   :  { %1205 = vmatpush.bf16.msra.mxu0 %v4385_v24  ;;  %v4762_v7 = vld [vmem:[#allocation2 + $0x3b8] sm:$0xf0]  ;;  %v6210_v10 = vld [vmem:[#allocation2 + $0x4c] sm:$0xf0]  ;;  %v4394_v13 = vld [vmem:[#allocation2 + $0xe0] sm:$0xf0]  ;;  %v4689_v16 = vor.u32 %v6301_v5, %v4688_v3 }
  0x32   :  { %1231 = vmatpush.bf16.msra.mxu2 %v4389_v29  ;;  %v961_v11 = vpack.c.b16 %v781_v0, %v781_v0  ;;  %v6219_v12 = vld [vmem:[#allocation2 + $0x9c] sm:$0xf]  ;;  %v4765_v17 = vor.u32 %v6310_v6, %v4762_v7  ;;  %v4616_v19 = vld [vmem:[#allocation2 + $0x250] sm:$0xf]  ;;  %v6283_v20 = vld [vmem:[#allocation2 + $0x294] sm:$0xf0]  ;;  %v962_v30 = vpack.c.b16 %v782_v14, %v782_v14 }
  0x33   :  { %1278 = vmatpush.bf16.msra.mxu3 %v4757_v9  ;;  %1254 = vmatpush.bf16.msrb.mxu1 %v4609_v22  ;;  %v4320_v9 = vld [vmem:[#allocation2 + $0x8] sm:$0xf]  ;;  %v4397_v21 = vor.u32 %v6219_v12, %v4394_v13  ;;  %v6201_v22 = vld [vmem:[#allocation2 + $0xc] sm:$0xf]  ;;  %v4322_v26 = vld [vmem:[#allocation2 + $0x50] sm:$0xf0]  ;;  %v4617_v31 = vor.u32 %v6283_v20, %v4616_v19 }
  0x34   :  { %v4321_v18 = vor.u32 %v6210_v10, %v4320_v9  ;;  %v4690_v24 = vld [vmem:[#allocation2 + $0x328] sm:$0xf0]  ;;  %v1158_v25 = vand.u32 %v6929_v15, %v961_v11  ;;  %v4904_v27 = vld [vmem:[#allocation2 + $0x490] sm:$0xf]  ;;  %v6355_v29 = vld [vmem:[#allocation2 + $0x4d4] sm:$0xf0]  ;;  %v4325_v36 = vor.u32 %v6201_v22, %v4322_v26  ;;  %v1161_v42 = vand.u32 %v6929_v15, %v962_v30 }
  0x35   :  { %1206 = vmatpush.bf16.msra.mxu0 %v4313_v39  ;;  %v4840_v32 = vld [vmem:[#allocation2 + $0x408] sm:$0xf]  ;;  %v6338_v33 = vld [vmem:[#allocation2 + $0x44c] sm:$0xf0]  ;;  %v4544_v35 = vld [vmem:[#allocation2 + $0x1c0] sm:$0xf]  ;;  %v4905_v39 = vor.u32 %v6355_v29, %v4904_v27 }
  0x36   :  { %1232 = vmatpush.bf16.msra.mxu2 %v4317_v43  ;;  %4960 = vmatmul.msk.bf16.vlgmr.msrb.gmra.mxu3 %vm1137_vm2, %v6940_v52  ;;  %v6274_v37 = vld [vmem:[#allocation2 + $0x254] sm:$0xf]  ;;  %v4841_v40 = vor.u32 %v6338_v33, %v4840_v32  ;;  %v4768_v41 = vld [vmem:[#allocation2 + $0x378] sm:$0xf]  ;;  %v6320_v44 = vld [vmem:[#allocation2 + $0x3bc] sm:$0xf0] }
  0x37   :  { %1279 = vmatpush.bf16.msra.mxu3 %v4685_v23  ;;  %1255 = vmatpush.bf16.msrb.mxu1 %v4537_v28  ;;  %v6292_v23 = vld [vmem:[#allocation2 + $0x2e4] sm:$0xf]  ;;  %v6265_v28 = vld [vmem:[#allocation2 + $0x204] sm:$0xf0]  ;;  %v6346_v45 = vld [vmem:[#allocation2 + $0x494] sm:$0xf]  ;;  %v4769_v55 = vor.u32 %v6320_v44, %v4768_v41 }
  0x38   :  { %1207 = vmatmul.bf16.vlgmr.msra.gmra.mxu0 %v6951_v53  ;;  %v4693_v34 = vor.u32 %v6292_v23, %v4690_v24  ;;  %v4545_v43 = vor.u32 %v6265_v28, %v4544_v35  ;;  %v4472_v48 = vld [vmem:[#allocation2 + $0x130] sm:$0xf]  ;;  %v6247_v49 = vld [vmem:[#allocation2 + $0x174] sm:$0xf0]  ;;  %v6256_v50 = vld [vmem:[#allocation2 + $0x1c4] sm:$0xf] }
  0x39   :  { %1296 = vmatpush.bf16.msrb.mxu0 %v1155_v46  ;;  %1233 = vmatmul.bf16.vlgmr.msra.gmra.mxu2 %v6951_v53  ;;  %v4906_v46 = vld [vmem:[#allocation2 + $0x4d8] sm:$0xf0]  ;;  %v276_v54 = vld [vmem:[#allocation2 + $0x528] sm:$0x33]  ;;  %v6302_v59 = vld [vmem:[#allocation2 + $0x32c] sm:$0xf0] }
  0x3a   :  { %1303 = vmatpush.bf16.msrb.mxu2 %v4833_v47  ;;  %v4909_v56 = vor.u32 %v6346_v45, %v4906_v46  ;;  %v4696_v58 = vld [vmem:[#allocation2 + $0x2e8] sm:$0xf]  ;;  %v4400_v61 = vld [vmem:[#allocation2 + $0xa0] sm:$0xf]  ;;  %v6238_v0 = vld [vmem:[#allocation2 + $0x134] sm:$0xf] }
  0x3b   :  { %1280 = vmatpush.bf16.msra.mxu3 %v4613_v38  ;;  %1256 = vmatpush.bf16.msrb.mxu1 %v4465_v51  ;;  %v4618_v38 = vld [vmem:[#allocation2 + $0x298] sm:$0xf0]  ;;  %v4546_v51 = vld [vmem:[#allocation2 + $0x208] sm:$0xf0]  ;;  %v6229_v62 = vld [vmem:[#allocation2 + $0xe4] sm:$0xf0] }
  0x3c   :  { %v4621_v47 = vor.u32 %v6274_v37, %v4618_v38  ;;  %v4549_v60 = vor.u32 %v6256_v50, %v4546_v51  ;;  %v4401_v3 = vor.u32 %v6229_v62, %v4400_v61  ;;  %v6284_v5 = vld [vmem:[#allocation2 + $0x29c] sm:$0xf0]  ;;  %v4328_v7 = vld [vmem:[#allocation2 + $0x10] sm:$0xf]  ;;  %v6329_v10 = vld [vmem:[#allocation2 + $0x40c] sm:$0xf] }
  0x3d   :  { %1297 = vmatpush.bf16.msrb.mxu0 %v4901_v63  ;;  %v783_v63 = vunpack.c.l.b16 %v276_v54  ;;  %v4842_v11 = vld [vmem:[#allocation2 + $0x450] sm:$0xf0]  ;;  %v6220_v13 = vld [vmem:[#allocation2 + $0xa4] sm:$0xf]  ;;  %v4402_v14 = vld [vmem:[#allocation2 + $0xe8] sm:$0xf0] }
  0x3e   :  { %1304 = vmatpush.bf16.msrb.mxu2 %v4761_v1  ;;  %v4474_v1 = vld [vmem:[#allocation2 + $0x178] sm:$0xf0]  ;;  %v6266_v19 = vld [vmem:[#allocation2 + $0x20c] sm:$0xf0]  ;;  %v4845_v20 = vor.u32 %v6329_v10, %v4842_v11  ;;  %v4770_v23 = vld [vmem:[#allocation2 + $0x3c0] sm:$0xf0]  ;;  %v4405_v24 = vor.u32 %v6220_v13, %v4402_v14 }
  0x3f   :  { %1281 = vmatpush.bf16.msra.mxu3 %v4541_v57  ;;  %1257 = vmatpush.bf16.msrb.mxu1 %v4393_v4  ;;  %v4473_v57 = vor.u32 %v6247_v49, %v4472_v48  ;;  %v4624_v4 = vld [vmem:[#allocation2 + $0x258] sm:$0xf]  ;;  %v4477_v6 = vor.u32 %v6238_v0, %v4474_v1  ;;  %v963_v9 = vpack.c.b16 %v783_v63, %v783_v63  ;;  %v6311_v22 = vld [vmem:[#allocation2 + $0x37c] sm:$0xf]  ;;  %v6356_v26 = vld [vmem:[#allocation2 + $0x4dc] sm:$0xf0] }
  0x40   :  { %v4625_v12 = vor.u32 %v6284_v5, %v4624_v4  ;;  %v6202_v27 = vld [vmem:[#allocation2 + $0x14] sm:$0xf]  ;;  %v4330_v30 = vld [vmem:[#allocation2 + $0x58] sm:$0xf0]  ;;  %v6339_v32 = vld [vmem:[#allocation2 + $0x454] sm:$0xf0]  ;;  %v4773_v28 = vor.u32 %v6311_v22, %v4770_v23 }
  0x41   :  { %1329 = vmatpush.bf16.msra.mxu0 %v4837_v2  ;;  %v4697_v2 = vor.u32 %v6302_v59, %v4696_v58  ;;  %v6248_v35 = vld [vmem:[#allocation2 + $0x17c] sm:$0xf0]  ;;  %v6966_v37 = vld [vmem:[#allocation2 + $0x530] sm:$0x33]  ;;  %v4333_v38 = vor.u32 %v6202_v27, %v4330_v30  ;;  %v4408_v44 = vld [vmem:[#allocation2 + $0xa8] sm:$0xf] }
  0x42   :  { %1305 = vmatpush.bf16.msrb.mxu2 %v4689_v16  ;;  %v784_v16 = vunpack.c.h.b16 %v276_v54  ;;  %v4698_v41 = vld [vmem:[#allocation2 + $0x330] sm:$0xf0]  ;;  %v4776_v45 = vld [vmem:[#allocation2 + $0x380] sm:$0xf]  ;;  %v6321_v46 = vld [vmem:[#allocation2 + $0x3c4] sm:$0xf0]  ;;  %v785_v50 = vunpack.c.l.b16 %v6966_v37 }
  0x43   :  { %1282 = vmatpush.bf16.msra.mxu3 %v4469_v8  ;;  %1258 = vmatpush.bf16.msrb.mxu1 %v4321_v18  ;;  %v6211_v8 = vld [vmem:[#allocation2 + $0x54] sm:$0xf0]  ;;  %v4552_v18 = vld [vmem:[#allocation2 + $0x1c8] sm:$0xf]  ;;  %v6347_v48 = vld [vmem:[#allocation2 + $0x49c] sm:$0xf] }
  0x44   :  { %v4553_v29 = vor.u32 %v6266_v19, %v4552_v18  ;;  %v964_v33 = vpack.c.b16 %v784_v16, %v784_v16  ;;  %v4914_v49 = vld [vmem:[#allocation2 + $0x4e0] sm:$0xf0]  ;;  %v6330_v54 = vld [vmem:[#allocation2 + $0x414] sm:$0xf]  ;;  %v4704_v61 = vld [vmem:[#allocation2 + $0x2f0] sm:$0xf] }
  0x45   :  { %1330 = vmatpush.bf16.msra.mxu0 %v4765_v17  ;;  %v4329_v17 = vor.u32 %v6211_v8, %v4328_v7  ;;  %v4626_v58 = vld [vmem:[#allocation2 + $0x2a0] sm:$0xf0]  ;;  %v6303_v62 = vld [vmem:[#allocation2 + $0x334] sm:$0xf0]  ;;  %v6212_v1 = vld [vmem:[#allocation2 + $0x5c] sm:$0xf0] }
  0x46   :  { %1259 = vmatmul.bf16.vlgmr.msrb.gmra.mxu1 %v6951_v53  ;;  %1306 = vmatpush.bf16.msrb.mxu2 %v4617_v31  ;;  %v4848_v31 = vld [vmem:[#allocation2 + $0x410] sm:$0xf]  ;;  %v4336_v0 = vld [vmem:[#allocation2 + $0x18] sm:$0xf]  ;;  %v6257_v4 = vld [vmem:[#allocation2 + $0x1cc] sm:$0xf]  ;;  %v4705_v5 = vor.u32 %v6303_v62, %v4704_v61 }
  0x47   :  { %1283 = vmatpush.bf16.msra.mxu3 %v4397_v21  ;;  %1322 = vmatpush.bf16.msra.mxu1 %v1158_v25  ;;  %v1164_v21 = vand.u32 %v6929_v15, %v963_v9  ;;  %v4912_v25 = vld [vmem:[#allocation2 + $0x498] sm:$0xf]  ;;  %v6312_v7 = vld [vmem:[#allocation2 + $0x384] sm:$0xf]  ;;  %v4778_v8 = vld [vmem:[#allocation2 + $0x3c8] sm:$0xf0]  ;;  %v4337_v9 = vor.u32 %v6212_v1, %v4336_v0 }
  0x48   :  { %4961 = vmatmul.msk.bf16.vlgmr.msrb.gmra.mxu0 %vm1137_vm2, %v6940_v52  ;;  %v4632_v10 = vld [vmem:[#allocation2 + $0x260] sm:$0xf]  ;;  %v6285_v11 = vld [vmem:[#allocation2 + $0x2a4] sm:$0xf0]  ;;  %v6239_v13 = vld [vmem:[#allocation2 + $0x13c] sm:$0xf]  ;;  %v4781_v16 = vor.u32 %v6312_v7, %v4778_v8 }
  0x49   :  { %1331 = vmatpush.bf16.msra.mxu0 %v4693_v34  ;;  %v4480_v34 = vld [vmem:[#allocation2 + $0x138] sm:$0xf]  ;;  %v4920_v18 = vld [vmem:[#allocation2 + $0x4a0] sm:$0xf]  ;;  %v6357_v19 = vld [vmem:[#allocation2 + $0x4e4] sm:$0xf0] }
  0x4a   :  { %1307 = vmatpush.bf16.msrb.mxu2 %v4545_v43  ;;  %v1167_v43 = vand.u32 %v6929_v15, %v964_v33  ;;  %v4706_v22 = vld [vmem:[#allocation2 + $0x338] sm:$0xf0]  ;;  %v4856_v23 = vld [vmem:[#allocation2 + $0x418] sm:$0xf]  ;;  %v4921_v27 = vor.u32 %v6357_v19, %v4920_v18  ;;  %v6240_v62 = vld [vmem:[#allocation2 + $0x144] sm:$0xf] }
  0x4b   :  { %1284 = vmatpush.bf16.msra.mxu3 %v4325_v36  ;;  %1323 = vmatpush.bf16.msra.mxu1 %v4905_v39  ;;  %v4913_v36 = vor.u32 %v6356_v26, %v4912_v25  ;;  %v4849_v39 = vor.u32 %v6339_v32, %v4848_v31  ;;  %v4560_v25 = vld [vmem:[#allocation2 + $0x1d0] sm:$0xf]  ;;  %v6267_v26 = vld [vmem:[#allocation2 + $0x214] sm:$0xf0]  ;;  %v6221_v31 = vld [vmem:[#allocation2 + $0xac] sm:$0xf] }
  0x4c   :  { %v4410_v32 = vld [vmem:[#allocation2 + $0xf0] sm:$0xf0]  ;;  %v6348_v0 = vld [vmem:[#allocation2 + $0x4a4] sm:$0xf]  ;;  %v4344_v8 = vld [vmem:[#allocation2 + $0x20] sm:$0xf] }
  0x4d   :  { %1332 = vmatpush.bf16.msra.mxu0 %v4621_v47  ;;  %v6230_v47 = vld [vmem:[#allocation2 + $0xec] sm:$0xf0]  ;;  %v6268_v18 = vld [vmem:[#allocation2 + $0x21c] sm:$0xf0]  ;;  %vm1682_vm3 = vcmask 523264   ;;  %s6848_s8 = smov 120  }
  0x4e   :  { %1285 = vmatmul.bf16.vlgmr.msra.gmra.mxu3 %v6951_v53  ;;  %1308 = vmatpush.bf16.msrb.mxu2 %v4473_v57  ;;  %v6275_v57 = vld [vmem:[#allocation2 + $0x25c] sm:$0xf]  ;;  %v4409_v59 = vor.u32 %v6230_v47, %v4408_v44  ;;  %vm4275_vm9 = vcmask 64512   ;;  %s6850_s27 = smov [#allocation10]   ;;  %s4298_s30 = sshll.u32 %s7296_s12, 4  ;;  %s4299_s30 = int_to_ptr.hbm [resolvable:$true] %s4298_s30 }
  0x4f   :  { %1355 = vmatpush.bf16.msrb.mxu3 %v4841_v40  ;;  %1348 = vmatpush.bf16.msrb.mxu1 %v1161_v42  ;;  %v6293_v40 = vld [vmem:[#allocation2 + $0x2ec] sm:$0xf]  ;;  %v4481_v42 = vor.u32 %v6248_v35, %v4480_v34  ;;  %v4561_v34 = vor.u32 %v6267_v26, %v4560_v25  ;;  %v6276_v35 = vld [vmem:[#allocation2 + $0x264] sm:$0xf]  ;;  %v6203_v44 = vld [vmem:[#allocation2 + $0x1c] sm:$0xf] }
  0x50   :  { %v4701_v51 = vor.u32 %v6293_v40, %v4698_v41  ;;  %v4488_v40 = vld [vmem:[#allocation2 + $0x140] sm:$0xf]  ;;  %v6249_v41 = vld [vmem:[#allocation2 + $0x184] sm:$0xf0]  ;;  %v6358_v26 = vld [vmem:[#allocation2 + $0x4ec] sm:$0xf0] }
  0x51   :  { %1333 = vmatpush.bf16.msra.mxu0 %v4549_v60  ;;  %v4917_v60 = vor.u32 %v6347_v48, %v4914_v49  ;;  %v4489_v47 = vor.u32 %v6249_v41, %v4488_v40  ;;  %v6258_v48 = vld [vmem:[#allocation2 + $0x1d4] sm:$0xf]  ;;  %v4562_v49 = vld [vmem:[#allocation2 + $0x218] sm:$0xf0]  ;;  %v4928_v25 = vld [vmem:[#allocation2 + $0x4a8] sm:$0xf] }
  0x52   :  { %1309 = vmatpush.bf16.msrb.mxu2 %v4401_v3  ;;  %v4629_v3 = vor.u32 %v6275_v57, %v4626_v58  ;;  %v4565_v58 = vor.u32 %v6258_v48, %v4562_v49  ;;  %v4929_v40 = vor.u32 %v6358_v26, %v4928_v25  ;;  %v4792_v48 = vld [vmem:[#allocation2 + $0x390] sm:$0xf]  ;;  %v6323_v49 = vld [vmem:[#allocation2 + $0x3d4] sm:$0xf0]  ;;  %v4576_v26 = vld [vmem:[#allocation2 + $0x1e0] sm:$0xf] }
  0x53   :  { %1356 = vmatpush.bf16.msrb.mxu3 %v4769_v55  ;;  %1349 = vmatpush.bf16.msrb.mxu1 %v4909_v56  ;;  %v4850_v55 = vld [vmem:[#allocation2 + $0x458] sm:$0xf0]  ;;  %v4777_v56 = vor.u32 %v6321_v46, %v4776_v45  ;;  %v4338_v45 = vld [vmem:[#allocation2 + $0x60] sm:$0xf0]  ;;  %s4296_s28 = sshll.u32 %s6850_s27, 4  ;;  %s4297_s28 = int_to_ptr.vmem [resolvable:$true] %s4296_s28 }
  0x54   :  { %v4853_v63 = vor.u32 %v6330_v54, %v4850_v55  ;;  %v6304_v54 = vld [vmem:[#allocation2 + $0x33c] sm:$0xf0]  ;;  %v4416_v55 = vld [vmem:[#allocation2 + $0xb0] sm:$0xf]  ;;  %v4341_v57 = vor.u32 %v6203_v44, %v4338_v45  ;;  %v4424_v44 = vld [vmem:[#allocation2 + $0xb8] sm:$0xf] }
  0x55   :  { %1334 = vmatpush.bf16.msra.mxu0 %v4477_v6  ;;  %v4554_v6 = vld [vmem:[#allocation2 + $0x210] sm:$0xf0]  ;;  %v6232_v45 = vld [vmem:[#allocation2 + $0xfc] sm:$0xf0] }
  0x56   :  { %4962 = vmatmul.msk.bf16.vlgmr.msra.gmra.mxu1 %vm1137_vm2, %v6940_v52  ;;  %1310 = vmatpush.bf16.msrb.mxu2 %v4329_v17  ;;  %v4557_v14 = vor.u32 %v6257_v4, %v4554_v6  ;;  %v4482_v17 = vld [vmem:[#allocation2 + $0x180] sm:$0xf0]  ;;  %v6286_v4 = vld [vmem:[#allocation2 + $0x2ac] sm:$0xf0] }
  0x57   :  { %1357 = vmatpush.bf16.msrb.mxu3 %v4697_v2  ;;  %1381 = vmatpush.bf16.msra.mxu1 %v4845_v20  ;;  %v965_v2 = vpack.c.b16 %v785_v50, %v785_v50  ;;  %v4633_v20 = vor.u32 %v6285_v11, %v4632_v10  ;;  %v6979_v50 = vld [vmem:[#allocation2 + $0x538] sm:$0x33]  ;;  %v4858_v6 = vld [vmem:[#allocation2 + $0x460] sm:$0xf0] }
  0x58   :  { %v788_v19 = vunpack.c.h.b16 %v6979_v50 }
  0x59   :  { %1335 = vmatpush.bf16.msra.mxu0 %v4405_v24  ;;  %1311 = vmatmul.bf16.vlgmr.msrb.gmra.mxu2 %v6951_v53  ;;  %v6340_v24 = vld [vmem:[#allocation2 + $0x45c] sm:$0xf0] }
  0x5a   :  { %1374 = vmatpush.bf16.msra.mxu2 %v1164_v21  ;;  %v6294_v21 = vld [vmem:[#allocation2 + $0x2f4] sm:$0xf]  ;;  %v4857_v33 = vor.u32 %v6340_v24, %v4856_v23 }
  0x5b   :  { %1358 = vmatpush.bf16.msrb.mxu3 %v4625_v12  ;;  %1382 = vmatpush.bf16.msra.mxu1 %v4773_v28  ;;  %v1170_v12 = vand.u32 %v6929_v15, %v965_v2  ;;  %v4709_v30 = vor.u32 %v6294_v21, %v4706_v22  ;;  %v4634_v28 = vld [vmem:[#allocation2 + $0x2a8] sm:$0xf0]  ;;  %v4786_v22 = vld [vmem:[#allocation2 + $0x3d0] sm:$0xf0] }
  0x5c   :  { %v4922_v2 = vld [vmem:[#allocation2 + $0x4e8] sm:$0xf0] }
  0x5d   :  { %1336 = vmatpush.bf16.msra.mxu0 %v4333_v38  ;;  %v786_v38 = vunpack.c.h.b16 %v6966_v37  ;;  %v4925_v11 = vor.u32 %v6348_v0, %v4922_v2  ;;  %v6313_v21 = vld [vmem:[#allocation2 + $0x38c] sm:$0xf]  ;;  %v4720_v0 = vld [vmem:[#allocation2 + $0x300] sm:$0xf] }
  0x5e   :  { %1375 = vmatpush.bf16.msra.mxu2 %v4913_v36  ;;  %v4784_v36 = vld [vmem:[#allocation2 + $0x388] sm:$0xf] }
  0x5f   :  { %1359 = vmatpush.bf16.msrb.mxu3 %v4553_v29  ;;  %1383 = vmatpush.bf16.msra.mxu1 %v4701_v51  ;;  %v4485_v29 = vor.u32 %v6239_v13, %v4482_v17  ;;  %v966_v37 = vpack.c.b16 %v786_v38, %v786_v38  ;;  %v4712_v51 = vld [vmem:[#allocation2 + $0x2f8] sm:$0xf]  ;;  %v6222_v13 = vld [vmem:[#allocation2 + $0xb4] sm:$0xf]  ;;  %v4714_v38 = vld [vmem:[#allocation2 + $0x340] sm:$0xf0] }
  0x60   :  { %1337 = vmatmul.bf16.vlgmr.msra.gmra.mxu0 %v6951_v53  ;;  %v4713_v61 = vor.u32 %v6304_v54, %v4712_v51  ;;  %v4568_v17 = vld [vmem:[#allocation2 + $0x1d8] sm:$0xf]  ;;  %v4642_v51 = vld [vmem:[#allocation2 + $0x2b0] sm:$0xf0]  ;;  %v6349_v54 = vld [vmem:[#allocation2 + $0x4ac] sm:$0xf] }
  0x61   :  { %1400 = vmatpush.bf16.msrb.mxu0 %v1167_v43  ;;  %v4637_v43 = vor.u32 %v6276_v35, %v4634_v28  ;;  %v6341_v35 = vld [vmem:[#allocation2 + $0x464] sm:$0xf0]  ;;  %v968_v28 = vpack.c.b16 %v788_v19, %v788_v19  ;;  %v6359_v19 = vld [vmem:[#allocation2 + $0x4f4] sm:$0xf0] }
  0x62   :  { %1407 = vmatpush.bf16.msrb.mxu2 %v4849_v39  ;;  %v6322_v39 = vld [vmem:[#allocation2 + $0x3cc] sm:$0xf0] }
  0x63   :  { %1360 = vmatpush.bf16.msrb.mxu3 %v4481_v42  ;;  %1384 = vmatpush.bf16.msra.mxu1 %v4629_v3  ;;  %v4413_v42 = vor.u32 %v6221_v31, %v4410_v32  ;;  %v4785_v46 = vor.u32 %v6322_v39, %v4784_v36  ;;  %v4640_v3 = vld [vmem:[#allocation2 + $0x268] sm:$0xf]  ;;  %v4789_v32 = vor.u32 %v6313_v21, %v4786_v22  ;;  %v6295_v36 = vld [vmem:[#allocation2 + $0x2fc] sm:$0xf]  ;;  %v6990_v39 = vld [vmem:[#allocation2 + $0x540] sm:$0x33] }
  0x64   :  { %v4496_v31 = vld [vmem:[#allocation2 + $0x148] sm:$0xf]  ;;  %v4722_v21 = vld [vmem:[#allocation2 + $0x348] sm:$0xf0] }
  0x65   :  { %1401 = vmatpush.bf16.msrb.mxu0 %v4917_v60  ;;  %v1173_v60 = vand.u32 %v6929_v15, %v966_v37  ;;  %v6277_v37 = vld [vmem:[#allocation2 + $0x26c] sm:$0xf] }
  0x66   :  { %1408 = vmatpush.bf16.msrb.mxu2 %v4777_v56  ;;  %4963 = vmatmul.msk.bf16.vlgmr.msrb.gmra.mxu1 %vm1137_vm2, %v6940_v52  ;;  %v6231_v56 = vld [vmem:[#allocation2 + $0xf4] sm:$0xf0] }
  0x67   :  { %1361 = vmatpush.bf16.msrb.mxu3 %v4409_v59  ;;  %1385 = vmatpush.bf16.msra.mxu1 %v4557_v14  ;;  %v787_v59 = vunpack.c.l.b16 %v6979_v50  ;;  %v4417_v1 = vor.u32 %v6231_v56, %v4416_v55  ;;  %v4418_v14 = vld [vmem:[#allocation2 + $0xf8] sm:$0xf0]  ;;  %v789_v50 = vunpack.c.l.b16 %v6990_v39  ;;  %v4930_v55 = vld [vmem:[#allocation2 + $0x4f0] sm:$0xf0]  ;;  %v6332_v56 = vld [vmem:[#allocation2 + $0x424] sm:$0xf] }
  0x68   :  { %v4421_v24 = vor.u32 %v6222_v13, %v4418_v14  ;;  %v6287_v13 = vld [vmem:[#allocation2 + $0x2b4] sm:$0xf0] }
  0x69   :  { %1433 = vmatpush.bf16.msra.mxu0 %v4853_v63  ;;  %4964 = vmatmul.msk.bf16.vlgmr.msra.gmra.mxu2 %vm1137_vm2, %v6940_v52  ;;  %v4490_v63 = vld [vmem:[#allocation2 + $0x188] sm:$0xf0]  ;;  %v967_v10 = vpack.c.b16 %v787_v59, %v787_v59  ;;  %v4793_v59 = vor.u32 %v6323_v49, %v4792_v48  ;;  %v969_v2 = vpack.c.b16 %v789_v50, %v789_v50  ;;  %v6260_v49 = vld [vmem:[#allocation2 + $0x1e4] sm:$0xf] }
  0x6a   :  { %1409 = vmatpush.bf16.msrb.mxu2 %v4705_v5  ;;  %v6331_v5 = vld [vmem:[#allocation2 + $0x41c] sm:$0xf]  ;;  %v4493_v7 = vor.u32 %v6240_v62, %v4490_v63  ;;  %v4933_v62 = vor.u32 %v6349_v54, %v4930_v55  ;;  %v6214_v63 = vld [vmem:[#allocation2 + $0x6c] sm:$0xf0] }
  0x6b   :  { %1362 = vmatpush.bf16.msrb.mxu3 %v4337_v9  ;;  %1386 = vmatpush.bf16.msra.mxu1 %v4485_v29  ;;  %v6213_v9 = vld [vmem:[#allocation2 + $0x64] sm:$0xf0]  ;;  %v1176_v23 = vand.u32 %v6929_v15, %v967_v10  ;;  %v6204_v29 = vld [vmem:[#allocation2 + $0x24] sm:$0xf]  ;;  %v6306_v54 = vld [vmem:[#allocation2 + $0x34c] sm:$0xf0] }
  0x6d   :  { %1434 = vmatpush.bf16.msra.mxu0 %v4781_v16  ;;  %v4861_v16 = vor.u32 %v6331_v5, %v4858_v6  ;;  %v4570_v5 = vld [vmem:[#allocation2 + $0x220] sm:$0xf0]  ;;  %v6314_v6 = vld [vmem:[#allocation2 + $0x394] sm:$0xf] }
  0x6e   :  { %1363 = vmatmul.bf16.vlgmr.msrb.gmra.mxu3 %v6951_v53  ;;  %1410 = vmatpush.bf16.msrb.mxu2 %v4633_v20  ;;  %v4345_v20 = vor.u32 %v6213_v9, %v4344_v8 }
  0x6f   :  { %1426 = vmatpush.bf16.msra.mxu3 %v1170_v12  ;;  %1387 = vmatpush.bf16.msra.mxu1 %v4413_v42  ;;  %v4641_v12 = vor.u32 %v6286_v4, %v4640_v3  ;;  %v6259_v4 = vld [vmem:[#allocation2 + $0x1dc] sm:$0xf] }
  0x70   :  { %4965 = vmatmul.msk.bf16.vlgmr.msrb.gmra.mxu0 %vm1137_vm2, %v6940_v52  ;;  %v4573_v10 = vor.u32 %v6259_v4, %v4570_v5  ;;  %v6288_v4 = vld [vmem:[#allocation2 + $0x2bc] sm:$0xf0]  ;;  %v6333_v5 = vld [vmem:[#allocation2 + $0x42c] sm:$0xf] }
  0x71   :  { %1435 = vmatpush.bf16.msra.mxu0 %v4709_v30  ;;  %v4346_v30 = vld [vmem:[#allocation2 + $0x68] sm:$0xf0] }
  0x72   :  { %1411 = vmatpush.bf16.msrb.mxu2 %v4561_v34  ;;  %v4864_v34 = vld [vmem:[#allocation2 + $0x420] sm:$0xf]  ;;  %v4349_v41 = vor.u32 %v6204_v29, %v4346_v30 }
  0x73   :  { %1427 = vmatpush.bf16.msra.mxu3 %v4921_v27  ;;  %1388 = vmatpush.bf16.msra.mxu1 %v4341_v57  ;;  %v4569_v27 = vor.u32 %v6268_v18, %v4568_v17  ;;  %v4866_v57 = vld [vmem:[#allocation2 + $0x468] sm:$0xf0]  ;;  %v4498_v17 = vld [vmem:[#allocation2 + $0x190] sm:$0xf0]  ;;  %v4936_v18 = vld [vmem:[#allocation2 + $0x4b0] sm:$0xf] }
  0x74   :  { %v4869_v3 = vor.u32 %v6332_v56, %v4866_v57  ;;  %v4937_v29 = vor.u32 %v6359_v19, %v4936_v18  ;;  %v4432_v56 = vld [vmem:[#allocation2 + $0xc0] sm:$0xf]  ;;  %v6233_v57 = vld [vmem:[#allocation2 + $0x104] sm:$0xf0] }
  0x75   :  { %1436 = vmatpush.bf16.msra.mxu0 %v4637_v43  ;;  %v4865_v43 = vor.u32 %v6341_v35, %v4864_v34  ;;  %v6278_v35 = vld [vmem:[#allocation2 + $0x274] sm:$0xf]  ;;  %v4584_v19 = vld [vmem:[#allocation2 + $0x1e8] sm:$0xf] }
  0x76   :  { %1412 = vmatpush.bf16.msrb.mxu2 %v4489_v47  ;;  %1389 = vmatmul.bf16.vlgmr.msra.gmra.mxu1 %v6951_v53  ;;  %v1179_v47 = vand.u32 %v6929_v15, %v968_v28  ;;  %v4650_v28 = vld [vmem:[#allocation2 + $0x2b8] sm:$0xf0] }
  0x77   :  { %1459 = vmatpush.bf16.msrb.mxu3 %v4857_v33  ;;  %1452 = vmatpush.bf16.msrb.mxu1 %v1173_v60  ;;  %v6250_v33 = vld [vmem:[#allocation2 + $0x18c] sm:$0xf0]  ;;  %v4352_v60 = vld [vmem:[#allocation2 + $0x28] sm:$0xf] }
  0x78   :  { %v4497_v42 = vor.u32 %v6250_v33, %v4496_v31  ;;  %v4353_v8 = vor.u32 %v6214_v63, %v4352_v60  ;;  %v6223_v31 = vld [vmem:[#allocation2 + $0xbc] sm:$0xf]  ;;  %v790_v33 = vunpack.c.h.b16 %v6990_v39  ;;  %v6205_v39 = vld [vmem:[#allocation2 + $0x2c] sm:$0xf] }
  0x79   :  { %1437 = vmatpush.bf16.msra.mxu0 %v4565_v58  ;;  %v4425_v58 = vor.u32 %v6232_v45, %v4424_v44  ;;  %v4653_v44 = vor.u32 %v6278_v35, %v4650_v28  ;;  %v4354_v45 = vld [vmem:[#allocation2 + $0x70] sm:$0xf0]  ;;  %v4512_v35 = vld [vmem:[#allocation2 + $0x158] sm:$0xf]  ;;  %v6252_v28 = vld [vmem:[#allocation2 + $0x19c] sm:$0xf0] }
  0x7a   :  { %1413 = vmatpush.bf16.msrb.mxu2 %v4417_v1  ;;  %v6305_v1 = vld [vmem:[#allocation2 + $0x344] sm:$0xf0]  ;;  %v4357_v55 = vor.u32 %v6205_v39, %v4354_v45  ;;  %v4513_v39 = vor.u32 %v6252_v28, %v4512_v35  ;;  %v6234_v45 = vld [vmem:[#allocation2 + $0x10c] sm:$0xf0] }
  0x7b   :  { %1460 = vmatpush.bf16.msrb.mxu3 %v4785_v46  ;;  %1453 = vmatpush.bf16.msrb.mxu1 %v4925_v11  ;;  %v4717_v46 = vor.u32 %v6295_v36, %v4714_v38  ;;  %v4721_v9 = vor.u32 %v6305_v1, %v4720_v0  ;;  %v1182_v11 = vand.u32 %v6929_v15, %v969_v2  ;;  %v4800_v38 = vld [vmem:[#allocation2 + $0x398] sm:$0xf]  ;;  %v6350_v0 = vld [vmem:[#allocation2 + $0x4b4] sm:$0xf]  ;;  %v4938_v1 = vld [vmem:[#allocation2 + $0x4f8] sm:$0xf0] }
  0x7c   :  { %v4656_v2 = vld [vmem:[#allocation2 + $0x278] sm:$0xf] }
  0x7d   :  { %1438 = vmatpush.bf16.msra.mxu0 %v4493_v7  ;;  %v4794_v7 = vld [vmem:[#allocation2 + $0x3d8] sm:$0xf0] }
  0x7e   :  { %4966 = vmatmul.msk.bf16.vlgmr.msra.gmra.mxu3 %vm1137_vm2, %v6940_v52  ;;  %1414 = vmatpush.bf16.msrb.mxu2 %v4345_v20  ;;  %v4797_v14 = vor.u32 %v6314_v6, %v4794_v7  ;;  %v6296_v20 = vld [vmem:[#allocation2 + $0x304] sm:$0xf]  ;;  %v4874_v6 = vld [vmem:[#allocation2 + $0x470] sm:$0xf0]  ;;  %v4360_v7 = vld [vmem:[#allocation2 + $0x30] sm:$0xf] }
  0x7f   :  { %1461 = vmatpush.bf16.msrb.mxu3 %v4713_v61  ;;  %1485 = vmatpush.bf16.msra.mxu1 %v4861_v16  ;;  %v4645_v61 = vor.u32 %v6277_v37, %v4642_v51  ;;  %v6241_v16 = vld [vmem:[#allocation2 + $0x14c] sm:$0xf]  ;;  %v4725_v30 = vor.u32 %v6296_v20, %v4722_v21  ;;  %v4728_v51 = vld [vmem:[#allocation2 + $0x308] sm:$0xf]  ;;  %v6270_v20 = vld [vmem:[#allocation2 + $0x22c] sm:$0xf0] }
  0x80   :  { %v4501_v25 = vor.u32 %v6241_v16, %v4498_v17  ;;  %v4578_v37 = vld [vmem:[#allocation2 + $0x228] sm:$0xf0]  ;;  %v4729_v63 = vor.u32 %v6306_v54, %v4728_v51  ;;  %v4946_v51 = vld [vmem:[#allocation2 + $0x500] sm:$0xf0] }
  0x81   :  { %1439 = vmatpush.bf16.msra.mxu0 %v4421_v24  ;;  %1415 = vmatmul.bf16.vlgmr.msrb.gmra.mxu2 %v6951_v53  ;;  %v6342_v24 = vld [vmem:[#allocation2 + $0x46c] sm:$0xf0]  ;;  %v4434_v16 = vld [vmem:[#allocation2 + $0x108] sm:$0xf0]  ;;  %v4658_v54 = vld [vmem:[#allocation2 + $0x2c0] sm:$0xf0] }
  0x82   :  { %1478 = vmatpush.bf16.msra.mxu2 %v1176_v23  ;;  %v4872_v23 = vld [vmem:[#allocation2 + $0x428] sm:$0xf] }
  0x83   :  { %1462 = vmatpush.bf16.msrb.mxu3 %v4641_v12  ;;  %1486 = vmatpush.bf16.msra.mxu1 %v4789_v32  ;;  %v4648_v12 = vld [vmem:[#allocation2 + $0x270] sm:$0xf]  ;;  %v4426_v32 = vld [vmem:[#allocation2 + $0x100] sm:$0xf0]  ;;  %v4873_v34 = vor.u32 %v6342_v24, %v4872_v23 }
  0x84   :  { %v4649_v22 = vor.u32 %v6287_v13, %v4648_v12  ;;  %v4657_v12 = vor.u32 %v6288_v4, %v4656_v2  ;;  %v4877_v13 = vor.u32 %v6333_v5, %v4874_v6  ;;  %v4802_v23 = vld [vmem:[#allocation2 + $0x3e0] sm:$0xf0]  ;;  %v6261_v2 = vld [vmem:[#allocation2 + $0x1ec] sm:$0xf]  ;;  %v4586_v4 = vld [vmem:[#allocation2 + $0x230] sm:$0xf0] }
  0x85   :  { %1440 = vmatpush.bf16.msra.mxu0 %v4349_v41  ;;  %v4429_v41 = vor.u32 %v6223_v31, %v4426_v32  ;;  %v4880_v31 = vld [vmem:[#allocation2 + $0x430] sm:$0xf]  ;;  %v6343_v32 = vld [vmem:[#allocation2 + $0x474] sm:$0xf0]  ;;  %v6316_v5 = vld [vmem:[#allocation2 + $0x3a4] sm:$0xf] }
  0x86   :  { %1479 = vmatpush.bf16.msra.mxu2 %v4929_v40  ;;  %4967 = vmatmul.msk.bf16.vlgmr.msrb.gmra.mxu1 %vm1137_vm2, %v6940_v52  ;;  %v6324_v40 = vld [vmem:[#allocation2 + $0x3dc] sm:$0xf0]  ;;  %v4810_v6 = vld [vmem:[#allocation2 + $0x3e8] sm:$0xf0] }
  0x87   :  { %1463 = vmatpush.bf16.msrb.mxu3 %v4569_v27  ;;  %1487 = vmatpush.bf16.msra.mxu1 %v4717_v46  ;;  %v6269_v27 = vld [vmem:[#allocation2 + $0x224] sm:$0xf0]  ;;  %v970_v46 = vpack.c.b16 %v790_v33, %v790_v33  ;;  %v4801_v48 = vor.u32 %v6324_v40, %v4800_v38  ;;  %v6297_v38 = vld [vmem:[#allocation2 + $0x30c] sm:$0xf]  ;;  %v4730_v40 = vld [vmem:[#allocation2 + $0x350] sm:$0xf0] }
  0x88   :  { %1441 = vmatmul.bf16.vlgmr.msra.gmra.mxu0 %v6951_v53  ;;  %v4577_v36 = vor.u32 %v6269_v27, %v4576_v26  ;;  %v6360_v26 = vld [vmem:[#allocation2 + $0x4fc] sm:$0xf0]  ;;  %v6206_v27 = vld [vmem:[#allocation2 + $0x34] sm:$0xf] }
  0x89   :  { %1504 = vmatpush.bf16.msrb.mxu0 %v1179_v47  ;;  %v7003_v47 = vld [vmem:[#allocation2 + $0x548] sm:$0x33]  ;;  %v1185_v60 = vand.u32 %v6929_v15, %v970_v46 }
  0x8a   :  { %1511 = vmatpush.bf16.msrb.mxu2 %v4865_v43  ;;  %v6251_v43 = vld [vmem:[#allocation2 + $0x194] sm:$0xf0]  ;;  %v792_v17 = vunpack.c.h.b16 %v7003_v47 }
  0x8b   :  { %1464 = vmatpush.bf16.msrb.mxu3 %v4497_v42  ;;  %1488 = vmatpush.bf16.msra.mxu1 %v4645_v61  ;;  %v4504_v42 = vld [vmem:[#allocation2 + $0x150] sm:$0xf]  ;;  %v6242_v61 = vld [vmem:[#allocation2 + $0x154] sm:$0xf] }
  0x8c   :  { %v4505_v50 = vor.u32 %v6251_v43, %v4504_v42  ;;  %v972_v33 = vpack.c.b16 %v792_v17, %v792_v17  ;;  %v4881_v42 = vor.u32 %v6343_v32, %v4880_v31  ;;  %v4440_v43 = vld [vmem:[#allocation2 + $0xc8] sm:$0xf]  ;;  %v4514_v17 = vld [vmem:[#allocation2 + $0x1a0] sm:$0xf0]  ;;  %v4442_v31 = vld [vmem:[#allocation2 + $0x110] sm:$0xf0] }
  0x8d   :  { %1505 = vmatpush.bf16.msrb.mxu0 %v4933_v62  ;;  %v4506_v62 = vld [vmem:[#allocation2 + $0x198] sm:$0xf0]  ;;  %v6280_v32 = vld [vmem:[#allocation2 + $0x284] sm:$0xf] }
  0x8e   :  { %1512 = vmatpush.bf16.msrb.mxu2 %v4793_v59  ;;  %v4581_v59 = vor.u32 %v6260_v49, %v4578_v37  ;;  %v1191_v46 = vand.u32 %v6929_v15, %v972_v33  ;;  %v4733_v49 = vor.u32 %v6297_v38, %v4730_v40  ;;  %v6279_v37 = vld [vmem:[#allocation2 + $0x27c] sm:$0xf]  ;;  %v4666_v33 = vld [vmem:[#allocation2 + $0x2c8] sm:$0xf0]  ;;  %v6253_v38 = vld [vmem:[#allocation2 + $0x1a4] sm:$0xf0] }
  0x8f   :  { %1465 = vmatpush.bf16.msrb.mxu3 %v4425_v58  ;;  %1489 = vmatpush.bf16.msra.mxu1 %v4573_v10  ;;  %v791_v58 = vunpack.c.l.b16 %v7003_v47  ;;  %v4509_v10 = vor.u32 %v6242_v61, %v4506_v62  ;;  %v4808_v47 = vld [vmem:[#allocation2 + $0x3a0] sm:$0xf]  ;;  %v4736_v61 = vld [vmem:[#allocation2 + $0x310] sm:$0xf]  ;;  %v6307_v62 = vld [vmem:[#allocation2 + $0x354] sm:$0xf0] }
  0x91   :  { %1537 = vmatpush.bf16.msra.mxu0 %v4869_v3  ;;  %4968 = vmatmul.msk.bf16.vlgmr.msra.gmra.mxu2 %vm1137_vm2, %v6940_v52  ;;  %v4433_v3 = vor.u32 %v6233_v57, %v4432_v56  ;;  %v4882_v56 = vld [vmem:[#allocation2 + $0x478] sm:$0xf0] }
  0x92   :  { %1513 = vmatpush.bf16.msrb.mxu2 %v4721_v9  ;;  %v971_v9 = vpack.c.b16 %v791_v58, %v791_v58 }
  0x93   :  { %1466 = vmatpush.bf16.msrb.mxu3 %v4353_v8  ;;  %1490 = vmatpush.bf16.msra.mxu1 %v4501_v25  ;;  %v6215_v8 = vld [vmem:[#allocation2 + $0x74] sm:$0xf0] }
  0x94   :  { %v4361_v18 = vor.u32 %v6215_v8, %v4360_v7  ;;  %v1188_v21 = vand.u32 %v6929_v15, %v971_v9  ;;  %v4944_v25 = vld [vmem:[#allocation2 + $0x4b8] sm:$0xf]  ;;  %v4737_v8 = vor.u32 %v6307_v62, %v4736_v61  ;;  %v6217_v61 = vld [vmem:[#allocation2 + $0x84] sm:$0xf0] }
  0x95   :  { %1538 = vmatpush.bf16.msra.mxu0 %v4797_v14  ;;  %v6224_v14 = vld [vmem:[#allocation2 + $0xc4] sm:$0xf] }
  0x96   :  { %1467 = vmatmul.bf16.vlgmr.msrb.gmra.mxu3 %v6951_v53  ;;  %1514 = vmatpush.bf16.msrb.mxu2 %v4649_v22  ;;  %v6315_v22 = vld [vmem:[#allocation2 + $0x39c] sm:$0xf]  ;;  %v4437_v24 = vor.u32 %v6224_v14, %v4434_v16  ;;  %v4813_v16 = vor.u32 %v6316_v5, %v4810_v6  ;;  %v6208_v6 = vld [vmem:[#allocation2 + $0x44] sm:$0xf] }
  0x97   :  { %1530 = vmatpush.bf16.msra.mxu3 %v1182_v11  ;;  %1491 = vmatpush.bf16.msra.mxu1 %v4429_v41  ;;  %v4941_v11 = vor.u32 %v6350_v0, %v4938_v1  ;;  %v4368_v0 = vld [vmem:[#allocation2 + $0x38] sm:$0xf]  ;;  %v6216_v1 = vld [vmem:[#allocation2 + $0x7c] sm:$0xf0]  ;;  %v6243_v14 = vld [vmem:[#allocation2 + $0x15c] sm:$0xf] }
  0x98   :  { %4969 = vmatmul.msk.bf16.vlgmr.msrb.gmra.mxu0 %vm1137_vm2, %v6940_v52  ;;  %v4369_v9 = vor.u32 %v6216_v1, %v4368_v0  ;;  %v6226_v1 = vld [vmem:[#allocation2 + $0xd4] sm:$0xf] }
  0x99   :  { %1539 = vmatpush.bf16.msra.mxu0 %v4725_v30  ;;  %v4362_v30 = vld [vmem:[#allocation2 + $0x78] sm:$0xf0] }
  0x9a   :  { %1515 = vmatpush.bf16.msrb.mxu2 %v4577_v36  ;;  %v4945_v36 = vor.u32 %v6360_v26, %v4944_v25  ;;  %v4365_v41 = vor.u32 %v6206_v27, %v4362_v30  ;;  %v6271_v25 = vld [vmem:[#allocation2 + $0x234] sm:$0xf0]  ;;  %v4517_v27 = vor.u32 %v6243_v14, %v4514_v17 }
  0x9b   :  { %1531 = vmatpush.bf16.msra.mxu3 %v4937_v29  ;;  %1492 = vmatpush.bf16.msra.mxu1 %v4357_v55  ;;  %v4585_v29 = vor.u32 %v6270_v20, %v4584_v19  ;;  %v6334_v55 = vld [vmem:[#allocation2 + $0x434] sm:$0xf]  ;;  %v4738_v19 = vld [vmem:[#allocation2 + $0x358] sm:$0xf0] }
  0x9d   :  { %1540 = vmatpush.bf16.msra.mxu0 %v4653_v44  ;;  %v7014_v44 = vld [vmem:[#allocation2 + $0x550] sm:$0x33] }
  0x9e   :  { %1516 = vmatpush.bf16.msrb.mxu2 %v4505_v50  ;;  %1493 = vmatmul.bf16.vlgmr.msra.gmra.mxu1 %v6951_v53  ;;  %v6351_v50 = vld [vmem:[#allocation2 + $0x4bc] sm:$0xf]  ;;  %v793_v57 = vunpack.c.l.b16 %v7014_v44  ;;  %v794_v35 = vunpack.c.h.b16 %v7014_v44 }
  0x9f   :  { %1563 = vmatpush.bf16.msrb.mxu3 %v4873_v34  ;;  %1556 = vmatpush.bf16.msrb.mxu1 %v1185_v60  ;;  %v4805_v34 = vor.u32 %v6315_v22, %v4802_v23  ;;  %v4949_v60 = vor.u32 %v6351_v50, %v4946_v51  ;;  %v4952_v22 = vld [vmem:[#allocation2 + $0x4c0] sm:$0xf]  ;;  %v6361_v23 = vld [vmem:[#allocation2 + $0x504] sm:$0xf0] }
  0xa0   :  { %v973_v7 = vpack.c.b16 %v793_v57, %v793_v57  ;;  %v974_v44 = vpack.c.b16 %v794_v35, %v794_v35 }
  0xa1   :  { %1541 = vmatpush.bf16.msra.mxu0 %v4581_v59  ;;  %v4441_v59 = vor.u32 %v6234_v45, %v4440_v43  ;;  %v4669_v43 = vor.u32 %v6280_v32, %v4666_v33  ;;  %v6262_v45 = vld [vmem:[#allocation2 + $0x1f4] sm:$0xf] }
  0xa2   :  { %1517 = vmatpush.bf16.msrb.mxu2 %v4433_v3  ;;  %v4885_v3 = vor.u32 %v6334_v55, %v4882_v56  ;;  %v1194_v20 = vand.u32 %v6929_v15, %v973_v7  ;;  %v4522_v55 = vld [vmem:[#allocation2 + $0x1a8] sm:$0xf0]  ;;  %v1197_v56 = vand.u32 %v6929_v15, %v974_v44 }
  0xa3   :  { %1564 = vmatpush.bf16.msrb.mxu3 %v4801_v48  ;;  %1557 = vmatpush.bf16.msrb.mxu1 %v4941_v11  ;;  %v6325_v48 = vld [vmem:[#allocation2 + $0x3e4] sm:$0xf0]  ;;  %v4378_v7 = vld [vmem:[#allocation2 + $0x88] sm:$0xf0] }
  0xa4   :  { %v4809_v58 = vor.u32 %v6325_v48, %v4808_v47  ;;  %v6289_v11 = vld [vmem:[#allocation2 + $0x2c4] sm:$0xf0]  ;;  %v4448_v48 = vld [vmem:[#allocation2 + $0xd0] sm:$0xf] }
  0xa5   :  { %1542 = vmatpush.bf16.msra.mxu0 %v4509_v10  ;;  %v4664_v10 = vld [vmem:[#allocation2 + $0x280] sm:$0xf] }
  0xa6   :  { %4970 = vmatmul.msk.bf16.vlgmr.msra.gmra.mxu3 %vm1137_vm2, %v6940_v52  ;;  %1518 = vmatpush.bf16.msrb.mxu2 %v4361_v18  ;;  %v6298_v18 = vld [vmem:[#allocation2 + $0x314] sm:$0xf] }
  0xa7   :  { %1565 = vmatpush.bf16.msrb.mxu3 %v4729_v63  ;;  %1589 = vmatpush.bf16.msra.mxu1 %v4877_v13  ;;  %v4661_v63 = vor.u32 %v6279_v37, %v4658_v54  ;;  %v4589_v13 = vor.u32 %v6261_v2, %v4586_v4  ;;  %v4741_v30 = vor.u32 %v6298_v18, %v4738_v19  ;;  %v6244_v54 = vld [vmem:[#allocation2 + $0x164] sm:$0xf]  ;;  %v4450_v2 = vld [vmem:[#allocation2 + $0x118] sm:$0xf0] }
  0xa8   :  { %v4453_v15 = vor.u32 %v6226_v1, %v4450_v2 }
  0xa9   :  { %1543 = vmatpush.bf16.msra.mxu0 %v4437_v24  ;;  %1519 = vmatmul.bf16.vlgmr.msrb.gmra.mxu2 %v6951_v53  ;;  %v4592_v24 = vld [vmem:[#allocation2 + $0x1f0] sm:$0xf]  ;;  %v7025_v26 = vpop.f32.mrf.mxu3 }
  0xaa   :  { %1582 = vmatpush.bf16.msra.mxu2 %v1188_v21  ;;  %v4665_v21 = vor.u32 %v6289_v11, %v4664_v10  ;;  %v4593_v28 = vor.u32 %v6271_v25, %v4592_v24  ;;  %v4381_v11 = vor.u32 %v6208_v6, %v4378_v7 }
  0xab   :  { %1566 = vmatpush.bf16.msrb.mxu3 %v4657_v12  ;;  %1590 = vmatpush.bf16.msra.mxu1 %v4805_v34  ;;  %v7020_v12 = vpop.f32.mrf.mxu1  ;;  %v4953_v34 = vor.u32 %v6361_v23, %v4952_v22 }
  0xad   :  { %1544 = vmatpush.bf16.msra.mxu0 %v4365_v41 }
  0xae   :  { %1583 = vmatpush.bf16.msra.mxu2 %v4945_v36  ;;  %4971 = vmatmul.msk.bf16.vlgmr.msrb.gmra.mxu1 %vm1137_vm2, %v6940_v52  ;;  %v4520_v36 = vld [vmem:[#allocation2 + $0x160] sm:$0xf] }
  0xaf   :  { %1567 = vmatpush.bf16.msrb.mxu3 %v4585_v29  ;;  %1591 = vmatpush.bf16.msra.mxu1 %v4733_v49  ;;  %v6225_v29 = vld [vmem:[#allocation2 + $0xcc] sm:$0xf]  ;;  %v4521_v47 = vor.u32 %v6253_v38, %v4520_v36  ;;  %v6235_v49 = vld [vmem:[#allocation2 + $0x114] sm:$0xf0] }
  0xb0   :  { %1545 = vmatmul.bf16.vlgmr.msra.gmra.mxu0 %v6951_v53  ;;  %v4445_v41 = vor.u32 %v6225_v29, %v4442_v31  ;;  %v4449_v57 = vor.u32 %v6235_v49, %v4448_v48 }
  0xb1   :  { %1608 = vmatpush.bf16.msrb.mxu0 %v1191_v46  ;;  %v4594_v46 = vld [vmem:[#allocation2 + $0x238] sm:$0xf0]  ;;  %v1249_v37 = vpop.f32.mrf.mxu3 }
  0xb2   :  { %1615 = vmatpush.bf16.msrb.mxu2 %v4881_v42  ;;  %v6207_v42 = vld [vmem:[#allocation2 + $0x3c] sm:$0xf]  ;;  %v4597_v51 = vor.u32 %v6262_v45, %v4594_v46 }
  0xb3   :  { %1568 = vmatpush.bf16.msrb.mxu3 %v4513_v39  ;;  %1592 = vmatpush.bf16.msra.mxu1 %v4661_v63  ;;  %v1223_v40 = vpop.f32.mrf.mxu1  ;;  %v4370_v39 = vld [vmem:[#allocation2 + $0x80] sm:$0xf0]  ;;  %v4525_v63 = vor.u32 %v6244_v54, %v4522_v55 }
  0xb4   :  { %v4373_v50 = vor.u32 %v6207_v42, %v4370_v39 }
  0xb5   :  { %1609 = vmatpush.bf16.msrb.mxu0 %v4949_v60  ;;  %v4376_v60 = vld [vmem:[#allocation2 + $0x40] sm:$0xf]  ;;  %v1208_v62 = vpop.f32.mrf.mxu0 }
  0xb6   :  { %1616 = vmatpush.bf16.msrb.mxu2 %v4809_v58  ;;  %v6352_v58 = vld [vmem:[#allocation2 + $0x4c4] sm:$0xf]  ;;  %v7035_v0 = vadd.f32 %v7020_v12, %v1208_v62  ;;  %v4377_v4 = vor.u32 %v6217_v61, %v4376_v60 }
  0xb7   :  { %1569 = vmatpush.bf16.msrb.mxu3 %v4441_v59  ;;  %1593 = vmatpush.bf16.msra.mxu1 %v4589_v13  ;;  %v4954_v59 = vld [vmem:[#allocation2 + $0x508] sm:$0xf0] }
  0xb9   :  { %1641 = vmatpush.bf16.msra.mxu0 %v4885_v3  ;;  %4972 = vmatmul.msk.bf16.vlgmr.msra.gmra.mxu2 %vm1137_vm2, %v6940_v52  ;;  %v4957_v3 = vor.u32 %v6352_v58, %v4954_v59  ;;  %v1273_v5 = vpop.f32.mrf.mxu3 }
  0xba   :  { %1617 = vmatpush.bf16.msrb.mxu2 %v4737_v8 }
  0xbb   :  { %1570 = vmatpush.bf16.msrb.mxu3 %v4369_v9  ;;  %1594 = vmatpush.bf16.msra.mxu1 %v4517_v27 }
  0xbc   :  { %v1234_v8 = vpop.f32.mrf.mxu2 }
  0xbd   :  { %1642 = vmatpush.bf16.msra.mxu0 %v4813_v16  ;;  %v7041_v9 = vadd.f32 %v7025_v26, %v1234_v8  ;;  %v1210_v10 = vpop.f32.mrf.mxu0 }
  0xbe   :  { %1571 = vmatmul.bf16.vlgmr.msrb.gmra.mxu3 %v6951_v53  ;;  %1618 = vmatpush.bf16.msrb.mxu2 %v4665_v21 }
  0xbf   :  { %1634 = vmatpush.bf16.msra.mxu3 %v1194_v20  ;;  %1595 = vmatpush.bf16.msra.mxu1 %v4445_v41 }
  0xc0   :  { %4973 = vmatmul.msk.bf16.vlgmr.msrb.gmra.mxu0 %vm1137_vm2, %v6940_v52 }
  0xc1   :  { %1643 = vmatpush.bf16.msra.mxu0 %v4741_v30  ;;  %v1275_v14 = vpop.f32.mrf.mxu3 }
  0xc2   :  { %1619 = vmatpush.bf16.msrb.mxu2 %v4593_v28 }
  0xc3   :  { %1635 = vmatpush.bf16.msra.mxu3 %v4953_v34  ;;  %1596 = vmatpush.bf16.msra.mxu1 %v4373_v50  ;;  %v1260_v12 = vpop.f32.mrf.mxu1 }
  0xc4   :  { %v7044_v13 = vadd.f32 %v1273_v5, %v1260_v12  ;;  %v1236_v16 = vpop.f32.mrf.mxu2 }
  0xc5   :  { %1644 = vmatpush.bf16.msra.mxu0 %v4669_v43  ;;  %v1299_v17 = vpop.f32.mrf.mxu0 }
  0xc6   :  { %1620 = vmatpush.bf16.msrb.mxu2 %v4521_v47  ;;  %1597 = vmatmul.bf16.vlgmr.msra.gmra.mxu1 %v6951_v53 }
  0xc7   :  { %1660 = vmatpush.bf16.msrb.mxu1 %v1197_v56 }
  0xc9   :  { %1645 = vmatpush.bf16.msra.mxu0 %v4597_v51 }
  0xca   :  { %1621 = vmatpush.bf16.msrb.mxu2 %v4449_v57 }
  0xcb   :  { %1661 = vmatpush.bf16.msrb.mxu1 %v4957_v3  ;;  %v1262_v18 = vpop.f32.mrf.mxu1 }
  0xcd   :  { %1646 = vmatpush.bf16.msra.mxu0 %v4525_v63  ;;  %v1301_v21 = vpop.f32.mrf.mxu0 }
  0xce   :  { %1622 = vmatpush.bf16.msrb.mxu2 %v4377_v4  ;;  %4974 = vmatmul.msk.bf16.vlgmr.msra.gmra.mxu3 %vm1137_vm2, %v6940_v52 }
  0xd1   :  { %1647 = vmatpush.bf16.msra.mxu0 %v4453_v15  ;;  %1623 = vmatmul.bf16.vlgmr.msrb.gmra.mxu2 %v6951_v53  ;;  %v1286_v19 = vpop.f32.mrf.mxu3 }
  0xd2   :  { %v7049_v20 = vadd.f32 %v1299_v17, %v1286_v19 }
  0xd3   :  { %v1325_v22 = vpop.f32.mrf.mxu1 }
  0xd5   :  { %1648 = vmatpush.bf16.msra.mxu0 %v4381_v11 }
  0xd6   :  { %4975 = vmatmul.msk.bf16.vlgmr.msrb.gmra.mxu1 %vm1137_vm2, %v6940_v52 }
  0xd8   :  { %1649 = vmatmul.bf16.vlgmr.msra.gmra.mxu0 %v6951_v53 }
  0xd9   :  { %v1288_v23 = vpop.f32.mrf.mxu3 }
  0xdb   :  { %v1327_v24 = vpop.f32.mrf.mxu1 }
  0xdc   :  { %v1312_v25 = vpop.f32.mrf.mxu2 }
  0xdd   :  { %v1338_v26 = vpop.f32.mrf.mxu0  ;;  %v7051_v27 = vadd.f32 %v1325_v22, %v1312_v25 }
  0xdf   :  { %1672 = vrot.lane.b32.xlu0 %v7051_v27, %s6844_s0 }
  0xe3   :  { %v1351_v53 = vpop.f32.mrf.mxu1 }
  0xe4   :  { %v1352_v29 = vadd.f32 %v1351_v53, %v1338_v26  ;;  %v1314_v30 = vpop.f32.mrf.mxu2 }
  0xe5   :  { %v1340_v52 = vpop.f32.mrf.mxu0 }
  0xe7   :  { %1674 = vrot.lane.b32.xlu0 %v1352_v29, %s6844_s0 }
  0xeb   :  { %v1353_v31 = vpop.f32.mrf.mxu1 }
  0xec   :  { %v1377_v33 = vpop.f32.mrf.mxu2 }
  0xed   :  { %v1403_v35 = vpop.f32.mrf.mxu0 }
  0xf1   :  { %v1364_v32 = vpop.f32.mrf.mxu3 }
  0xf2   :  { %v1378_v34 = vadd.f32 %v1377_v33, %v1364_v32  ;;  %v5218_v33 = vld [vmem:[#allocation5 + $0x1e0] sm:$0xf] }
  0xf3   :  { %v1390_v36 = vpop.f32.mrf.mxu1 }
  0xf4   :  { %1676 = vrot.lane.b32.xlu2 %v1378_v34, %s6844_s0  ;;  %v1404_v38 = vadd.f32 %v1403_v35, %v1390_v36  ;;  %v1379_v40 = vpop.f32.mrf.mxu2  ;;  %v6424_v34 = vld [vmem:[#allocation5 + $0x1ec] sm:$0xf0]  ;;  %v5202_v35 = vld [vmem:[#allocation5 + $0x1c0] sm:$0xf] }
  0xf5   :  { %v1405_v41 = vpop.f32.mrf.mxu0  ;;  %v6420_v36 = vld [vmem:[#allocation5 + $0x1cc] sm:$0xf0]  ;;  %v5090_v40 = vld [vmem:[#allocation5 + $0xe0] sm:$0xf] }
  0xf6   :  { %v6392_v41 = vld [vmem:[#allocation5 + $0xec] sm:$0xf0] }
  0xf9   :  { %v1366_v28 = vpop.f32.mrf.mxu3 }
  0xfa   :  { %v5219_v28 = vor.u32 %v6424_v34, %v5218_v33  ;;  %v6396_v34 = vld [vmem:[#allocation5 + $0x10c] sm:$0xf0] }
  0xfb   :  { %v1392_v42 = vpop.f32.mrf.mxu1 }
  0xfc   :  { %2648 = vmatpush.bf16.msra.mxu2 %v5219_v28  ;;  %v5346_v42 = vld [vmem:[#allocation5 + $0x2e0] sm:$0xf]  ;;  %v6376_v28 = vld [vmem:[#allocation5 + $0x6c] sm:$0xf0] }
 0x101   :  { %v1429_v43 = vpop.f32.mrf.mxu3 }
 0x103   :  { %v1455_v44 = vpop.f32.mrf.mxu1 }
 0x104   :  { %v1416_v45 = vpop.f32.mrf.mxu2 }
 0x105   :  { %v1442_v39 = vpop.f32.mrf.mxu0  ;;  %v1430_v46 = vadd.f32 %v1429_v43, %v1416_v45  ;;  %v6456_v43 = vld [vmem:[#allocation5 + $0x2ec] sm:$0xf0] }
 0x106   :  { %v7058_v48 = vadd.f32 %v1455_v44, %v1442_v39  ;;  %v5186_v39 = vld [vmem:[#allocation5 + $0x1a0] sm:$0xf]  ;;  %v6416_v45 = vld [vmem:[#allocation5 + $0x1ac] sm:$0xf0]  ;;  %v5347_v44 = vor.u32 %v6456_v43, %v5346_v42 }
 0x107   :  { %1680 = vrot.lane.b32.xlu0 %v1430_v46, %s6844_s0  ;;  %v5091_v46 = vor.u32 %v6392_v41, %v5090_v40  ;;  %v5092_v41 = vld [vmem:[#allocation5 + $0xf0] sm:$0xf0]  ;;  %v5426_v42 = vld [vmem:[#allocation5 + $0x380] sm:$0xf] }
 0x108   :  { %2661 = vmatpush.bf16.msra.mxu1 %v5347_v44 }
 0x109   :  { %v1431_v47 = vpop.f32.mrf.mxu3  ;;  %2635 = vmatpush.bf16.msrb.mxu3 %v5091_v46  ;;  %v6440_v46 = vld [vmem:[#allocation5 + $0x26c] sm:$0xf0] }
 0x10a   :  { %v5074_v47 = vld [vmem:[#allocation5 + $0xc0] sm:$0xf] }
 0x10b   :  { %v1457_v50 = vpop.f32.mrf.mxu1 }
 0x10c   :  { %v1418_v37 = vpop.f32.mrf.mxu2  ;;  %v6488_v50 = vld [vmem:[#allocation5 + $0x3ec] sm:$0xf0] }
 0x10d   :  { %v1444_v49 = vpop.f32.mrf.mxu0  ;;  %v5474_v37 = vld [vmem:[#allocation5 + $0x3e0] sm:$0xf] }
 0x10e   :  { %v6388_v49 = vld [vmem:[#allocation5 + $0xcc] sm:$0xf0] }
 0x114   :  { %v1481_v54 = vpop.f32.mrf.mxu2 }
 0x115   :  { %v1507_v55 = vpop.f32.mrf.mxu0 }
 0x119   :  { %v1468_v51 = vpop.f32.mrf.mxu3 }
 0x11a   :  { %v7060_v56 = vadd.f32 %v1481_v54, %v1468_v51  ;;  %v5170_v51 = vld [vmem:[#allocation5 + $0x180] sm:$0xf]  ;;  %v5075_v54 = vor.u32 %v6388_v49, %v5074_v47 }
 0x11b   :  { %v1494_v57 = vpop.f32.mrf.mxu1  ;;  %v5010_v49 = vld [vmem:[#allocation5 + $0x40] sm:$0xf] }
 0x11c   :  { %v7062_v58 = vadd.f32 %v1507_v55, %v1494_v57  ;;  %v1483_v60 = vpop.f32.mrf.mxu2  ;;  %v5475_v55 = vor.u32 %v6488_v50, %v5474_v37  ;;  %v5330_v57 = vld [vmem:[#allocation5 + $0x2c0] sm:$0xf]  ;;  %2636 = vmatpush.bf16.msrb.mxu3 %v5075_v54  ;;  %v6372_v37 = vld [vmem:[#allocation5 + $0x4c] sm:$0xf0]  ;;  %v6386_v50 = vld [vmem:[#allocation5 + $0xc4] sm:$0xf] }
 0x11d   :  { %v1509_v61 = vpop.f32.mrf.mxu0  ;;  %v5187_v60 = vor.u32 %v6416_v45, %v5186_v39  ;;  %v6476_v39 = vld [vmem:[#allocation5 + $0x38c] sm:$0xf0]  ;;  %v5282_v45 = vld [vmem:[#allocation5 + $0x260] sm:$0xf]  ;;  %v5076_v54 = vld [vmem:[#allocation5 + $0xd0] sm:$0xf0] }
 0x11e   :  { %v6412_v61 = vld [vmem:[#allocation5 + $0x18c] sm:$0xf0]  ;;  %2674 = vmatpush.bf16.msrb.mxu0 %v5475_v55  ;;  %v5427_v44 = vor.u32 %v6476_v39, %v5426_v42  ;;  %v5283_v47 = vor.u32 %v6440_v46, %v5282_v45  ;;  %v5410_v55 = vld [vmem:[#allocation5 + $0x360] sm:$0xf]  ;;  %v6486_v45 = vld [vmem:[#allocation5 + $0x3e4] sm:$0xf] }
 0x11f   :  { %v5522_v42 = vld [vmem:[#allocation5 + $0x440] sm:$0xf]  ;;  %v6500_v39 = vld [vmem:[#allocation5 + $0x44c] sm:$0xf0]  ;;  %v5476_v46 = vld [vmem:[#allocation5 + $0x3f0] sm:$0xf0] }
 0x121   :  { %v1470_v59 = vpop.f32.mrf.mxu3 }
 0x122   :  { %v6452_v59 = vld [vmem:[#allocation5 + $0x2cc] sm:$0xf0] }
 0x123   :  { %v1496_v62 = vpop.f32.mrf.mxu1 }
 0x124   :  { %v5331_v62 = vor.u32 %v6452_v59, %v5330_v57  ;;  %v6472_v57 = vld [vmem:[#allocation5 + $0x36c] sm:$0xf0]  ;;  %v5079_v59 = vor.u32 %v6386_v50, %v5076_v54  ;;  %v5012_v54 = vld [vmem:[#allocation5 + $0x50] sm:$0xf0] }
 0x126   :  { %2662 = vmatpush.bf16.msra.mxu1 %v5331_v62  ;;  %v6436_v62 = vld [vmem:[#allocation5 + $0x24c] sm:$0xf0] }
 0x129   :  { %v1533_v63 = vpop.f32.mrf.mxu3 }
 0x12b   :  { %v1559_v4 = vpop.f32.mrf.mxu1 }
 0x12c   :  { %v1520_v1 = vpop.f32.mrf.mxu2 }
 0x12d   :  { %v1546_v2 = vpop.f32.mrf.mxu0  ;;  %v7064_v3 = vadd.f32 %v1533_v63, %v1520_v1  ;;  %v5058_v63 = vld [vmem:[#allocation5 + $0xa0] sm:$0xf]  ;;  %v6384_v1 = vld [vmem:[#allocation5 + $0xac] sm:$0xf0] }
 0x12e   :  { %v7066_v15 = vadd.f32 %v1559_v4, %v1546_v2  ;;  %v5458_v2 = vld [vmem:[#allocation5 + $0x3c0] sm:$0xf]  ;;  %v6484_v4 = vld [vmem:[#allocation5 + $0x3cc] sm:$0xf0] }
 0x130   :  { %1702 = vrot.lane.b32.xlu1 %v7066_v15, %s6844_s0 }
 0x131   :  { %v1535_v5 = vpop.f32.mrf.mxu3 }
 0x132   :  { %v5314_v5 = vld [vmem:[#allocation5 + $0x2a0] sm:$0xf] }
 0x133   :  { %v1561_v8 = vpop.f32.mrf.mxu1 }
 0x134   :  { %v1522_v6 = vpop.f32.mrf.mxu2  ;;  %v5059_v8 = vor.u32 %v6384_v1, %v5058_v63  ;;  %v4994_v1 = vld [vmem:[#allocation5 + $0x20] sm:$0xf] }
 0x135   :  { %v1548_v7 = vpop.f32.mrf.mxu0  ;;  %v5459_v6 = vor.u32 %v6484_v4, %v5458_v2  ;;  %v6368_v2 = vld [vmem:[#allocation5 + $0x2c] sm:$0xf0]  ;;  %v6382_v4 = vld [vmem:[#allocation5 + $0xa4] sm:$0xf] }
 0x136   :  { %v6448_v7 = vld [vmem:[#allocation5 + $0x2ac] sm:$0xf0]  ;;  %2637 = vmatpush.bf16.msrb.mxu3 %v5059_v8 }
 0x137   :  { %2675 = vmatpush.bf16.msrb.mxu0 %v5459_v6  ;;  %v5060_v6 = vld [vmem:[#allocation5 + $0xb0] sm:$0xf0]  ;;  %v6468_v8 = vld [vmem:[#allocation5 + $0x34c] sm:$0xf0] }
 0x13c   :  { %v1585_v11 = vpop.f32.mrf.mxu2 }
 0x13d   :  { %v1611_v12 = vpop.f32.mrf.mxu0 }
 0x141   :  { %v1572_v10 = vpop.f32.mrf.mxu3 }
 0x142   :  { %v1586_v14 = vadd.f32 %v1585_v11, %v1572_v10  ;;  %v5315_v10 = vor.u32 %v6448_v7, %v5314_v5  ;;  %v5171_v11 = vor.u32 %v6412_v61, %v5170_v51  ;;  %v5011_v51 = vor.u32 %v6372_v37, %v5010_v49  ;;  %v5266_v61 = vld [vmem:[#allocation5 + $0x240] sm:$0xf]  ;;  %v6418_v49 = vld [vmem:[#allocation5 + $0x1c4] sm:$0xf]  ;;  %v5204_v37 = vld [vmem:[#allocation5 + $0x1d0] sm:$0xf0] }
 0x143   :  { %v1598_v16 = vpop.f32.mrf.mxu1  ;;  %v5267_v63 = vor.u32 %v6436_v62, %v5266_v61  ;;  %v4995_v5 = vor.u32 %v6368_v2, %v4994_v1  ;;  %v5394_v7 = vld [vmem:[#allocation5 + $0x340] sm:$0xf]  ;;  %v5207_v50 = vor.u32 %v6418_v49, %v5204_v37  ;;  %v6482_v61 = vld [vmem:[#allocation5 + $0x3c4] sm:$0xf]  ;;  %v5460_v62 = vld [vmem:[#allocation5 + $0x3d0] sm:$0xf0] }
 0x144   :  { %1704 = vrot.lane.b32.xlu1 %v1586_v14, %s6844_s0  ;;  %v1612_v17 = vadd.f32 %v1611_v12, %v1598_v16  ;;  %v1587_v19 = vpop.f32.mrf.mxu2  ;;  %v5154_v12 = vld [vmem:[#allocation5 + $0x160] sm:$0xf]  ;;  %v6408_v14 = vld [vmem:[#allocation5 + $0x16c] sm:$0xf0]  ;;  %2663 = vmatpush.bf16.msra.mxu1 %v5315_v10  ;;  %v5063_v10 = vor.u32 %v6382_v4, %v5060_v6  ;;  %v6414_v1 = vld [vmem:[#allocation5 + $0x1a4] sm:$0xf] }
 0x145   :  { %v1613_v21 = vpop.f32.mrf.mxu0  ;;  %v5155_v16 = vor.u32 %v6408_v14, %v5154_v12  ;;  %v5250_v12 = vld [vmem:[#allocation5 + $0x220] sm:$0xf]  ;;  %v6432_v14 = vld [vmem:[#allocation5 + $0x22c] sm:$0xf0]  ;;  %v5188_v2 = vld [vmem:[#allocation5 + $0x1b0] sm:$0xf0] }
 0x146   :  { %1706 = vrot.lane.b32.xlu2 %v1612_v17, %s6844_s0  ;;  %v5138_v17 = vld [vmem:[#allocation5 + $0x140] sm:$0xf]  ;;  %v5191_v4 = vor.u32 %v6414_v1, %v5188_v2  ;;  %v4996_v6 = vld [vmem:[#allocation5 + $0x30] sm:$0xf0]  ;;  %v6394_v37 = vld [vmem:[#allocation5 + $0x104] sm:$0xf] }
 0x147   :  { %v5122_v21 = vld [vmem:[#allocation5 + $0x120] sm:$0xf] }
 0x149   :  { %v1574_v18 = vpop.f32.mrf.mxu3 }
 0x14a   :  { %v6404_v18 = vld [vmem:[#allocation5 + $0x14c] sm:$0xf0] }
 0x14b   :  { %v1600_v22 = vpop.f32.mrf.mxu1  ;;  %v5139_v19 = vor.u32 %v6404_v18, %v5138_v17  ;;  %v5251_v17 = vor.u32 %v6432_v14, %v5250_v12  ;;  %v6364_v18 = vld [vmem:[#allocation5 + $0xc] sm:$0xf0]  ;;  %v6478_v12 = vld [vmem:[#allocation5 + $0x3a4] sm:$0xf]  ;;  %v5444_v14 = vld [vmem:[#allocation5 + $0x3b0] sm:$0xf0] }
 0x14c   :  { %v6400_v22 = vld [vmem:[#allocation5 + $0x12c] sm:$0xf0] }
 0x14e   :  { %1678 = vrot.lane.b32.xlu2 %v1404_v38, %s6844_s0  ;;  %v5203_v38 = vor.u32 %v6420_v36, %v5202_v35  ;;  %v5026_v35 = vld [vmem:[#allocation5 + $0x60] sm:$0xf] }
 0x14f   :  { %v5027_v40 = vor.u32 %v6376_v28, %v5026_v35  ;;  %v6374_v28 = vld [vmem:[#allocation5 + $0x64] sm:$0xf] }
 0x150   :  { %2649 = vmatpush.bf16.msra.mxu2 %v5203_v38  ;;  %v6390_v38 = vld [vmem:[#allocation5 + $0xe4] sm:$0xf] }
 0x151   :  { %v1637_v23 = vpop.f32.mrf.mxu3  ;;  %v5095_v43 = vor.u32 %v6390_v38, %v5092_v41  ;;  %v5362_v38 = vld [vmem:[#allocation5 + $0x300] sm:$0xf]  ;;  %v6460_v41 = vld [vmem:[#allocation5 + $0x30c] sm:$0xf0] }
 0x153   :  { %v1663_v53 = vpop.f32.mrf.mxu1 }
 0x154   :  { %v1624_v24 = vpop.f32.mrf.mxu2  ;;  %2650 = vmatpush.bf16.msra.mxu2 %v5187_v60  ;;  %v5411_v60 = vor.u32 %v6472_v57, %v5410_v55  ;;  %v5506_v57 = vld [vmem:[#allocation5 + $0x420] sm:$0xf] }
 0x155   :  { %v1650_v25 = vpop.f32.mrf.mxu0  ;;  %v1638_v26 = vadd.f32 %v1637_v23, %v1624_v24  ;;  %v5123_v23 = vor.u32 %v6400_v22, %v5122_v21  ;;  %v5042_v24 = vld [vmem:[#allocation5 + $0x80] sm:$0xf]  ;;  %v5044_v21 = vld [vmem:[#allocation5 + $0x90] sm:$0xf0] }
 0x156   :  { %v1664_v29 = vadd.f32 %v1663_v53, %v1650_v25  ;;  %v6380_v25 = vld [vmem:[#allocation5 + $0x8c] sm:$0xf0]  ;;  %v5442_v53 = vld [vmem:[#allocation5 + $0x3a0] sm:$0xf] }
 0x157   :  { %1708 = vrot.lane.b32.xlu0 %v1638_v26, %s6844_s0  ;;  %v5043_v26 = vor.u32 %v6380_v25, %v5042_v24  ;;  %v5378_v24 = vld [vmem:[#allocation5 + $0x320] sm:$0xf]  ;;  %v6464_v25 = vld [vmem:[#allocation5 + $0x32c] sm:$0xf0] }
 0x158   :  { %1710 = vrot.lane.b32.xlu1 %v1664_v29, %s6844_s0  ;;  %2651 = vmatpush.bf16.msra.mxu2 %v5171_v11  ;;  %v6480_v29 = vld [vmem:[#allocation5 + $0x3ac] sm:$0xf0]  ;;  %v5395_v11 = vor.u32 %v6468_v8, %v5394_v7  ;;  %v5490_v7 = vld [vmem:[#allocation5 + $0x400] sm:$0xf] }
 0x159   :  { %v1639_v30 = vpop.f32.mrf.mxu3  ;;  %2638 = vmatpush.bf16.msrb.mxu3 %v5043_v26  ;;  %v5538_v26 = vld [vmem:[#allocation5 + $0x460] sm:$0xf] }
 0x15a   :  { %v5443_v30 = vor.u32 %v6480_v29, %v5442_v53  ;;  %v5379_v53 = vor.u32 %v6464_v25, %v5378_v24  ;;  %v6504_v29 = vld [vmem:[#allocation5 + $0x46c] sm:$0xf0]  ;;  %v6474_v24 = vld [vmem:[#allocation5 + $0x384] sm:$0xf]  ;;  %v5428_v25 = vld [vmem:[#allocation5 + $0x390] sm:$0xf0] }
 0x15b   :  { %v1665_v32 = vpop.f32.mrf.mxu1 }
 0x15c   :  { %v1626_v31 = vpop.f32.mrf.mxu2  ;;  %2652 = vmatpush.bf16.msra.mxu2 %v5155_v16  ;;  %v5106_v32 = vld [vmem:[#allocation5 + $0x100] sm:$0xf]  ;;  %2676 = vmatpush.bf16.msrb.mxu0 %v5443_v30 }
 0x15d   :  { %v1652_v52 = vpop.f32.mrf.mxu0  ;;  %v6444_v31 = vld [vmem:[#allocation5 + $0x28c] sm:$0xf0]  ;;  %v5107_v36 = vor.u32 %v6396_v34, %v5106_v32  ;;  %2639 = vmatpush.bf16.msrb.mxu3 %v5027_v40  ;;  %v4978_v16 = vld [vmem:[#allocation5] sm:$0xf]  ;;  %v5220_v34 = vld [vmem:[#allocation5 + $0x1f0] sm:$0xf0] }
 0x15e   :  { %v5298_v52 = vld [vmem:[#allocation5 + $0x280] sm:$0xf]  ;;  %v4979_v22 = vor.u32 %v6364_v18, %v4978_v16  ;;  %v6410_v16 = vld [vmem:[#allocation5 + $0x184] sm:$0xf]  ;;  %v5447_v18 = vor.u32 %v6478_v12, %v5444_v14 }
 0x15f   :  { %v5299_v33 = vor.u32 %v6444_v31, %v5298_v52  ;;  %v5234_v30 = vld [vmem:[#allocation5 + $0x200] sm:$0xf]  ;;  %v6428_v52 = vld [vmem:[#allocation5 + $0x20c] sm:$0xf0]  ;;  %v5539_v31 = vor.u32 %v6504_v29, %v5538_v26  ;;  %v5431_v26 = vor.u32 %v6474_v24, %v5428_v25  ;;  %v5156_v29 = vld [vmem:[#allocation5 + $0x170] sm:$0xf0] }
 0x160   :  { %2653 = vmatpush.bf16.msra.mxu2 %v5139_v19  ;;  %2677 = vmatpush.bf16.msrb.mxu0 %v5427_v44  ;;  %v6378_v19 = vld [vmem:[#allocation5 + $0x84] sm:$0xf]  ;;  %v5235_v32 = vor.u32 %v6428_v52, %v5234_v30  ;;  %v5523_v44 = vor.u32 %v6500_v39, %v5522_v42  ;;  %v1673_v52 = vpop.permute.xlu0 %1672  ;;  %v5124_v42 = vld [vmem:[#allocation5 + $0x130] sm:$0xf0] }
 0x161   :  { %2664 = vmatpush.bf16.msra.mxu1 %v5299_v33  ;;  %2640 = vmatpush.bf16.msrb.mxu3 %v5011_v51  ;;  %v6422_v33 = vld [vmem:[#allocation5 + $0x1e4] sm:$0xf] }
 0x162   :  { %v5223_v35 = vor.u32 %v6422_v33, %v5220_v34  ;;  %v6370_v51 = vld [vmem:[#allocation5 + $0x44] sm:$0xf]  ;;  %v5140_v34 = vld [vmem:[#allocation5 + $0x150] sm:$0xf0] }
 0x163   :  { %v5015_v55 = vor.u32 %v6370_v51, %v5012_v54  ;;  %v6402_v33 = vld [vmem:[#allocation5 + $0x144] sm:$0xf] }
 0x164   :  { %2654 = vmatpush.bf16.msra.mxu2 %v5123_v23  ;;  %2678 = vmatpush.bf16.msrb.mxu0 %v5411_v60  ;;  %v5047_v23 = vor.u32 %v6378_v19, %v5044_v21  ;;  %v6362_v21 = vld [vmem:[#allocation5 + $0x4] sm:$0xf] }
 0x165   :  { %2665 = vmatpush.bf16.msra.mxu1 %v5283_v47  ;;  %2641 = vmatpush.bf16.msrb.mxu3 %v4995_v5  ;;  %v5479_v47 = vor.u32 %v6486_v45, %v5476_v46  ;;  %v6366_v5 = vld [vmem:[#allocation5 + $0x24] sm:$0xf] }
 0x166   :  { %v4999_v8 = vor.u32 %v6366_v5, %v4996_v6  ;;  %v6454_v14 = vld [vmem:[#allocation5 + $0x2e4] sm:$0xf] }
 0x167   :  { %v6450_v24 = vld [vmem:[#allocation5 + $0x2c4] sm:$0xf] }
 0x168   :  { %2655 = vmatpush.bf16.msra.mxu2 %v5107_v36  ;;  %2679 = vmatpush.bf16.msrb.mxu0 %v5395_v11  ;;  %v5028_v36 = vld [vmem:[#allocation5 + $0x70] sm:$0xf0]  ;;  %v1675_v46 = vpop.permute.xlu0 %1674 }
 0x169   :  { %2666 = vmatpush.bf16.msra.mxu1 %v5267_v63  ;;  %2642 = vmatpush.bf16.msrb.mxu3 %v4979_v22  ;;  %v5031_v40 = vor.u32 %v6374_v28, %v5028_v36  ;;  %v5463_v63 = vor.u32 %v6482_v61, %v5460_v62  ;;  %v4980_v22 = vld [vmem:[#allocation5 + $0x10] sm:$0xf0]  ;;  %v5143_v28 = vor.u32 %v6402_v33, %v5140_v34  ;;  %v6494_v34 = vld [vmem:[#allocation5 + $0x424] sm:$0xf] }
 0x16a   :  { %v1683_v54 = vsel %vm1682_vm3, %v1673_v52, %v1675_v46  ;;  %v5316_v33 = vld [vmem:[#allocation5 + $0x2b0] sm:$0xf0] }
 0x16b   :  { %v1692_v1 = vmax.f32 %v7035_v0, %v1683_v54 }
 0x16c   :  { %2700 = vmatpush.bf16.msrb.mxu2 %v5095_v43  ;;  %2680 = vmatpush.bf16.msrb.mxu0 %v5379_v53  ;;  %v5363_v43 = vor.u32 %v6460_v41, %v5362_v38  ;;  %v6406_v53 = vld [vmem:[#allocation5 + $0x164] sm:$0xf]  ;;  %v5396_v38 = vld [vmem:[#allocation5 + $0x350] sm:$0xf0] }
 0x16d   :  { %2667 = vmatpush.bf16.msra.mxu1 %v5251_v17  ;;  %2691 = vmatpush.bf16.msra.mxu3 %v5539_v31  ;;  %v5172_v17 = vld [vmem:[#allocation5 + $0x190] sm:$0xf0]  ;;  %v5159_v30 = vor.u32 %v6406_v53, %v5156_v29  ;;  %v6470_v31 = vld [vmem:[#allocation5 + $0x364] sm:$0xf] }
 0x16e   :  { %v5175_v19 = vor.u32 %v6410_v16, %v5172_v17  ;;  %v6398_v41 = vld [vmem:[#allocation5 + $0x124] sm:$0xf]  ;;  %v5348_v17 = vld [vmem:[#allocation5 + $0x2f0] sm:$0xf0] }
 0x16f   :  { %v5127_v45 = vor.u32 %v6398_v41, %v5124_v42  ;;  %v6498_v53 = vld [vmem:[#allocation5 + $0x444] sm:$0xf]  ;;  %v5524_v29 = vld [vmem:[#allocation5 + $0x450] sm:$0xf0] }
 0x170   :  { %2701 = vmatpush.bf16.msrb.mxu2 %v5079_v59  ;;  %2681 = vmatpush.bf16.msrb.mxu0 %v5363_v43  ;;  %v6496_v59 = vld [vmem:[#allocation5 + $0x42c] sm:$0xf0]  ;;  %v7075_v43 = vpop.permute.xlu2 %1676  ;;  %v5527_v52 = vor.u32 %v6498_v53, %v5524_v29  ;;  %v5300_v42 = vld [vmem:[#allocation5 + $0x290] sm:$0xf0]  ;;  %v6481_v53 = vld [vmem:[#allocation5 + $0x3b4] sm:$0xf0] }
 0x171   :  { %2668 = vmatpush.bf16.msra.mxu1 %v5235_v32  ;;  %2692 = vmatpush.bf16.msra.mxu3 %v5523_v44  ;;  %v5507_v60 = vor.u32 %v6496_v59, %v5506_v57  ;;  %v5412_v32 = vld [vmem:[#allocation5 + $0x370] sm:$0xf0]  ;;  %v6462_v44 = vld [vmem:[#allocation5 + $0x324] sm:$0xf]  ;;  %v7083_v57 = vld [vmem:[%s7287_s3] sm:$0x1f] }
 0x172   :  { %v6458_v59 = vld [vmem:[#allocation5 + $0x304] sm:$0xf]  ;;  %v1733_v6 = vperm.slane %v7083_v57, 0 }
 0x174   :  { %2702 = vmatpush.bf16.msrb.mxu2 %v5063_v10  ;;  %2739 = vmatpush.bf16.msra.mxu0 %v5479_v47  ;;  %v6492_v10 = vld [vmem:[#allocation5 + $0x40c] sm:$0xf0]  ;;  %v5380_v47 = vld [vmem:[#allocation5 + $0x330] sm:$0xf0] }
 0x175   :  { %2713 = vmatpush.bf16.msrb.mxu1 %v5223_v35  ;;  %2693 = vmatpush.bf16.msra.mxu3 %v5507_v60  ;;  %v5491_v11 = vor.u32 %v6492_v10, %v5490_v7  ;;  %v5415_v35 = vor.u32 %v6470_v31, %v5412_v32  ;;  %v5383_v49 = vor.u32 %v6462_v44, %v5380_v47  ;;  %v5364_v60 = vld [vmem:[#allocation5 + $0x310] sm:$0xf0]  ;;  %v1734_v7 = vperm.slane %v7083_v57, 1  ;;  %v6446_v31 = vld [vmem:[#allocation5 + $0x2a4] sm:$0xf] }
 0x176   :  { %v1735_v47 = vperm.slane %v7083_v57, 2 }
 0x178   :  { %2703 = vmatpush.bf16.msrb.mxu2 %v5047_v23  ;;  %2740 = vmatpush.bf16.msra.mxu0 %v5463_v63  ;;  %v4983_v23 = vor.u32 %v6362_v21, %v4980_v22  ;;  %v5367_v63 = vor.u32 %v6458_v59, %v5364_v60  ;;  %v5351_v22 = vor.u32 %v6454_v14, %v5348_v17  ;;  %v5284_v59 = vld [vmem:[#allocation5 + $0x270] sm:$0xf0]  ;;  %v5482_v60 = vld [vmem:[#allocation5 + $0x3e8] sm:$0xf]  ;;  %v6434_v17 = vld [vmem:[#allocation5 + $0x244] sm:$0xf] }
 0x179   :  { %2714 = vmatpush.bf16.msrb.mxu1 %v5207_v50  ;;  %2694 = vmatpush.bf16.msra.mxu3 %v5491_v11  ;;  %v5108_v50 = vld [vmem:[#allocation5 + $0x110] sm:$0xf0]  ;;  %v1681_v25 = vpop.permute.xlu0 %1680  ;;  %v5466_v14 = vld [vmem:[#allocation5 + $0x3c8] sm:$0xf] }
 0x17a   :  { %v5111_v51 = vor.u32 %v6394_v37, %v5108_v50 }
 0x17c   :  { %2704 = vmatpush.bf16.msrb.mxu2 %v5031_v40  ;;  %2741 = vmatpush.bf16.msra.mxu0 %v5447_v18  ;;  %v6466_v40 = vld [vmem:[#allocation5 + $0x344] sm:$0xf]  ;;  %v5540_v18 = vld [vmem:[#allocation5 + $0x470] sm:$0xf0] }
 0x17d   :  { %2715 = vmatpush.bf16.msrb.mxu1 %v5191_v4  ;;  %v5399_v39 = vor.u32 %v6466_v40, %v5396_v38  ;;  %v6442_v38 = vld [vmem:[#allocation5 + $0x284] sm:$0xf] }
 0x180   :  { %2705 = vmatpush.bf16.msrb.mxu2 %v5015_v55  ;;  %2742 = vmatpush.bf16.msra.mxu0 %v5431_v26  ;;  %v1684_v55 = vsel %vm1682_vm3, %v1675_v46, %v7075_v43 }
 0x181   :  { %2716 = vmatpush.bf16.msrb.mxu1 %v5175_v19  ;;  %v1693_v2 = vmax.f32 %v7041_v9, %v1684_v55  ;;  %v6502_v9 = vld [vmem:[#allocation5 + $0x464] sm:$0xf] }
 0x184   :  { %2706 = vmatpush.bf16.msrb.mxu2 %v4999_v8  ;;  %2743 = vmatpush.bf16.msra.mxu0 %v5415_v35  ;;  %v5508_v35 = vld [vmem:[#allocation5 + $0x430] sm:$0xf0] }
 0x185   :  { %2717 = vmatpush.bf16.msrb.mxu1 %v5159_v30  ;;  %v5511_v40 = vor.u32 %v6494_v34, %v5508_v35  ;;  %v6453_v35 = vld [vmem:[#allocation5 + $0x2d4] sm:$0xf0] }
 0x188   :  { %2707 = vmatpush.bf16.msrb.mxu2 %v4983_v23  ;;  %2744 = vmatpush.bf16.msra.mxu0 %v5399_v39  ;;  %v5543_v23 = vor.u32 %v6502_v9, %v5540_v18  ;;  %v6490_v39 = vld [vmem:[#allocation5 + $0x404] sm:$0xf]  ;;  %v5354_v9 = vld [vmem:[#allocation5 + $0x2e8] sm:$0xf] }
 0x189   :  { %2718 = vmatpush.bf16.msrb.mxu1 %v5143_v28 }
 0x18c   :  { %2745 = vmatpush.bf16.msra.mxu0 %v5383_v49 }
 0x18d   :  { %2719 = vmatpush.bf16.msrb.mxu1 %v5127_v45  ;;  %v5492_v45 = vld [vmem:[#allocation5 + $0x410] sm:$0xf0] }
 0x18e   :  { %v5495_v50 = vor.u32 %v6490_v39, %v5492_v45 }
 0x190   :  { %2746 = vmatpush.bf16.msra.mxu0 %v5367_v63 }
 0x191   :  { %2720 = vmatpush.bf16.msrb.mxu1 %v5111_v51  ;;  %v6438_v51 = vld [vmem:[#allocation5 + $0x264] sm:$0xf] }
 0x1a0   :  { %v1707_v61 = vpop.permute.xlu2 %1706 }
 0x1a2   :  { %v1703_v36 = vpop.permute.xlu1 %1702 }
 0x1a8   :  { %v1679_v32 = vpop.permute.xlu2 %1678 }
 0x1a9   :  { %v1685_v28 = vsel %vm1682_vm3, %v7075_v43, %v1679_v32  ;;  %v1686_v37 = vsel %vm1682_vm3, %v1679_v32, %v1681_v25  ;;  %v5303_v43 = vor.u32 %v6442_v38, %v5300_v42  ;;  %v5252_v32 = vld [vmem:[#allocation5 + $0x230] sm:$0xf0]  ;;  %v6477_v42 = vld [vmem:[#allocation5 + $0x394] sm:$0xf0] }
 0x1aa   :  { %v1694_v44 = vmax.f32 %v7044_v13, %v1685_v28  ;;  %v1737_v13 = vperm.slane %v7083_v57, 4  ;;  %v5066_v28 = vld [vmem:[#allocation5 + $0xa8] sm:$0xf] }
 0x1b6   :  { %v1705_v62 = vpop.permute.xlu1 %1704 }
 0x1b7   :  { %v1712_v4 = vsel %vm1682_vm3, %v1703_v36, %v1705_v62  ;;  %v1713_v5 = vsel %vm1682_vm3, %v1705_v62, %v1707_v61  ;;  %v5319_v36 = vor.u32 %v6446_v31, %v5316_v33  ;;  %v6489_v62 = vld [vmem:[#allocation5 + $0x3f4] sm:$0xf0]  ;;  %v6430_v31 = vld [vmem:[#allocation5 + $0x224] sm:$0xf]  ;;  %v5338_v33 = vld [vmem:[#allocation5 + $0x2c8] sm:$0xf] }
 0x1b8   :  { %v1721_v8 = vmax.f32 %v7058_v48, %v1712_v4  ;;  %v1722_v10 = vmax.f32 %v7060_v56, %v1713_v5  ;;  %v5332_v56 = vld [vmem:[#allocation5 + $0x2d0] sm:$0xf0]  ;;  %v1736_v4 = vperm.slane %v7083_v57, 3  ;;  %v6457_v57 = vld [vmem:[#allocation5 + $0x2f4] sm:$0xf0]  ;;  %v5255_v38 = vor.u32 %v6430_v31, %v5252_v32 }
 0x1b9   :  { %v5335_v30 = vor.u32 %v6450_v24, %v5332_v56  ;;  %v5450_v56 = vld [vmem:[#allocation5 + $0x3a8] sm:$0xf]  ;;  %v5339_v39 = vor.u32 %v6453_v35, %v5338_v33  ;;  %v6461_v31 = vld [vmem:[#allocation5 + $0x314] sm:$0xf0] }
 0x1ba   :  { %v1726_v11 = vmax.f32 %v1692_v1, %v1721_v8  ;;  %v1727_v12 = vmax.f32 %v1693_v2, %v1722_v10  ;;  %v1695_v1 = vmax.f32 %v7049_v20, %v1686_v37  ;;  %v5287_v10 = vor.u32 %v6438_v51, %v5284_v59  ;;  %v5268_v20 = vld [vmem:[#allocation5 + $0x250] sm:$0xf0]  ;;  %v5322_v37 = vld [vmem:[#allocation5 + $0x2a8] sm:$0xf] }
 0x1bb   :  { %v5050_v51 = vld [vmem:[#allocation5 + $0x88] sm:$0xf] }
 0x1bc   :  { %v1743_v16 = vadd.f32 %v1733_v6, %v1726_v11  ;;  %v1744_v0 = vadd.f32 %v1734_v7, %v1727_v12  ;;  %v5098_v6 = vld [vmem:[#allocation5 + $0xe8] sm:$0xf]  ;;  %v6393_v7 = vld [vmem:[#allocation5 + $0xf4] sm:$0xf0] }
 0x1bd   :  { %v5418_v59 = vld [vmem:[#allocation5 + $0x368] sm:$0xf] }
 0x1be   :  { %v1748_v19 = vmax.f32 %v1743_v16, 0.0  ;;  %v1749_v21 = vmax.f32 %v1744_v0, 0.0  ;;  %v6485_v16 = vld [vmem:[#allocation5 + $0x3d4] sm:$0xf0]  ;;  %v5162_v35 = vld [vmem:[#allocation5 + $0x168] sm:$0xf] }
 0x1c0   :  { %v7093_v26 = vpack.c.bf16 %v1748_v19, %v1748_v19  ;;  %v7095_v48 = vpack.c.bf16 %v1749_v21, %v1749_v21  ;;  %v5082_v19 = vld [vmem:[#allocation5 + $0xc8] sm:$0xf]  ;;  %v6389_v21 = vld [vmem:[#allocation5 + $0xd4] sm:$0xf0] }
 0x1c2   :  { %2643 = vmatmul.bf16.vlgmr.msrb.gmra.mxu3 %v7093_v26  ;;  %2656 = vmatmul.bf16.vlgmr.msra.gmra.mxu2 %v7095_v48 }
 0x1c3   :  { %2726 = vmatpush.bf16.msrb.mxu3 %v5351_v22  ;;  %2756 = vmatpush.bf16.msra.mxu2 %v5543_v23  ;;  %v5467_v23 = vor.u32 %v6485_v16, %v5466_v14  ;;  %v6417_v14 = vld [vmem:[#allocation5 + $0x1b4] sm:$0xf0]  ;;  %v5290_v16 = vld [vmem:[#allocation5 + $0x268] sm:$0xf] }
 0x1c7   :  { %2727 = vmatpush.bf16.msrb.mxu3 %v5335_v30  ;;  %2757 = vmatpush.bf16.msra.mxu2 %v5527_v52  ;;  %v5355_v30 = vor.u32 %v6457_v57, %v5354_v9  ;;  %v5083_v52 = vor.u32 %v6389_v21, %v5082_v19  ;;  %v5386_v9 = vld [vmem:[#allocation5 + $0x328] sm:$0xf] }
 0x1c8   :  { %v5178_v21 = vld [vmem:[#allocation5 + $0x188] sm:$0xf] }
 0x1c9   :  { %v1709_v41 = vpop.permute.xlu0 %1708 }
 0x1ca   :  { %v1714_v46 = vsel %vm1682_vm3, %v1707_v61, %v1709_v41  ;;  %v1711_v55 = vpop.permute.xlu1 %1710  ;;  %v1696_v61 = vmax.f32 %v7051_v27, %v1681_v25  ;;  %v5483_v27 = vor.u32 %v6489_v62, %v5482_v60  ;;  %v5271_v25 = vor.u32 %v6434_v17, %v5268_v20  ;;  %v6473_v60 = vld [vmem:[#allocation5 + $0x374] sm:$0xf0]  ;;  %v5018_v17 = vld [vmem:[#allocation5 + $0x48] sm:$0xf] }
 0x1cb   :  { %v1723_v49 = vmax.f32 %v7062_v58, %v1714_v46  ;;  %2728 = vmatpush.bf16.msrb.mxu3 %v5319_v36  ;;  %2758 = vmatpush.bf16.msra.mxu2 %v5511_v40  ;;  %v1715_v63 = vsel %vm1682_vm3, %v1709_v41, %v1711_v55  ;;  %v1725_v58 = vmax.f32 %v7066_v15, %v1711_v55  ;;  %v6385_v36 = vld [vmem:[#allocation5 + $0xb4] sm:$0xf0]  ;;  %v5434_v41 = vld [vmem:[#allocation5 + $0x388] sm:$0xf]  ;;  %v6426_v46 = vld [vmem:[#allocation5 + $0x204] sm:$0xf] }
 0x1cc   :  { %v1724_v5 = vmax.f32 %v7064_v3, %v1715_v63  ;;  %v5099_v15 = vor.u32 %v6393_v7, %v5098_v6  ;;  %v5451_v40 = vor.u32 %v6481_v53, %v5450_v56  ;;  %v5067_v45 = vor.u32 %v6385_v36, %v5066_v28  ;;  %v6377_v6 = vld [vmem:[#allocation5 + $0x74] sm:$0xf0]  ;;  %v5402_v7 = vld [vmem:[#allocation5 + $0x348] sm:$0xf]  ;;  %v6455_v28 = vld [vmem:[#allocation5 + $0x2ec] sm:$0xf] }
 0x1cd   :  { %v1728_v54 = vmax.f32 %v1694_v44, %v1723_v49  ;;  %v1730_v8 = vmax.f32 %v1696_v61, %v1725_v58  ;;  %v5236_v44 = vld [vmem:[#allocation5 + $0x210] sm:$0xf0]  ;;  %v6425_v49 = vld [vmem:[#allocation5 + $0x1f4] sm:$0xf0]  ;;  %v5002_v53 = vld [vmem:[#allocation5 + $0x28] sm:$0xf] }
 0x1ce   :  { %v1729_v12 = vmax.f32 %v1695_v1, %v1724_v5  ;;  %v5239_v55 = vor.u32 %v6426_v46, %v5236_v44  ;;  %v6421_v58 = vld [vmem:[#allocation5 + $0x1d4] sm:$0xf0]  ;;  %v5306_v1 = vld [vmem:[#allocation5 + $0x288] sm:$0xf]  ;;  %v5356_v36 = vld [vmem:[#allocation5 + $0x2f8] sm:$0xf0] }
 0x1cf   :  { %v1745_v2 = vadd.f32 %v1735_v47, %v1728_v54  ;;  %2729 = vmatpush.bf16.msrb.mxu3 %v5303_v43  ;;  %2759 = vmatpush.bf16.msra.mxu2 %v5495_v50  ;;  %v1747_v0 = vadd.f32 %v1737_v13, %v1730_v8  ;;  %v5226_v47 = vld [vmem:[#allocation5 + $0x1e8] sm:$0xf]  ;;  %v6449_v43 = vld [vmem:[#allocation5 + $0x2b4] sm:$0xf0]  ;;  %v5435_v50 = vor.u32 %v6477_v42, %v5434_v41 }
 0x1d0   :  { %v1746_v18 = vadd.f32 %v1736_v4, %v1729_v12  ;;  %v6381_v54 = vld [vmem:[#allocation5 + $0x94] sm:$0xf0]  ;;  %v5227_v62 = vor.u32 %v6425_v49, %v5226_v47  ;;  %v5323_v61 = vor.u32 %v6449_v43, %v5322_v37  ;;  %v5210_v13 = vld [vmem:[#allocation5 + $0x1c8] sm:$0xf]  ;;  %v5419_v4 = vor.u32 %v6473_v60, %v5418_v59 }
 0x1d1   :  { %v1750_v11 = vmax.f32 %v1745_v2, 0.0  ;;  %v1752_v22 = vmax.f32 %v1747_v0, 0.0  ;;  %v5051_v63 = vor.u32 %v6381_v54, %v5050_v51  ;;  %v6445_v2 = vld [vmem:[#allocation5 + $0x294] sm:$0xf0]  ;;  %v5034_v5 = vld [vmem:[#allocation5 + $0x68] sm:$0xf]  ;;  %v5359_v44 = vor.u32 %v6455_v28, %v5356_v36 }
 0x1d2   :  { %2708 = vmatmul.bf16.vlgmr.msrb.gmra.mxu2 %v7093_v26  ;;  %v1751_v24 = vmax.f32 %v1746_v18, 0.0  ;;  %v6469_v8 = vld [vmem:[#allocation5 + $0x354] sm:$0xf0]  ;;  %v5035_v12 = vor.u32 %v6377_v6, %v5034_v5  ;;  %v5258_v41 = vld [vmem:[#allocation5 + $0x228] sm:$0xf] }
 0x1d3   :  { %v7114_v3 = vpack.c.bf16 %v1750_v11, %v1750_v11  ;;  %2730 = vmatpush.bf16.msrb.mxu3 %v5287_v10  ;;  %2804 = vmatpush.bf16.msrb.mxu2 %v5483_v27  ;;  %v7117_v29 = vpack.c.bf16 %v1752_v22, %v1752_v22  ;;  %v5211_v10 = vor.u32 %v6421_v58, %v5210_v13  ;;  %v5194_v11 = vld [vmem:[#allocation5 + $0x1a8] sm:$0xf]  ;;  %v6441_v0 = vld [vmem:[#allocation5 + $0x274] sm:$0xf0]  ;;  %v6451_v51 = vld [vmem:[#allocation5 + $0x2cc] sm:$0xf] }
 0x1d4   :  { %v7119_v34 = vpack.c.bf16 %v1751_v24, %v1751_v24  ;;  %v5307_v27 = vor.u32 %v6445_v2, %v5306_v1  ;;  %v6373_v20 = vld [vmem:[#allocation5 + $0x54] sm:$0xf0]  ;;  %v5195_v57 = vor.u32 %v6417_v14, %v5194_v11  ;;  %v5291_v19 = vor.u32 %v6441_v0, %v5290_v16  ;;  %v5274_v24 = vld [vmem:[#allocation5 + $0x248] sm:$0xf]  ;;  %v5340_v54 = vld [vmem:[#allocation5 + $0x2d8] sm:$0xf0] }
 0x1d5   :  { %2669 = vmatmul.bf16.vlgmr.msra.gmra.mxu1 %v7114_v3  ;;  %5552 = vmatmul.msk.bf16.vlgmr.msra.gmra.mxu3 %vm1682_vm3, %v7117_v29  ;;  %v6465_v18 = vld [vmem:[#allocation5 + $0x334] sm:$0xf0]  ;;  %v5019_v22 = vor.u32 %v6373_v20, %v5018_v17  ;;  %v5546_v47 = vld [vmem:[#allocation5 + $0x468] sm:$0xf]  ;;  %v6423_v13 = vld [vmem:[#allocation5 + $0x1ec] sm:$0xf]  ;;  %v5343_v58 = vor.u32 %v6451_v51, %v5340_v54 }
 0x1d6   :  { %2765 = vmatpush.bf16.msra.mxu1 %v5099_v15  ;;  %2682 = vmatmul.bf16.vlgmr.msrb.gmra.mxu0 %v7119_v34  ;;  %v5403_v15 = vor.u32 %v6469_v8, %v5402_v7  ;;  %v5387_v56 = vor.u32 %v6465_v18, %v5386_v9  ;;  %v6433_v42 = vld [vmem:[#allocation5 + $0x234] sm:$0xf0]  ;;  %v5242_v60 = vld [vmem:[#allocation5 + $0x208] sm:$0xf]  ;;  %v6447_v6 = vld [vmem:[#allocation5 + $0x2ac] sm:$0xf] }
 0x1d7   :  { %2805 = vmatpush.bf16.msrb.mxu2 %v5467_v23  ;;  %2731 = vmatpush.bf16.msrb.mxu3 %v5271_v25  ;;  %v6413_v23 = vld [vmem:[#allocation5 + $0x194] sm:$0xf0]  ;;  %v5259_v43 = vor.u32 %v6433_v42, %v5258_v41  ;;  %v5530_v1 = vld [vmem:[#allocation5 + $0x448] sm:$0xf]  ;;  %v5324_v7 = vld [vmem:[#allocation5 + $0x2b8] sm:$0xf0] }
 0x1d8   :  { %2791 = vmatpush.bf16.msrb.mxu0 %v5355_v30  ;;  %v6437_v25 = vld [vmem:[#allocation5 + $0x254] sm:$0xf0]  ;;  %v5179_v32 = vor.u32 %v6413_v23, %v5178_v21  ;;  %v5212_v14 = vld [vmem:[#allocation5 + $0x1d8] sm:$0xf0]  ;;  %v5327_v16 = vor.u32 %v6447_v6, %v5324_v7  ;;  %v5514_v0 = vld [vmem:[#allocation5 + $0x428] sm:$0xf] }
 0x1d9   :  { %v6369_v30 = vld [vmem:[#allocation5 + $0x34] sm:$0xf0]  ;;  %v5275_v33 = vor.u32 %v6437_v25, %v5274_v24  ;;  %v6443_v20 = vld [vmem:[#allocation5 + $0x28c] sm:$0xf]  ;;  %v5308_v9 = vld [vmem:[#allocation5 + $0x298] sm:$0xf0] }
 0x1da   :  { %2766 = vmatpush.bf16.msra.mxu1 %v5083_v52  ;;  %v5370_v52 = vld [vmem:[#allocation5 + $0x308] sm:$0xf]  ;;  %v6365_v46 = vld [vmem:[#allocation5 + $0x14] sm:$0xf0]  ;;  %v6391_v21 = vld [vmem:[#allocation5 + $0xec] sm:$0xf] }
 0x1db   :  { %2806 = vmatpush.bf16.msrb.mxu2 %v5451_v40  ;;  %2732 = vmatpush.bf16.msrb.mxu3 %v5255_v38  ;;  %v5003_v40 = vor.u32 %v6369_v30, %v5002_v53  ;;  %v6409_v38 = vld [vmem:[#allocation5 + $0x174] sm:$0xf0]  ;;  %v5100_v23 = vld [vmem:[#allocation5 + $0xf8] sm:$0xf0]  ;;  %v6415_v24 = vld [vmem:[#allocation5 + $0x1ac] sm:$0xf] }
 0x1dc   :  { %2792 = vmatpush.bf16.msrb.mxu0 %v5339_v39  ;;  %v5371_v39 = vor.u32 %v6461_v31, %v5370_v52  ;;  %v6505_v49 = vld [vmem:[#allocation5 + $0x474] sm:$0xf0]  ;;  %v5163_v37 = vor.u32 %v6409_v38, %v5162_v35  ;;  %v5196_v25 = vld [vmem:[#allocation5 + $0x1b8] sm:$0xf0]  ;;  %v5498_v53 = vld [vmem:[#allocation5 + $0x408] sm:$0xf] }
 0x1dd   :  { %v6405_v59 = vld [vmem:[#allocation5 + $0x154] sm:$0xf0]  ;;  %v6487_v31 = vld [vmem:[#allocation5 + $0x3ec] sm:$0xf]  ;;  %v5199_v35 = vor.u32 %v6415_v24, %v5196_v25  ;;  %v5292_v36 = vld [vmem:[#allocation5 + $0x278] sm:$0xf0] }
 0x1de   :  { %2767 = vmatpush.bf16.msra.mxu1 %v5067_v45  ;;  %v4986_v45 = vld [vmem:[#allocation5 + $0x8] sm:$0xf]  ;;  %v6501_v2 = vld [vmem:[#allocation5 + $0x454] sm:$0xf0]  ;;  %v6439_v28 = vld [vmem:[#allocation5 + $0x26c] sm:$0xf] }
 0x1df   :  { %2807 = vmatpush.bf16.msrb.mxu2 %v5435_v50  ;;  %2733 = vmatpush.bf16.msrb.mxu3 %v5239_v55  ;;  %v5146_v50 = vld [vmem:[#allocation5 + $0x148] sm:$0xf]  ;;  %v4987_v55 = vor.u32 %v6365_v46, %v4986_v45  ;;  %v5531_v11 = vor.u32 %v6501_v2, %v5530_v1  ;;  %v6493_v30 = vld [vmem:[#allocation5 + $0x414] sm:$0xf0]  ;;  %v5084_v41 = vld [vmem:[#allocation5 + $0xd8] sm:$0xf0]  ;;  %v5295_v46 = vor.u32 %v6439_v28, %v5292_v36 }
 0x1e0   :  { %2793 = vmatpush.bf16.msrb.mxu0 %v5323_v61  ;;  %v5547_v61 = vor.u32 %v6505_v49, %v5546_v47  ;;  %v5499_v38 = vor.u32 %v6493_v30, %v5498_v53  ;;  %v6411_v42 = vld [vmem:[#allocation5 + $0x18c] sm:$0xf]  ;;  %v5468_v47 = vld [vmem:[#allocation5 + $0x3d8] sm:$0xf0] }
 0x1e1   :  { %v6383_v51 = vld [vmem:[#allocation5 + $0xac] sm:$0xf]  ;;  %v5068_v54 = vld [vmem:[#allocation5 + $0xb8] sm:$0xf0] }
 0x1e2   :  { %2768 = vmatpush.bf16.msra.mxu1 %v5051_v63  ;;  %5553 = vmatmul.msk.bf16.vlgmr.msra.gmra.mxu2 %vm1682_vm3, %v7117_v29  ;;  %v5228_v63 = vld [vmem:[#allocation5 + $0x1f8] sm:$0xf0]  ;;  %v6403_v7 = vld [vmem:[#allocation5 + $0x14c] sm:$0xf] }
 0x1e3   :  { %2778 = vmatpush.bf16.msra.mxu3 %v5227_v62  ;;  %2808 = vmatpush.bf16.msrb.mxu2 %v5419_v4  ;;  %v6429_v62 = vld [vmem:[#allocation5 + $0x214] sm:$0xf0]  ;;  %v5147_v4 = vor.u32 %v6405_v59, %v5146_v50  ;;  %v5231_v8 = vor.u32 %v6423_v13, %v5228_v63  ;;  %v5276_v50 = vld [vmem:[#allocation5 + $0x258] sm:$0xf0]  ;;  %v6407_v59 = vld [vmem:[#allocation5 + $0x16c] sm:$0xf]  ;;  %v5071_v63 = vor.u32 %v6383_v51, %v5068_v54 }
 0x1e4   :  { %2794 = vmatpush.bf16.msrb.mxu0 %v5307_v27  ;;  %v5243_v5 = vor.u32 %v6429_v62, %v5242_v60  ;;  %v6401_v27 = vld [vmem:[#allocation5 + $0x134] sm:$0xf0]  ;;  %v5164_v60 = vld [vmem:[#allocation5 + $0x178] sm:$0xf0]  ;;  %v6371_v24 = vld [vmem:[#allocation5 + $0x4c] sm:$0xf] }
 0x1e5   :  { %2721 = vmatmul.bf16.vlgmr.msrb.gmra.mxu1 %v7095_v48  ;;  %2734 = vmatmul.bf16.vlgmr.msrb.gmra.mxu3 %v7114_v3  ;;  %v5452_v13 = vld [vmem:[#allocation5 + $0x3b8] sm:$0xf0]  ;;  %v5167_v2 = vor.u32 %v6407_v59, %v5164_v60  ;;  %v6395_v53 = vld [vmem:[#allocation5 + $0x10c] sm:$0xf]  ;;  %v6517_v59 = vld [vmem:[#allocation7 + $0x54] sm:$0xf0] }
 0x1e6   :  { %2769 = vmatpush.bf16.msra.mxu1 %v5035_v12  ;;  %2747 = vmatmul.bf16.vlgmr.msra.gmra.mxu0 %v7119_v34  ;;  %v6419_v12 = vld [vmem:[#allocation5 + $0x1cc] sm:$0xf]  ;;  %v5260_v1 = vld [vmem:[#allocation5 + $0x238] sm:$0xf0] }
 0x1e7   :  { %2779 = vmatpush.bf16.msra.mxu3 %v5211_v10  ;;  %2809 = vmatpush.bf16.msrb.mxu2 %v5403_v15  ;;  %v5130_v10 = vld [vmem:[#allocation5 + $0x128] sm:$0xf]  ;;  %v6497_v15 = vld [vmem:[#allocation5 + $0x434] sm:$0xf0]  ;;  %v5215_v18 = vor.u32 %v6419_v12, %v5212_v14  ;;  %v6427_v14 = vld [vmem:[#allocation5 + $0x20c] sm:$0xf] }
 0x1e8   :  { %2795 = vmatpush.bf16.msrb.mxu0 %v5291_v19  ;;  %v5131_v17 = vor.u32 %v6401_v27, %v5130_v10  ;;  %v6397_v19 = vld [vmem:[#allocation5 + $0x114] sm:$0xf0]  ;;  %v6475_v27 = vld [vmem:[#allocation5 + $0x38c] sm:$0xf]  ;;  %v5020_v25 = vld [vmem:[#allocation5 + $0x58] sm:$0xf0] }
 0x1e9   :  { %v5116_v30 = vld [vmem:[#allocation5 + $0x118] sm:$0xf0]  ;;  %v6367_v36 = vld [vmem:[#allocation5 + $0x2c] sm:$0xf] }
 0x1ea   :  { %2770 = vmatpush.bf16.msra.mxu1 %v5019_v22  ;;  %v5515_v22 = vor.u32 %v6497_v15, %v5514_v0  ;;  %v6375_v15 = vld [vmem:[#allocation5 + $0x6c] sm:$0xf]  ;;  %v5119_v28 = vor.u32 %v6395_v53, %v5116_v30  ;;  %v5548_v51 = vld [vmem:[#allocation5 + $0x478] sm:$0xf0]  ;;  %v6520_v30 = vld [vmem:[#allocation7 + $0x74] sm:$0xf] }
 0x1eb   :  { %2780 = vmatpush.bf16.msra.mxu3 %v5195_v57  ;;  %2810 = vmatpush.bf16.msrb.mxu2 %v5387_v56  ;;  %v5114_v57 = vld [vmem:[#allocation5 + $0x108] sm:$0xf]  ;;  %v5311_v56 = vor.u32 %v6443_v20, %v5308_v9  ;;  %v6399_v9 = vld [vmem:[#allocation5 + $0x12c] sm:$0xf] }
 0x1ec   :  { %2796 = vmatpush.bf16.msrb.mxu0 %v5275_v33  ;;  %v5115_v52 = vor.u32 %v6397_v19, %v5114_v57  ;;  %v5103_v33 = vor.u32 %v6391_v21, %v5100_v23  ;;  %v6471_v19 = vld [vmem:[#allocation5 + $0x36c] sm:$0xf]  ;;  %v5420_v21 = vld [vmem:[#allocation5 + $0x378] sm:$0xf0] }
 0x1ee   :  { %2771 = vmatpush.bf16.msra.mxu1 %v5003_v40  ;;  %v6387_v40 = vld [vmem:[#allocation5 + $0xcc] sm:$0xf] }
 0x1ef   :  { %2781 = vmatpush.bf16.msra.mxu3 %v5179_v32  ;;  %2811 = vmatpush.bf16.msrb.mxu2 %v5371_v39  ;;  %v5484_v32 = vld [vmem:[#allocation5 + $0x3f8] sm:$0xf0]  ;;  %v5087_v49 = vor.u32 %v6387_v40, %v5084_v41  ;;  %v6463_v41 = vld [vmem:[#allocation5 + $0x32c] sm:$0xf] }
 0x1f0   :  { %2797 = vmatpush.bf16.msrb.mxu0 %v5259_v43  ;;  %v5180_v39 = vld [vmem:[#allocation5 + $0x198] sm:$0xf0]  ;;  %v5487_v45 = vor.u32 %v6487_v31, %v5484_v32  ;;  %v6435_v43 = vld [vmem:[#allocation5 + $0x24c] sm:$0xf]  ;;  %v5614_v32 = vld [vmem:[#allocation7 + $0x70] sm:$0xf] }
 0x1f1   :  { %v5279_v62 = vor.u32 %v6435_v43, %v5276_v50  ;;  %v5404_v31 = vld [vmem:[#allocation5 + $0x358] sm:$0xf0]  ;;  %v6459_v43 = vld [vmem:[#allocation5 + $0x30c] sm:$0xf] }
 0x1f2   :  { %2772 = vmatpush.bf16.msra.mxu1 %v4987_v55  ;;  %2812 = vmatmul.bf16.vlgmr.msrb.gmra.mxu2 %v7119_v34  ;;  %v5004_v40 = vld [vmem:[#allocation5 + $0x38] sm:$0xf0]  ;;  %v6503_v50 = vld [vmem:[#allocation5 + $0x46c] sm:$0xf] }
 0x1f3   :  { %2856 = vmatpush.bf16.msra.mxu2 %v5359_v44  ;;  %2782 = vmatpush.bf16.msra.mxu3 %v5163_v37  ;;  %v6483_v44 = vld [vmem:[#allocation5 + $0x3cc] sm:$0xf]  ;;  %v5183_v37 = vor.u32 %v6411_v42, %v5180_v39  ;;  %v5388_v39 = vld [vmem:[#allocation5 + $0x338] sm:$0xf0] }
 0x1f4   :  { %2798 = vmatpush.bf16.msrb.mxu0 %v5243_v5  ;;  %v5471_v55 = vor.u32 %v6483_v44, %v5468_v47  ;;  %v5052_v5 = vld [vmem:[#allocation5 + $0x98] sm:$0xf0]  ;;  %v5007_v44 = vor.u32 %v6367_v36, %v5004_v40  ;;  %v6363_v47 = vld [vmem:[#allocation5 + $0xc] sm:$0xf]  ;;  %v5646_v40 = vld [vmem:[#allocation7 + $0xb0] sm:$0xf] }
 0x1f5   :  { %2773 = vmatmul.bf16.vlgmr.msra.gmra.mxu1 %v7093_v26  ;;  %v5608_v36 = vld [vmem:[#allocation7 + $0x68] sm:$0xf0] }
 0x1f6   :  { %2821 = vmatpush.bf16.msrb.mxu1 %v5547_v61  ;;  %v6479_v61 = vld [vmem:[#allocation5 + $0x3ac] sm:$0xf] }
 0x1f7   :  { %2857 = vmatpush.bf16.msra.mxu2 %v5343_v58  ;;  %2783 = vmatpush.bf16.msra.mxu3 %v5147_v4  ;;  %v6431_v58 = vld [vmem:[#allocation5 + $0x22c] sm:$0xf]  ;;  %v5455_v6 = vor.u32 %v6479_v61, %v5452_v13 }
 0x1f8   :  { %2843 = vmatpush.bf16.msra.mxu0 %v5231_v8  ;;  %v6379_v4 = vld [vmem:[#allocation5 + $0x8c] sm:$0xf]  ;;  %v5148_v8 = vld [vmem:[#allocation5 + $0x158] sm:$0xf0]  ;;  %v5263_v10 = vor.u32 %v6431_v58, %v5260_v1  ;;  %v5590_v1 = vld [vmem:[#allocation7 + $0x40] sm:$0xf] }
 0x1f9   :  { %2799 = vmatmul.bf16.vlgmr.msrb.gmra.mxu0 %v7114_v3  ;;  %v5055_v12 = vor.u32 %v6379_v4, %v5052_v5  ;;  %v5151_v0 = vor.u32 %v6403_v7, %v5148_v8  ;;  %v6499_v13 = vld [vmem:[#allocation5 + $0x44c] sm:$0xf]  ;;  %v6513_v8 = vld [vmem:[#allocation7 + $0x34] sm:$0xf0] }
 0x1fa   :  { %2822 = vmatpush.bf16.msrb.mxu1 %v5531_v11  ;;  %v5436_v11 = vld [vmem:[#allocation5 + $0x398] sm:$0xf0]  ;;  %v6495_v5 = vld [vmem:[#allocation5 + $0x42c] sm:$0xf] }
 0x1fb   :  { %2858 = vmatpush.bf16.msra.mxu2 %v5327_v16  ;;  %2784 = vmatpush.bf16.msra.mxu3 %v5131_v17  ;;  %v5244_v16 = vld [vmem:[#allocation5 + $0x218] sm:$0xf0]  ;;  %v5439_v20 = vor.u32 %v6475_v27, %v5436_v11  ;;  %v6491_v27 = vld [vmem:[#allocation5 + $0x40c] sm:$0xf] }
 0x1fc   :  { %2844 = vmatpush.bf16.msra.mxu0 %v5215_v18  ;;  %v5036_v17 = vld [vmem:[#allocation5 + $0x78] sm:$0xf0]  ;;  %v5247_v57 = vor.u32 %v6427_v14, %v5244_v16  ;;  %v5574_v16 = vld [vmem:[#allocation7 + $0x20] sm:$0xf] }
 0x1fd   :  { %v5132_v18 = vld [vmem:[#allocation5 + $0x138] sm:$0xf0] }
 0x1fe   :  { %2823 = vmatpush.bf16.msrb.mxu1 %v5515_v22  ;;  %v5039_v22 = vor.u32 %v6375_v15, %v5036_v17  ;;  %v5135_v23 = vor.u32 %v6399_v9, %v5132_v18  ;;  %v5500_v11 = vld [vmem:[#allocation5 + $0x418] sm:$0xf0]  ;;  %v5678_v15 = vld [vmem:[#allocation7 + $0xf0] sm:$0xf]  ;;  %v6509_v9 = vld [vmem:[#allocation7 + $0x14] sm:$0xf0] }
 0x1ff   :  { %2859 = vmatpush.bf16.msra.mxu2 %v5311_v56  ;;  %2785 = vmatpush.bf16.msra.mxu3 %v5115_v52  ;;  %v5423_v56 = vor.u32 %v6471_v19, %v5420_v21  ;;  %v6467_v52 = vld [vmem:[#allocation5 + $0x34c] sm:$0xf]  ;;  %v5503_v14 = vor.u32 %v6491_v27, %v5500_v11 }
 0x200   :  { %2845 = vmatpush.bf16.msra.mxu0 %v5199_v35  ;;  %v5023_v35 = vor.u32 %v6371_v24, %v5020_v25  ;;  %v5662_v24 = vld [vmem:[#allocation7 + $0xd0] sm:$0xf]  ;;  %v6533_v25 = vld [vmem:[#allocation7 + $0xd4] sm:$0xf0] }
 0x201   :  { %v5663_v53 = vor.u32 %v6533_v25, %v5662_v24  ;;  %v5664_v25 = vld [vmem:[#allocation7 + $0xd8] sm:$0xf0] }
 0x202   :  { %2824 = vmatpush.bf16.msrb.mxu1 %v5499_v38  ;;  %2786 = vmatmul.bf16.vlgmr.msra.gmra.mxu3 %v7095_v48  ;;  %v5407_v38 = vor.u32 %v6467_v52, %v5404_v31  ;;  %v5616_v52 = vld [vmem:[#allocation7 + $0x78] sm:$0xf0] }
 0x203   :  { %2830 = vmatpush.bf16.msrb.mxu3 %v5103_v33  ;;  %2860 = vmatpush.bf16.msra.mxu2 %v5295_v46  ;;  %v6521_v33 = vld [vmem:[#allocation7 + $0x74] sm:$0xf0]  ;;  %v6519_v46 = vld [vmem:[#allocation7 + $0x64] sm:$0xf0]  ;;  %v5619_v31 = vor.u32 %v6520_v30, %v5616_v52 }
 0x204   :  { %2846 = vmatpush.bf16.msra.mxu0 %v5183_v37  ;;  %v5615_v42 = vor.u32 %v6521_v33, %v5614_v32  ;;  %v5391_v37 = vor.u32 %v6463_v41, %v5388_v39  ;;  %v5654_v32 = vld [vmem:[#allocation7 + $0xc0] sm:$0xf]  ;;  %v6531_v33 = vld [vmem:[#allocation7 + $0xc4] sm:$0xf0]  ;;  %v5600_v39 = vld [vmem:[#allocation7 + $0x58] sm:$0xf0] }
 0x205   :  { %5554 = vmatmul.msk.bf16.vlgmr.msrb.gmra.mxu1 %vm1682_vm3, %v7117_v29 }
 0x206   :  { %2869 = vmatpush.bf16.msra.mxu1 %v5487_v45  ;;  %v5606_v45 = vld [vmem:[#allocation7 + $0x60] sm:$0xf] }
 0x207   :  { %2831 = vmatpush.bf16.msrb.mxu3 %v5087_v49  ;;  %2861 = vmatpush.bf16.msra.mxu2 %v5279_v62  ;;  %v4988_v49 = vld [vmem:[#allocation5 + $0x18] sm:$0xf0]  ;;  %v5607_v54 = vor.u32 %v6519_v46, %v5606_v45  ;;  %v5551_v62 = vor.u32 %v6503_v50, %v5548_v51  ;;  %v5638_v46 = vld [vmem:[#allocation7 + $0xa0] sm:$0xf]  ;;  %v5630_v50 = vld [vmem:[#allocation7 + $0x90] sm:$0xf] }
 0x208   :  { %2847 = vmatpush.bf16.msra.mxu0 %v5167_v2  ;;  %v4991_v60 = vor.u32 %v6363_v47, %v4988_v49  ;;  %v6515_v2 = vld [vmem:[#allocation7 + $0x44] sm:$0xf0]  ;;  %v6514_v49 = vld [vmem:[#allocation7 + $0x44] sm:$0xf]  ;;  %v6525_v51 = vld [vmem:[#allocation7 + $0x94] sm:$0xf0] }
 0x209   :  { %v5591_v7 = vor.u32 %v6515_v2, %v5590_v1 }
 0x20a   :  { %2870 = vmatpush.bf16.msra.mxu1 %v5471_v55  ;;  %v5598_v55 = vld [vmem:[#allocation7 + $0x50] sm:$0xf] }
 0x20b   :  { %2832 = vmatpush.bf16.msrb.mxu3 %v5071_v63  ;;  %2862 = vmatpush.bf16.msra.mxu2 %v5263_v10  ;;  %v5532_v63 = vld [vmem:[#allocation5 + $0x458] sm:$0xf0]  ;;  %v5599_v58 = vor.u32 %v6517_v59, %v5598_v55 }
 0x20c   :  { %2848 = vmatpush.bf16.msra.mxu0 %v5151_v0  ;;  %v5535_v4 = vor.u32 %v6499_v13, %v5532_v63  ;;  %v6511_v0 = vld [vmem:[#allocation7 + $0x24] sm:$0xf0]  ;;  %v5584_v55 = vld [vmem:[#allocation7 + $0x38] sm:$0xf0]  ;;  %v5622_v13 = vld [vmem:[#allocation7 + $0x80] sm:$0xf] }
 0x20d   :  { %v5575_v17 = vor.u32 %v6511_v0, %v5574_v16  ;;  %v6523_v63 = vld [vmem:[#allocation7 + $0x84] sm:$0xf0]  ;;  %v5568_v16 = vld [vmem:[#allocation7 + $0x18] sm:$0xf0]  ;;  %v6534_v0 = vld [vmem:[#allocation7 + $0xe4] sm:$0xf] }
 0x20e   :  { %2871 = vmatpush.bf16.msra.mxu1 %v5455_v6  ;;  %v5516_v6 = vld [vmem:[#allocation5 + $0x438] sm:$0xf0]  ;;  %v5623_v2 = vor.u32 %v6523_v63, %v5622_v13 }
 0x20f   :  { %2833 = vmatpush.bf16.msrb.mxu3 %v5055_v12  ;;  %2863 = vmatpush.bf16.msra.mxu2 %v5247_v57  ;;  %v5519_v10 = vor.u32 %v6495_v5, %v5516_v6  ;;  %v5670_v57 = vld [vmem:[#allocation7 + $0xe0] sm:$0xf]  ;;  %v5576_v5 = vld [vmem:[#allocation7 + $0x28] sm:$0xf0]  ;;  %v6536_v6 = vld [vmem:[#allocation7 + $0xf4] sm:$0xf] }
 0x210   :  { %2849 = vmatpush.bf16.msra.mxu0 %v5135_v23  ;;  %v6507_v23 = vld [vmem:[#allocation7 + $0x4] sm:$0xf0] }
 0x212   :  { %2872 = vmatpush.bf16.msra.mxu1 %v5439_v20  ;;  %2864 = vmatmul.bf16.vlgmr.msra.gmra.mxu2 %v7114_v3  ;;  %v5372_v3 = vld [vmem:[#allocation5 + $0x318] sm:$0xf0]  ;;  %v6537_v20 = vld [vmem:[#allocation7 + $0xf4] sm:$0xf0] }
 0x213   :  { %2834 = vmatpush.bf16.msrb.mxu3 %v5039_v22  ;;  %v5375_v61 = vor.u32 %v6459_v43, %v5372_v3  ;;  %v5679_v18 = vor.u32 %v6537_v20, %v5678_v15  ;;  %v5558_v22 = vld [vmem:[#allocation7] sm:$0xf]  ;;  %v6512_v3 = vld [vmem:[#allocation7 + $0x34] sm:$0xf]  ;;  %v5726_v20 = vld [vmem:[#allocation7 + $0x150] sm:$0xf] }
 0x214   :  { %2850 = vmatpush.bf16.msra.mxu0 %v5119_v28  ;;  %v6518_v28 = vld [vmem:[#allocation7 + $0x64] sm:$0xf]  ;;  %v5587_v59 = vor.u32 %v6512_v3, %v5584_v55 }
 0x215   :  { %3306 = vmatpush.bf16.msrb.mxu2 %v5679_v18 }
 0x216   :  { %2873 = vmatpush.bf16.msra.mxu1 %v5423_v56  ;;  %v5559_v56 = vor.u32 %v6507_v23, %v5558_v22  ;;  %v5560_v22 = vld [vmem:[#allocation7 + $0x8] sm:$0xf0]  ;;  %v6532_v23 = vld [vmem:[#allocation7 + $0xd4] sm:$0xf] }
 0x217   :  { %2835 = vmatpush.bf16.msrb.mxu3 %v5023_v35  ;;  %2851 = vmatmul.bf16.vlgmr.msra.gmra.mxu0 %v7095_v48  ;;  %v5582_v48 = vld [vmem:[#allocation7 + $0x30] sm:$0xf]  ;;  %v5655_v35 = vor.u32 %v6531_v33, %v5654_v32  ;;  %v5667_v52 = vor.u32 %v6532_v23, %v5664_v25  ;;  %v6530_v33 = vld [vmem:[#allocation7 + $0xc4] sm:$0xf] }
 0x218   :  { %3293 = vmatpush.bf16.msrb.mxu0 %v5615_v42  ;;  %v5583_v12 = vor.u32 %v6513_v8, %v5582_v48  ;;  %v6516_v42 = vld [vmem:[#allocation7 + $0x54] sm:$0xf]  ;;  %v5680_v48 = vld [vmem:[#allocation7 + $0xf8] sm:$0xf0]  ;;  %v5734_v8 = vld [vmem:[#allocation7 + $0x160] sm:$0xf] }
 0x219   :  { %v5603_v45 = vor.u32 %v6516_v42, %v5600_v39  ;;  %v5683_v27 = vor.u32 %v6536_v6, %v5680_v48  ;;  %v6539_v6 = vld [vmem:[#allocation7 + $0x104] sm:$0xf0]  ;;  %v5806_v25 = vld [vmem:[#allocation7 + $0x1f0] sm:$0xf] }
 0x21a   :  { %2874 = vmatpush.bf16.msra.mxu1 %v5407_v38  ;;  %v6529_v38 = vld [vmem:[#allocation7 + $0xb4] sm:$0xf0] }
 0x21b   :  { %2836 = vmatpush.bf16.msrb.mxu3 %v5007_v44  ;;  %v5647_v41 = vor.u32 %v6529_v38, %v5646_v40  ;;  %v6527_v44 = vld [vmem:[#allocation7 + $0xa4] sm:$0xf0] }
 0x21c   :  { %3294 = vmatpush.bf16.msrb.mxu0 %v5607_v54  ;;  %v5639_v47 = vor.u32 %v6527_v44, %v5638_v46  ;;  %v5631_v54 = vor.u32 %v6525_v51, %v5630_v50  ;;  %v5648_v46 = vld [vmem:[#allocation7 + $0xb8] sm:$0xf0]  ;;  %v5702_v44 = vld [vmem:[#allocation7 + $0x120] sm:$0xf]  ;;  %v6526_v51 = vld [vmem:[#allocation7 + $0xa4] sm:$0xf] }
 0x21e   :  { %2875 = vmatpush.bf16.msra.mxu1 %v5391_v37  ;;  %v5592_v37 = vld [vmem:[#allocation7 + $0x48] sm:$0xf0] }
 0x21f   :  { %2837 = vmatpush.bf16.msrb.mxu3 %v4991_v60  ;;  %v5595_v43 = vor.u32 %v6514_v49, %v5592_v37  ;;  %v5742_v60 = vld [vmem:[#allocation7 + $0x170] sm:$0xf]  ;;  %v6543_v49 = vld [vmem:[#allocation7 + $0x124] sm:$0xf0] }
 0x220   :  { %3295 = vmatpush.bf16.msrb.mxu0 %v5599_v58  ;;  %v5703_v37 = vor.u32 %v6543_v49, %v5702_v44  ;;  %v5790_v44 = vld [vmem:[#allocation7 + $0x1d0] sm:$0xf] }
 0x222   :  { %2876 = vmatpush.bf16.msra.mxu1 %v5375_v61  ;;  %2838 = vmatmul.bf16.vlgmr.msrb.gmra.mxu3 %v7093_v26  ;;  %v5566_v26 = vld [vmem:[#allocation7 + $0x10] sm:$0xf] }
 0x223   :  { %2886 = vmatpush.bf16.msra.mxu3 %v5551_v62  ;;  %v5567_v19 = vor.u32 %v6509_v9, %v5566_v26  ;;  %v6553_v62 = vld [vmem:[#allocation7 + $0x174] sm:$0xf0] }
 0x224   :  { %3296 = vmatpush.bf16.msrb.mxu0 %v5591_v7  ;;  %v5743_v61 = vor.u32 %v6553_v62, %v5742_v60  ;;  %v6549_v26 = vld [vmem:[#allocation7 + $0x154] sm:$0xf0] }
 0x225   :  { %2877 = vmatmul.bf16.vlgmr.msra.gmra.mxu1 %v7119_v34  ;;  %v6535_v34 = vld [vmem:[#allocation7 + $0xe4] sm:$0xf0]  ;;  %v6541_v60 = vld [vmem:[#allocation7 + $0x114] sm:$0xf0] }
 0x226   :  { %v5671_v21 = vor.u32 %v6535_v34, %v5670_v57  ;;  %3319 = vmatpush.bf16.msrb.mxu1 %v5743_v61  ;;  %v5727_v57 = vor.u32 %v6549_v26, %v5726_v20  ;;  %v6550_v20 = vld [vmem:[#allocation7 + $0x164] sm:$0xf]  ;;  %v5736_v26 = vld [vmem:[#allocation7 + $0x168] sm:$0xf0] }
 0x227   :  { %2887 = vmatpush.bf16.msra.mxu3 %v5535_v4  ;;  %v6510_v4 = vld [vmem:[#allocation7 + $0x24] sm:$0xf] }
 0x228   :  { %3297 = vmatpush.bf16.msrb.mxu0 %v5583_v12  ;;  %3307 = vmatpush.bf16.msrb.mxu2 %v5671_v21  ;;  %v5579_v7 = vor.u32 %v6510_v4, %v5576_v5  ;;  %v7144_v12 = vld [vmem:[%s7289_s5] sm:$0xf]  ;;  %v6506_v21 = vld [vmem:[#allocation7 + $0x4] sm:$0xf]  ;;  %v5686_v5 = vld [vmem:[#allocation7 + $0x100] sm:$0xf] }
 0x229   :  { %v1904_v9 = vperm.slane %v7144_v12, 0  ;;  %v5563_v24 = vor.u32 %v6506_v21, %v5560_v22  ;;  %v5728_v21 = vld [vmem:[#allocation7 + $0x158] sm:$0xf0] }
 0x22b   :  { %2888 = vmatpush.bf16.msra.mxu3 %v5519_v10  ;;  %v6551_v10 = vld [vmem:[#allocation7 + $0x164] sm:$0xf0] }
 0x22c   :  { %3298 = vmatpush.bf16.msrb.mxu0 %v5575_v17  ;;  %3308 = vmatpush.bf16.msrb.mxu2 %v5663_v53  ;;  %v5735_v11 = vor.u32 %v6551_v10, %v5734_v8  ;;  %v5672_v17 = vld [vmem:[#allocation7 + $0xe8] sm:$0xf0]  ;;  %v6547_v53 = vld [vmem:[#allocation7 + $0x144] sm:$0xf0]  ;;  %v5687_v8 = vor.u32 %v6539_v6, %v5686_v5  ;;  %v5744_v10 = vld [vmem:[#allocation7 + $0x178] sm:$0xf0] }
 0x22d   :  { %v5675_v18 = vor.u32 %v6534_v0, %v5672_v17  ;;  %v1905_v17 = vperm.slane %v7144_v12, 1  ;;  %v6538_v6 = vld [vmem:[#allocation7 + $0x104] sm:$0xf] }
 0x22e   :  { %3320 = vmatpush.bf16.msrb.mxu1 %v5735_v11 }
 0x22f   :  { %2889 = vmatpush.bf16.msra.mxu3 %v5503_v14  ;;  %v6508_v14 = vld [vmem:[#allocation7 + $0x14] sm:$0xf] }
 0x230   :  { %3299 = vmatpush.bf16.msrb.mxu0 %v5567_v19  ;;  %3309 = vmatpush.bf16.msrb.mxu2 %v5655_v35  ;;  %v5571_v15 = vor.u32 %v6508_v14, %v5568_v16  ;;  %v5656_v35 = vld [vmem:[#allocation7 + $0xc8] sm:$0xf0]  ;;  %v6522_v14 = vld [vmem:[#allocation7 + $0x84] sm:$0xf] }
 0x231   :  { %v5624_v16 = vld [vmem:[#allocation7 + $0x88] sm:$0xf0] }
 0x232   :  { %5555 = vmatmul.msk.bf16.vlgmr.msra.gmra.mxu3 %vm1682_vm3, %v7117_v29  ;;  %v5611_v29 = vor.u32 %v6518_v28, %v5608_v36  ;;  %3321 = vmatpush.bf16.msrb.mxu1 %v5727_v57  ;;  %v5659_v28 = vor.u32 %v6530_v33, %v5656_v35  ;;  %v5710_v36 = vld [vmem:[#allocation7 + $0x130] sm:$0xf] }
 0x234   :  { %3300 = vmatpush.bf16.msrb.mxu0 %v5559_v56  ;;  %3310 = vmatpush.bf16.msrb.mxu2 %v5647_v41  ;;  %v5718_v56 = vld [vmem:[#allocation7 + $0x140] sm:$0xf] }
 0x238   :  { %3345 = vmatpush.bf16.msra.mxu0 %v5619_v31  ;;  %3311 = vmatpush.bf16.msrb.mxu2 %v5639_v47  ;;  %v5719_v31 = vor.u32 %v6547_v53, %v5718_v56  ;;  %v6569_v56 = vld [vmem:[#allocation7 + $0x1f4] sm:$0xf0] }
 0x23a   :  { %3322 = vmatpush.bf16.msrb.mxu1 %v5719_v31  ;;  %v6546_v31 = vld [vmem:[#allocation7 + $0x144] sm:$0xf] }
 0x23c   :  { %3346 = vmatpush.bf16.msra.mxu0 %v5611_v29  ;;  %3312 = vmatpush.bf16.msrb.mxu2 %v5631_v54  ;;  %v6545_v29 = vld [vmem:[#allocation7 + $0x134] sm:$0xf0]  ;;  %v5640_v54 = vld [vmem:[#allocation7 + $0xa8] sm:$0xf0] }
 0x23d   :  { %v5711_v38 = vor.u32 %v6545_v29, %v5710_v36  ;;  %v5643_v55 = vor.u32 %v6526_v51, %v5640_v54  ;;  %v5798_v29 = vld [vmem:[#allocation7 + $0x1e0] sm:$0xf]  ;;  %v6542_v51 = vld [vmem:[#allocation7 + $0x124] sm:$0xf]  ;;  %v5704_v54 = vld [vmem:[#allocation7 + $0x128] sm:$0xf0] }
 0x23f   :  { %3323 = vmatpush.bf16.msrb.mxu1 %v5711_v38 }
 0x240   :  { %3347 = vmatpush.bf16.msra.mxu0 %v5603_v45  ;;  %3313 = vmatpush.bf16.msrb.mxu2 %v5623_v2  ;;  %v6528_v45 = vld [vmem:[#allocation7 + $0xb4] sm:$0xf]  ;;  %v5632_v2 = vld [vmem:[#allocation7 + $0x98] sm:$0xf0] }
 0x241   :  { %v5651_v47 = vor.u32 %v6528_v45, %v5648_v46 }
 0x243   :  { %3324 = vmatpush.bf16.msrb.mxu1 %v5703_v37 }
 0x244   :  { %3348 = vmatpush.bf16.msra.mxu0 %v5595_v43  ;;  %3358 = vmatpush.bf16.msra.mxu2 %v5683_v27 }
 0x245   :  { %v2644_v58 = vpop.f32.mrf.mxu3  ;;  %v2657_v1 = vpop.f32.mrf.mxu2 }
 0x246   :  { %v2645_v30 = vadd.f32 %v2644_v58, %v1904_v9  ;;  %v5739_v9 = vor.u32 %v6550_v20, %v5736_v26 }
 0x248   :  { %3349 = vmatpush.bf16.msra.mxu0 %v5587_v59  ;;  %3359 = vmatpush.bf16.msra.mxu2 %v5675_v18  ;;  %v2658_v40 = vadd.f32 %v2657_v1, %v2645_v30  ;;  %v5694_v59 = vld [vmem:[#allocation7 + $0x110] sm:$0xf]  ;;  %v6524_v1 = vld [vmem:[#allocation7 + $0x94] sm:$0xf]  ;;  %v5807_v30 = vor.u32 %v6569_v56, %v5806_v25  ;;  %v6566_v56 = vld [vmem:[#allocation7 + $0x1e4] sm:$0xf] }
 0x249   :  { %v5695_v61 = vor.u32 %v6541_v60, %v5694_v59  ;;  %v5635_v4 = vor.u32 %v6524_v1, %v5632_v2  ;;  %v6563_v59 = vld [vmem:[#allocation7 + $0x1c4] sm:$0xf0]  ;;  %v6540_v60 = vld [vmem:[#allocation7 + $0x114] sm:$0xf]  ;;  %v5774_v1 = vld [vmem:[#allocation7 + $0x1b0] sm:$0xf] }
 0x24a   :  { %3332 = vmatpush.bf16.msrb.mxu3 %v5807_v30  ;;  %v6561_v2 = vld [vmem:[#allocation7 + $0x1b4] sm:$0xf0] }
 0x24b   :  { %3325 = vmatpush.bf16.msrb.mxu1 %v5695_v61 }
 0x24c   :  { %3350 = vmatpush.bf16.msra.mxu0 %v5579_v7  ;;  %3360 = vmatpush.bf16.msra.mxu2 %v5667_v52  ;;  %v6552_v7 = vld [vmem:[#allocation7 + $0x174] sm:$0xf] }
 0x24d   :  { %v2646_v34 = vpop.f32.mrf.mxu3  ;;  %v2659_v19 = vpop.f32.mrf.mxu2  ;;  %v5747_v27 = vor.u32 %v6552_v7, %v5744_v10  ;;  %v5688_v7 = vld [vmem:[#allocation7 + $0x108] sm:$0xf0]  ;;  %v6559_v10 = vld [vmem:[#allocation7 + $0x1a4] sm:$0xf0] }
 0x24e   :  { %v6548_v19 = vld [vmem:[#allocation7 + $0x154] sm:$0xf] }
 0x24f   :  { %3326 = vmatpush.bf16.msrb.mxu1 %v5687_v8  ;;  %v5731_v22 = vor.u32 %v6548_v19, %v5728_v21  ;;  %v5766_v8 = vld [vmem:[#allocation7 + $0x1a0] sm:$0xf] }
 0x250   :  { %3351 = vmatpush.bf16.msra.mxu0 %v5571_v15  ;;  %3361 = vmatpush.bf16.msra.mxu2 %v5659_v28  ;;  %v5627_v15 = vor.u32 %v6522_v14, %v5624_v16  ;;  %v5767_v14 = vor.u32 %v6559_v10, %v5766_v8  ;;  %v1906_v16 = vperm.slane %v7144_v12, 2 }
 0x252   :  { %v2670_v32 = vpop.f32.mrf.mxu1 }
 0x253   :  { %v2671_v41 = vadd.f32 %v2670_v32, %v2658_v40  ;;  %v2683_v42 = vpop.f32.mrf.mxu0  ;;  %3371 = vmatpush.bf16.msra.mxu1 %v5747_v27  ;;  %v5720_v32 = vld [vmem:[#allocation7 + $0x148] sm:$0xf0]  ;;  %v6567_v40 = vld [vmem:[#allocation7 + $0x1e4] sm:$0xf0] }
 0x254   :  { %3352 = vmatpush.bf16.msra.mxu0 %v5563_v24  ;;  %3362 = vmatpush.bf16.msra.mxu2 %v5651_v47  ;;  %v5723_v33 = vor.u32 %v6546_v31, %v5720_v32  ;;  %v5799_v38 = vor.u32 %v6567_v40, %v5798_v29  ;;  %v6565_v47 = vld [vmem:[#allocation7 + $0x1d4] sm:$0xf0]  ;;  %v6562_v40 = vld [vmem:[#allocation7 + $0x1c4] sm:$0xf] }
 0x255   :  { %v2709_v39 = vpop.f32.mrf.mxu2  ;;  %v2684_v43 = vadd.f32 %v2683_v42, %v2671_v41  ;;  %v6544_v42 = vld [vmem:[#allocation7 + $0x134] sm:$0xf]  ;;  %v5791_v37 = vor.u32 %v6565_v47, %v5790_v44  ;;  %v6558_v47 = vld [vmem:[#allocation7 + $0x1a4] sm:$0xf] }
 0x256   :  { %v2710_v34 = vadd.f32 %v2709_v39, %v1905_v17  ;;  %v5712_v39 = vld [vmem:[#allocation7 + $0x138] sm:$0xf0]  ;;  %3333 = vmatpush.bf16.msrb.mxu3 %v5799_v38  ;;  %v5784_v38 = vld [vmem:[#allocation7 + $0x1c8] sm:$0xf0] }
 0x257   :  { %3372 = vmatpush.bf16.msra.mxu1 %v5739_v9  ;;  %v5715_v45 = vor.u32 %v6544_v42, %v5712_v39  ;;  %v5787_v39 = vor.u32 %v6562_v40, %v5784_v38  ;;  %v6584_v40 = vld [vmem:[#allocation8 + $0x6c] sm:$0xf0]  ;;  %v6054_v38 = vld [vmem:[#allocation8 + $0x1e0] sm:$0xf] }
 0x258   :  { %v2696_v3 = vpop.f32.mrf.mxu3  ;;  %3363 = vmatpush.bf16.msra.mxu2 %v5643_v55  ;;  %v5707_v55 = vor.u32 %v6542_v51, %v5704_v54 }
 0x259   :  { %v2697_v62 = vadd.f32 %v2696_v3, %v2684_v43  ;;  %v5782_v3 = vld [vmem:[#allocation7 + $0x1c0] sm:$0xf] }
 0x25a   :  { %v2672_v50 = vpop.f32.mrf.mxu1  ;;  %3334 = vmatpush.bf16.msrb.mxu3 %v5791_v37 }
 0x25b   :  { %v2895_v13 = vmax.f32 %v2697_v62, 0.0  ;;  %v2685_v63 = vpop.f32.mrf.mxu0  ;;  %3373 = vmatpush.bf16.msra.mxu1 %v5731_v22  ;;  %v5696_v62 = vld [vmem:[#allocation7 + $0x118] sm:$0xf0]  ;;  %v6568_v22 = vld [vmem:[#allocation7 + $0x1f4] sm:$0xf] }
 0x25c   :  { %3364 = vmatpush.bf16.msra.mxu2 %v5635_v4  ;;  %v5783_v63 = vor.u32 %v6563_v59, %v5782_v3  ;;  %v5775_v4 = vor.u32 %v6561_v2, %v5774_v1  ;;  %v6554_v59 = vld [vmem:[#allocation7 + $0x184] sm:$0xf] }
 0x25d   :  { %v2711_v58 = vpop.f32.mrf.mxu2  ;;  %v2899_v48 = vpack.c.bf16 %v2895_v13, %v2895_v13 }
 0x25e   :  { %v5699_v58 = vor.u32 %v6540_v60, %v5696_v62  ;;  %3335 = vmatpush.bf16.msrb.mxu3 %v5783_v63  ;;  %v5752_v60 = vld [vmem:[#allocation7 + $0x188] sm:$0xf0]  ;;  %v1907_v62 = vperm.slane %v7144_v12, 3 }
 0x25f   :  { %3301 = vmatmul.bf16.vlgmr.msrb.gmra.mxu0 %v2899_v48  ;;  %3374 = vmatpush.bf16.msra.mxu1 %v5723_v33 }
 0x260   :  { %v2698_v0 = vpop.f32.mrf.mxu3  ;;  %3365 = vmatpush.bf16.msra.mxu2 %v5627_v15  ;;  %v6557_v15 = vld [vmem:[#allocation7 + $0x194] sm:$0xf0] }
 0x261   :  { %v5758_v0 = vld [vmem:[#allocation7 + $0x190] sm:$0xf] }
 0x262   :  { %v2722_v11 = vpop.f32.mrf.mxu1  ;;  %3336 = vmatpush.bf16.msrb.mxu3 %v5775_v4  ;;  %v5759_v20 = vor.u32 %v6557_v15, %v5758_v0  ;;  %v6598_v0 = vld [vmem:[#allocation8 + $0xe4] sm:$0xf] }
 0x263   :  { %v2748_v18 = vpop.f32.mrf.mxu0  ;;  %v2723_v23 = vadd.f32 %v2722_v11, %v2710_v34  ;;  %3375 = vmatpush.bf16.msra.mxu1 %v5715_v45  ;;  %v6555_v34 = vld [vmem:[#allocation7 + $0x184] sm:$0xf0]  ;;  %v6560_v45 = vld [vmem:[#allocation7 + $0x1b4] sm:$0xf] }
 0x265   :  { %v2761_v57 = vpop.f32.mrf.mxu2 }
 0x266   :  { %3337 = vmatpush.bf16.msrb.mxu3 %v5767_v14  ;;  %v5926_v14 = vld [vmem:[#allocation8 + $0xe0] sm:$0xf] }
 0x267   :  { %3376 = vmatpush.bf16.msra.mxu1 %v5707_v55 }
 0x268   :  { %v2735_v53 = vpop.f32.mrf.mxu3 }
 0x269   :  { %v2736_v52 = vadd.f32 %v2735_v53, %v2723_v23  ;;  %v5808_v23 = vld [vmem:[#allocation7 + $0x1f8] sm:$0xf0]  ;;  %v5800_v53 = vld [vmem:[#allocation7 + $0x1e8] sm:$0xf0] }
 0x26a   :  { %v2724_v24 = vpop.f32.mrf.mxu1  ;;  %3338 = vmatpush.bf16.msrb.mxu3 %v5759_v20  ;;  %v5803_v30 = vor.u32 %v6566_v56, %v5800_v53  ;;  %v5896_v53 = vld [vmem:[#allocation8 + $0xb0] sm:$0xf0] }
 0x26b   :  { %v2749_v35 = vadd.f32 %v2748_v18, %v2736_v52  ;;  %v2750_v28 = vpop.f32.mrf.mxu0  ;;  %3377 = vmatpush.bf16.msra.mxu1 %v5699_v58  ;;  %v5811_v24 = vor.u32 %v6568_v22, %v5808_v23  ;;  %v5894_v23 = vld [vmem:[#allocation8 + $0xa0] sm:$0xf] }
 0x26c   :  { %v6564_v28 = vld [vmem:[#allocation7 + $0x1d4] sm:$0xf] }
 0x26d   :  { %v2763_v36 = vpop.f32.mrf.mxu2  ;;  %v2762_v41 = vadd.f32 %v2761_v57, %v2749_v35  ;;  %v5750_v57 = vld [vmem:[#allocation7 + $0x180] sm:$0xf] }
 0x26e   :  { %v5751_v19 = vor.u32 %v6555_v34, %v5750_v57  ;;  %v5792_v36 = vld [vmem:[#allocation7 + $0x1d8] sm:$0xf0] }
 0x26f   :  { %v2896_v46 = vmax.f32 %v2762_v41, 0.0  ;;  %3353 = vmatmul.bf16.vlgmr.msra.gmra.mxu0 %v2899_v48  ;;  %v5691_v48 = vor.u32 %v6538_v6, %v5688_v7  ;;  %v5795_v29 = vor.u32 %v6564_v28, %v5792_v36 }
 0x270   :  { %v2737_v49 = vpop.f32.mrf.mxu3  ;;  %3339 = vmatpush.bf16.msrb.mxu3 %v5751_v19  ;;  %v5912_v19 = vld [vmem:[#allocation8 + $0xd0] sm:$0xf0] }
 0x271   :  { %v2900_v43 = vpack.c.bf16 %v2896_v46, %v2896_v46  ;;  %3378 = vmatpush.bf16.msra.mxu1 %v5691_v48  ;;  %v5776_v46 = vld [vmem:[#allocation7 + $0x1b8] sm:$0xf0]  ;;  %v5768_v49 = vld [vmem:[#allocation7 + $0x1a8] sm:$0xf0] }
 0x272   :  { %v2774_v50 = vpop.f32.mrf.mxu1  ;;  %v5779_v44 = vor.u32 %v6560_v45, %v5776_v46  ;;  %v5771_v37 = vor.u32 %v6558_v47, %v5768_v49  ;;  %v5864_v45 = vld [vmem:[#allocation8 + $0x70] sm:$0xf0]  ;;  %v6630_v47 = vld [vmem:[#allocation8 + $0x1e4] sm:$0xf] }
 0x273   :  { %3314 = vmatmul.bf16.vlgmr.msrb.gmra.mxu2 %v2900_v43  ;;  %v2775_v17 = vadd.f32 %v2774_v50, %v1906_v16  ;;  %v5760_v50 = vld [vmem:[#allocation7 + $0x198] sm:$0xf0]  ;;  %v6600_v16 = vld [vmem:[#allocation8 + $0xec] sm:$0xf0]  ;;  %v6056_v49 = vld [vmem:[#allocation8 + $0x1f0] sm:$0xf0] }
 0x274   :  { %3384 = vmatpush.bf16.msra.mxu3 %v5811_v24  ;;  %v5927_v15 = vor.u32 %v6600_v16, %v5926_v14  ;;  %v6592_v24 = vld [vmem:[#allocation8 + $0xac] sm:$0xf0]  ;;  %v5814_v16 = vld [vmem:[#allocation8] sm:$0xf] }
 0x275   :  { %v2813_v13 = vpop.f32.mrf.mxu2  ;;  %v5895_v56 = vor.u32 %v6592_v24, %v5894_v23  ;;  %v6601_v23 = vld [vmem:[#allocation8 + $0xf4] sm:$0xf0]  ;;  %v6599_v24 = vld [vmem:[#allocation8 + $0xec] sm:$0xf] }
 0x276   :  { %v2800_v61 = vpop.f32.mrf.mxu0  ;;  %3795 = vmatpush.bf16.msrb.mxu0 %v5927_v15  ;;  %v6006_v15 = vld [vmem:[#allocation8 + $0x180] sm:$0xf] }
 0x278   :  { %3385 = vmatpush.bf16.msra.mxu3 %v5803_v30 }
 0x27a   :  { %v2776_v5 = vpop.f32.mrf.mxu1 }
 0x27c   :  { %3386 = vmatpush.bf16.msra.mxu3 %v5795_v29  ;;  %v5862_v29 = vld [vmem:[#allocation8 + $0x60] sm:$0xf] }
 0x27d   :  { %v2815_v11 = vpop.f32.mrf.mxu2 }
 0x27e   :  { %v2802_v27 = vpop.f32.mrf.mxu0 }
 0x280   :  { %3387 = vmatpush.bf16.msra.mxu3 %v5787_v39  ;;  %v6582_v39 = vld [vmem:[#allocation8 + $0x64] sm:$0xf] }
 0x282   :  { %v2826_v9 = vpop.f32.mrf.mxu1 }
 0x283   :  { %3366 = vmatmul.bf16.vlgmr.msra.gmra.mxu2 %v2900_v43  ;;  %v6556_v43 = vld [vmem:[#allocation7 + $0x194] sm:$0xf] }
 0x284   :  { %3388 = vmatpush.bf16.msra.mxu3 %v5779_v44  ;;  %v5763_v55 = vor.u32 %v6556_v43, %v5760_v50  ;;  %v5867_v44 = vor.u32 %v6582_v39, %v5864_v45  ;;  %v6059_v43 = vor.u32 %v6630_v47, %v6056_v49  ;;  %v6580_v50 = vld [vmem:[#allocation8 + $0x4c] sm:$0xf0] }
 0x285   :  { %v2787_v26 = vpop.f32.mrf.mxu3 }
 0x286   :  { %v2788_v18 = vadd.f32 %v2787_v26, %v2775_v17  ;;  %v5928_v17 = vld [vmem:[#allocation8 + $0xf0] sm:$0xf0]  ;;  %v5910_v26 = vld [vmem:[#allocation8 + $0xc0] sm:$0xf] }
 0x287   :  { %v5931_v20 = vor.u32 %v6598_v0, %v5928_v17  ;;  %v6572_v0 = vld [vmem:[#allocation8 + $0xc] sm:$0xf0] }
 0x288   :  { %v2801_v21 = vadd.f32 %v2800_v61, %v2788_v18  ;;  %3389 = vmatpush.bf16.msra.mxu3 %v5771_v37  ;;  %v6594_v18 = vld [vmem:[#allocation8 + $0xc4] sm:$0xf]  ;;  %v5846_v37 = vld [vmem:[#allocation8 + $0x40] sm:$0xf] }
 0x28a   :  { %v2814_v25 = vadd.f32 %v2813_v13, %v2801_v21  ;;  %v2828_v32 = vpop.f32.mrf.mxu1  ;;  %v5755_v13 = vor.u32 %v6554_v59, %v5752_v60  ;;  %v5915_v21 = vor.u32 %v6594_v18, %v5912_v19  ;;  %v6578_v59 = vld [vmem:[#allocation8 + $0x44] sm:$0xf]  ;;  %v5848_v60 = vld [vmem:[#allocation8 + $0x50] sm:$0xf0]  ;;  %v5934_v19 = vld [vmem:[#allocation8 + $0xe8] sm:$0xf] }
 0x28b   :  { %v6586_v32 = vld [vmem:[#allocation8 + $0x84] sm:$0xf] }
 0x28c   :  { %v2827_v52 = vadd.f32 %v2826_v9, %v2814_v25  ;;  %3390 = vmatpush.bf16.msra.mxu3 %v5763_v55  ;;  %v6596_v9 = vld [vmem:[#allocation8 + $0xcc] sm:$0xf0]  ;;  %v6590_v25 = vld [vmem:[#allocation8 + $0xa4] sm:$0xf] }
 0x28d   :  { %v2789_v31 = vpop.f32.mrf.mxu3  ;;  %v5911_v34 = vor.u32 %v6596_v9, %v5910_v26  ;;  %v5899_v30 = vor.u32 %v6590_v25, %v5896_v53  ;;  %v6570_v26 = vld [vmem:[#allocation8 + $0x4] sm:$0xf]  ;;  %v5816_v9 = vld [vmem:[#allocation8 + $0x10] sm:$0xf0]  ;;  %v5936_v25 = vld [vmem:[#allocation8 + $0xf8] sm:$0xf0] }
 0x28e   :  { %v2897_v33 = vmax.f32 %v2827_v52, 0.0  ;;  %v5878_v52 = vld [vmem:[#allocation8 + $0x80] sm:$0xf]  ;;  %v6588_v31 = vld [vmem:[#allocation8 + $0x8c] sm:$0xf0]  ;;  %v5819_v53 = vor.u32 %v6570_v26, %v5816_v9 }
 0x28f   :  { %3796 = vmatpush.bf16.msrb.mxu0 %v5911_v34  ;;  %v6008_v34 = vld [vmem:[#allocation8 + $0x190] sm:$0xf0]  ;;  %v6585_v26 = vld [vmem:[#allocation8 + $0x74] sm:$0xf0] }
 0x290   :  { %v2901_v35 = vpack.c.bf16 %v2897_v33, %v2897_v33  ;;  %3391 = vmatpush.bf16.msra.mxu3 %v5755_v13  ;;  %v5879_v33 = vor.u32 %v6588_v31, %v5878_v52  ;;  %v5851_v13 = vor.u32 %v6578_v59, %v5848_v60  ;;  %v5935_v31 = vor.u32 %v6601_v23, %v5934_v19  ;;  %v5904_v60 = vld [vmem:[#allocation8 + $0xb8] sm:$0xf0]  ;;  %v6633_v19 = vld [vmem:[#allocation8 + $0x1f4] sm:$0xf0] }
 0x292   :  { %3327 = vmatmul.bf16.vlgmr.msrb.gmra.mxu1 %v2901_v35 }
 0x293   :  { %3821 = vmatpush.bf16.msrb.mxu1 %v5931_v20  ;;  %3797 = vmatpush.bf16.msrb.mxu0 %v5895_v56  ;;  %v6620_v20 = vld [vmem:[#allocation8 + $0x18c] sm:$0xf0] }
 0x294   :  { %v2852_v41 = vpop.f32.mrf.mxu0  ;;  %v6007_v56 = vor.u32 %v6620_v20, %v6006_v15  ;;  %v5870_v20 = vld [vmem:[#allocation8 + $0x68] sm:$0xf] }
 0x295   :  { %v2865_v42 = vpop.f32.mrf.mxu2 }
 0x297   :  { %3822 = vmatpush.bf16.msrb.mxu1 %v5915_v21  ;;  %3798 = vmatpush.bf16.msrb.mxu0 %v5879_v33  ;;  %v5815_v21 = vor.u32 %v6572_v0, %v5814_v16  ;;  %v6616_v33 = vld [vmem:[#allocation8 + $0x16c] sm:$0xf0]  ;;  %v6602_v0 = vld [vmem:[#allocation8 + $0x104] sm:$0xf] }
 0x298   :  { %v6604_v16 = vld [vmem:[#allocation8 + $0x10c] sm:$0xf0] }
 0x29b   :  { %3823 = vmatpush.bf16.msrb.mxu1 %v5899_v30 }
 0x29c   :  { %v2854_v51 = vpop.f32.mrf.mxu0 }
 0x29d   :  { %v2867_v54 = vpop.f32.mrf.mxu2  ;;  %v6038_v51 = vld [vmem:[#allocation8 + $0x1c0] sm:$0xf] }
 0x29e   :  { %v6628_v54 = vld [vmem:[#allocation8 + $0x1cc] sm:$0xf0] }
 0x29f   :  { %v6039_v55 = vor.u32 %v6628_v54, %v6038_v51  ;;  %v5902_v54 = vld [vmem:[#allocation8 + $0xa8] sm:$0xf] }
 0x2a2   :  { %v2878_v3 = vpop.f32.mrf.mxu1  ;;  %3379 = vmatmul.bf16.vlgmr.msra.gmra.mxu1 %v2901_v35  ;;  %v5880_v35 = vld [vmem:[#allocation8 + $0x90] sm:$0xf0] }
 0x2a3   :  { %v5883_v36 = vor.u32 %v6586_v32, %v5880_v35  ;;  %v5990_v32 = vld [vmem:[#allocation8 + $0x160] sm:$0xf]  ;;  %v6614_v35 = vld [vmem:[#allocation8 + $0x164] sm:$0xf] }
 0x2a5   :  { %v2839_v61 = vpop.f32.mrf.mxu3  ;;  %3824 = vmatpush.bf16.msrb.mxu1 %v5883_v36  ;;  %v5992_v36 = vld [vmem:[#allocation8 + $0x170] sm:$0xf0] }
 0x2a6   :  { %v2840_v63 = vadd.f32 %v2839_v61, %v1907_v62  ;;  %v6626_v62 = vld [vmem:[#allocation8 + $0x1c4] sm:$0xf]  ;;  %v5995_v39 = vor.u32 %v6614_v35, %v5992_v36  ;;  %v6629_v35 = vld [vmem:[#allocation8 + $0x1d4] sm:$0xf0]  ;;  %v5856_v36 = vld [vmem:[#allocation8 + $0x58] sm:$0xf0] }
 0x2a8   :  { %v2853_v1 = vadd.f32 %v2852_v41, %v2840_v63  ;;  %v5863_v41 = vor.u32 %v6584_v40, %v5862_v29  ;;  %v6040_v63 = vld [vmem:[#allocation8 + $0x1d0] sm:$0xf0]  ;;  %v5918_v29 = vld [vmem:[#allocation8 + $0xc8] sm:$0xf]  ;;  %v6597_v40 = vld [vmem:[#allocation8 + $0xd4] sm:$0xf0] }
 0x2a9   :  { %3825 = vmatpush.bf16.msrb.mxu1 %v5867_v44  ;;  %v5919_v45 = vor.u32 %v6597_v40, %v5918_v29  ;;  %v6612_v44 = vld [vmem:[#allocation8 + $0x14c] sm:$0xf0] }
 0x2aa   :  { %v2880_v58 = vpop.f32.mrf.mxu1  ;;  %v2866_v4 = vadd.f32 %v2865_v42, %v2853_v1  ;;  %v6632_v42 = vld [vmem:[#allocation8 + $0x1ec] sm:$0xf0]  ;;  %3799 = vmatpush.bf16.msrb.mxu0 %v5863_v41  ;;  %v5920_v41 = vld [vmem:[#allocation8 + $0xd8] sm:$0xf0] }
 0x2ab   :  { %v6055_v46 = vor.u32 %v6632_v42, %v6054_v38  ;;  %v5830_v58 = vld [vmem:[#allocation8 + $0x20] sm:$0xf]  ;;  %v6576_v1 = vld [vmem:[#allocation8 + $0x2c] sm:$0xf0]  ;;  %v6595_v38 = vld [vmem:[#allocation8 + $0xcc] sm:$0xf]  ;;  %v5991_v42 = vor.u32 %v6616_v33, %v5990_v32 }
 0x2ac   :  { %v2879_v5 = vadd.f32 %v2878_v3, %v2866_v4  ;;  %v5847_v3 = vor.u32 %v6580_v50, %v5846_v37  ;;  %v6022_v4 = vld [vmem:[#allocation8 + $0x1a0] sm:$0xf]  ;;  %v5923_v49 = vor.u32 %v6595_v38, %v5920_v41  ;;  %v6610_v37 = vld [vmem:[#allocation8 + $0x144] sm:$0xf]  ;;  %v6046_v32 = vld [vmem:[#allocation8 + $0x1c8] sm:$0xf] }
 0x2ad   :  { %v2841_v2 = vpop.f32.mrf.mxu3  ;;  %3808 = vmatpush.bf16.msrb.mxu2 %v6055_v46  ;;  %3826 = vmatpush.bf16.msrb.mxu1 %v5851_v13  ;;  %v5974_v46 = vld [vmem:[#allocation8 + $0x140] sm:$0xf]  ;;  %v6047_v40 = vor.u32 %v6629_v35, %v6046_v32  ;;  %v6627_v41 = vld [vmem:[#allocation8 + $0x1cc] sm:$0xf] }
 0x2ae   :  { %v6043_v2 = vor.u32 %v6626_v62, %v6040_v63  ;;  %3800 = vmatpush.bf16.msrb.mxu0 %v5847_v3  ;;  %v5975_v50 = vor.u32 %v6612_v44, %v5974_v46  ;;  %v6593_v3 = vld [vmem:[#allocation8 + $0xb4] sm:$0xf0]  ;;  %v5958_v13 = vld [vmem:[#allocation8 + $0x120] sm:$0xf]  ;;  %v6608_v63 = vld [vmem:[#allocation8 + $0x12c] sm:$0xf0] }
 0x2af   :  { %v5903_v59 = vor.u32 %v6593_v3, %v5902_v54  ;;  %v6577_v46 = vld [vmem:[#allocation8 + $0x34] sm:$0xf0]  ;;  %v6030_v44 = vld [vmem:[#allocation8 + $0x1a8] sm:$0xf]  ;;  %v6623_v54 = vld [vmem:[#allocation8 + $0x1ac] sm:$0xf] }
 0x2b0   :  { %v6032_v3 = vld [vmem:[#allocation8 + $0x1b8] sm:$0xf0] }
 0x2b1   :  { %3809 = vmatpush.bf16.msrb.mxu2 %v6039_v55  ;;  %v6591_v55 = vld [vmem:[#allocation8 + $0xac] sm:$0xf] }
 0x2b2   :  { %v5907_v62 = vor.u32 %v6591_v55, %v5904_v60  ;;  %v6035_v55 = vor.u32 %v6623_v54, %v6032_v3  ;;  %v6573_v60 = vld [vmem:[#allocation8 + $0x14] sm:$0xf0]  ;;  %v6638_v54 = vld [vmem:[%s7294_s10 + $0x20] sm:$0xff] }
 0x2b3   :  { %v6646_v3 = vld [vmem:[%s7294_s10 + $0x60] sm:$0xff] }
 0x2b5   :  { %v2891_v6 = vpop.f32.mrf.mxu3 }
 0x2b6   :  { %v2892_v7 = vadd.f32 %v2891_v6, %v2879_v5  ;;  %v6624_v5 = vld [vmem:[#allocation8 + $0x1ac] sm:$0xf0]  ;;  %v6574_v6 = vld [vmem:[#allocation8 + $0x24] sm:$0xf] }
 0x2b8   :  { %v2898_v48 = vmax.f32 %v2892_v7, 0.0  ;;  %v5831_v7 = vor.u32 %v6576_v1, %v5830_v58  ;;  %v6606_v58 = vld [vmem:[#allocation8 + $0x124] sm:$0xf]  ;;  %v5959_v1 = vor.u32 %v6608_v63, %v5958_v13  ;;  %v6621_v63 = vld [vmem:[#allocation8 + $0x194] sm:$0xf0] }
 0x2ba   :  { %v2902_v8 = vpack.c.bf16 %v2898_v48, %v2898_v48  ;;  %v5832_v48 = vld [vmem:[#allocation8 + $0x30] sm:$0xf0]  ;;  %3801 = vmatpush.bf16.msrb.mxu0 %v5831_v7 }
 0x2bb   :  { %v5835_v14 = vor.u32 %v6574_v6, %v5832_v48 }
 0x2bc   :  { %3340 = vmatmul.bf16.vlgmr.msrb.gmra.mxu3 %v2902_v8 }
 0x2bd   :  { %v2893_v10 = vpop.f32.mrf.mxu3  ;;  %3834 = vmatpush.bf16.msrb.mxu3 %v6059_v43  ;;  %3827 = vmatpush.bf16.msrb.mxu1 %v5835_v14  ;;  %v5976_v43 = vld [vmem:[#allocation8 + $0x150] sm:$0xf0]  ;;  %v5942_v14 = vld [vmem:[#allocation8 + $0x100] sm:$0xf] }
 0x2be   :  { %v6024_v10 = vld [vmem:[#allocation8 + $0x1b0] sm:$0xf0]  ;;  %3802 = vmatpush.bf16.msrb.mxu0 %v5815_v21  ;;  %v5979_v51 = vor.u32 %v6610_v37, %v5976_v43  ;;  %v5943_v15 = vor.u32 %v6604_v16, %v5942_v14  ;;  %v6583_v21 = vld [vmem:[#allocation8 + $0x6c] sm:$0xf]  ;;  %v5840_v43 = vld [vmem:[#allocation8 + $0x38] sm:$0xf0] }
 0x2bf   :  { %v6575_v37 = vld [vmem:[#allocation8 + $0x2c] sm:$0xf] }
 0x2c0   :  { %v6615_v14 = vld [vmem:[#allocation8 + $0x16c] sm:$0xf] }
 0x2c1   :  { %3835 = vmatpush.bf16.msrb.mxu3 %v6043_v2  ;;  %3828 = vmatpush.bf16.msrb.mxu1 %v5819_v53  ;;  %v5960_v2 = vld [vmem:[#allocation8 + $0x130] sm:$0xf0] }
 0x2c2   :  { %3847 = vmatpush.bf16.msra.mxu0 %v5935_v31  ;;  %v5963_v7 = vor.u32 %v6606_v58, %v5960_v2  ;;  %v6581_v31 = vld [vmem:[#allocation8 + $0x54] sm:$0xf0]  ;;  %v6571_v58 = vld [vmem:[#allocation8 + $0xc] sm:$0xf]  ;;  %v2967_v2 = vld [vmem:[%s7291_s7] sm:$0x3] }
 0x2c3   :  { %v2969_v16 = vperm.slane %v2967_v2, 0 }
 0x2c6   :  { %3848 = vmatpush.bf16.msra.mxu0 %v5919_v45  ;;  %v5838_v45 = vld [vmem:[#allocation8 + $0x28] sm:$0xf] }
 0x2ca   :  { %3849 = vmatpush.bf16.msra.mxu0 %v5903_v59  ;;  %v5822_v59 = vld [vmem:[#allocation8 + $0x8] sm:$0xf] }
 0x2cb   :  { %v5823_v13 = vor.u32 %v6573_v60, %v5822_v59  ;;  %v6645_v59 = vld [vmem:[%s7294_s10 + $0x58] sm:$0xff] }
 0x2cc   :  { %3392 = vmatmul.bf16.vlgmr.msra.gmra.mxu3 %v2902_v8  ;;  %v6622_v8 = vld [vmem:[#allocation8 + $0x1a4] sm:$0xf] }
 0x2cd   :  { %v6027_v17 = vor.u32 %v6622_v8, %v6024_v10  ;;  %v6587_v8 = vld [vmem:[#allocation8 + $0x8c] sm:$0xf]  ;;  %v5888_v10 = vld [vmem:[#allocation8 + $0x98] sm:$0xf0]  ;;  %v6657_v60 = vld [vmem:[%s7294_s10 + $0xb8] sm:$0xff] }
 0x2cf   :  { %3836 = vmatpush.bf16.msrb.mxu3 %v6027_v17  ;;  %v5944_v17 = vld [vmem:[#allocation8 + $0x110] sm:$0xf0] }
 0x2d0   :  { %v5947_v9 = vor.u32 %v6602_v0, %v5944_v17 }
 0x2dc   :  { %v7150_v27 = vpop.f32.mrf.mxu0 }
 0x2e4   :  { %v3304_v12 = vpop.f32.mrf.mxu0 }
 0x2e5   :  { %v6023_v12 = vor.u32 %v6624_v5, %v6022_v4  ;;  %v5886_v4 = vld [vmem:[#allocation8 + $0x88] sm:$0xf]  ;;  %v6589_v5 = vld [vmem:[#allocation8 + $0x94] sm:$0xf0] }
 0x2e6   :  { %v5887_v48 = vor.u32 %v6589_v5, %v5886_v4 }
 0x2e7   :  { %3810 = vmatpush.bf16.msrb.mxu2 %v6023_v12  ;;  %v5891_v12 = vor.u32 %v6587_v8, %v5888_v10  ;;  %v5998_v10 = vld [vmem:[#allocation8 + $0x168] sm:$0xf] }
 0x2e8   :  { %3850 = vmatpush.bf16.msra.mxu0 %v5887_v48  ;;  %v6016_v48 = vld [vmem:[#allocation8 + $0x198] sm:$0xf0] }
 0x2eb   :  { %3811 = vmatpush.bf16.msrb.mxu2 %v6007_v56  ;;  %v6064_v56 = vld [vmem:[#allocation8 + $0x1f8] sm:$0xf0] }
 0x2ec   :  { %v7152_v11 = vpop.f32.mrf.mxu0 }
 0x2ef   :  { %3812 = vmatpush.bf16.msrb.mxu2 %v5991_v42  ;;  %v6048_v42 = vld [vmem:[#allocation8 + $0x1d8] sm:$0xf0] }
 0x2f3   :  { %3813 = vmatpush.bf16.msrb.mxu2 %v5975_v50 }
 0x2f4   :  { %v3356_v57 = vpop.f32.mrf.mxu0 }
 0x2f5   :  { %v6618_v57 = vld [vmem:[#allocation8 + $0x184] sm:$0xf] }
 0x2f6   :  { %v7154_v22 = vpop.f32.mrf.mxu2  ;;  %v6011_v52 = vor.u32 %v6618_v57, %v6008_v34  ;;  %v5871_v57 = vor.u32 %v6585_v26, %v5870_v20  ;;  %v6062_v34 = vld [vmem:[#allocation8 + $0x1e8] sm:$0xf]  ;;  %v6613_v26 = vld [vmem:[#allocation8 + $0x154] sm:$0xf0] }
 0x2f7   :  { %3814 = vmatpush.bf16.msrb.mxu2 %v5959_v1  ;;  %v6063_v23 = vor.u32 %v6633_v19, %v6062_v34  ;;  %v5824_v1 = vld [vmem:[#allocation8 + $0x18] sm:$0xf0]  ;;  %v5982_v20 = vld [vmem:[#allocation8 + $0x148] sm:$0xf]  ;;  %v3303_v34 = vadd.f32 %v7150_v27, %v2969_v16  ;;  %v6605_v27 = vld [vmem:[#allocation8 + $0x114] sm:$0xf0] }
 0x2f8   :  { %3837 = vmatpush.bf16.msrb.mxu3 %v6011_v52  ;;  %v5854_v52 = vld [vmem:[#allocation8 + $0x48] sm:$0xf]  ;;  %3851 = vmatpush.bf16.msra.mxu0 %v5871_v57  ;;  %v5827_v5 = vor.u32 %v6571_v58, %v5824_v1  ;;  %v5984_v57 = vld [vmem:[#allocation8 + $0x158] sm:$0xf0]  ;;  %v5983_v19 = vor.u32 %v6613_v26, %v5982_v20 }
 0x2f9   :  { %v5855_v33 = vor.u32 %v6581_v31, %v5854_v52  ;;  %v6656_v58 = vld [vmem:[%s7294_s10 + $0xb0] sm:$0xff] }
 0x2fa   :  { %v6664_v1 = vld [vmem:[%s7294_s10 + $0xf0] sm:$0xff] }
 0x2fb   :  { %3815 = vmatpush.bf16.msrb.mxu2 %v5943_v15  ;;  %v6000_v15 = vld [vmem:[#allocation8 + $0x178] sm:$0xf0] }
 0x2fc   :  { %3838 = vmatpush.bf16.msrb.mxu3 %v5995_v39  ;;  %v6051_v39 = vor.u32 %v6627_v41, %v6048_v42  ;;  %3852 = vmatpush.bf16.msra.mxu0 %v5855_v33  ;;  %v6003_v17 = vor.u32 %v6615_v14, %v6000_v15  ;;  %v5950_v33 = vld [vmem:[#allocation8 + $0x108] sm:$0xf]  ;;  %v2970_v41 = vperm.slane %v2967_v2, 1  ;;  %v6635_v2 = vld [vmem:[%s7294_s10 + $0x8] sm:$0xff]  ;;  %v6661_v15 = vld [vmem:[%s7294_s10 + $0xd8] sm:$0xff] }
 0x2fd   :  { %v6660_v20 = vld [vmem:[%s7294_s10 + $0xd0] sm:$0xff] }
 0x2fe   :  { %v3317_v28 = vpop.f32.mrf.mxu2  ;;  %v3355_v42 = vadd.f32 %v7152_v11, %v2970_v41  ;;  %v6649_v11 = vld [vmem:[%s7294_s10 + $0x78] sm:$0xff] }
 0x2ff   :  { %v5939_v28 = vor.u32 %v6599_v24, %v5936_v25  ;;  %v5872_v24 = vld [vmem:[#allocation8 + $0x78] sm:$0xf0]  ;;  %v6631_v25 = vld [vmem:[#allocation8 + $0x1ec] sm:$0xf]  ;;  %3860 = vmatpush.bf16.msra.mxu2 %v6063_v23  ;;  %v5966_v23 = vld [vmem:[#allocation8 + $0x128] sm:$0xf] }
 0x300   :  { %3839 = vmatpush.bf16.msrb.mxu3 %v5979_v51  ;;  %v5875_v53 = vor.u32 %v6583_v21, %v5872_v24  ;;  %v5843_v51 = vor.u32 %v6575_v37, %v5840_v43  ;;  %v6609_v24 = vld [vmem:[#allocation8 + $0x134] sm:$0xf0]  ;;  %v6641_v43 = vld [vmem:[%s7294_s10 + $0x38] sm:$0xff] }
 0x301   :  { %3873 = vmatpush.bf16.msra.mxu1 %v5939_v28  ;;  %v6579_v28 = vld [vmem:[#allocation8 + $0x4c] sm:$0xf]  ;;  %v5967_v52 = vor.u32 %v6609_v24, %v5966_v23 }
 0x302   :  { %v5859_v38 = vor.u32 %v6579_v28, %v5856_v36  ;;  %v6603_v28 = vld [vmem:[#allocation8 + $0x10c] sm:$0xf]  ;;  %v5952_v36 = vld [vmem:[#allocation8 + $0x118] sm:$0xf0] }
 0x303   :  { %3861 = vmatpush.bf16.msra.mxu2 %v6047_v40  ;;  %v5951_v40 = vor.u32 %v6605_v27, %v5950_v33  ;;  %v6658_v23 = vld [vmem:[%s7294_s10 + $0xc0] sm:$0xff]  ;;  %v6846_v33 = vmov 0.0  }
 0x304   :  { %3840 = vmatpush.bf16.msrb.mxu3 %v5963_v7  ;;  %v6619_v7 = vld [vmem:[#allocation8 + $0x18c] sm:$0xf] }
 0x305   :  { %3874 = vmatpush.bf16.msra.mxu1 %v5923_v49  ;;  %v6625_v49 = vld [vmem:[#allocation8 + $0x1b4] sm:$0xf0]  ;;  %v6019_v8 = vor.u32 %v6619_v7, %v6016_v48  ;;  %v6663_v7 = vld [vmem:[%s7294_s10 + $0xe8] sm:$0xff]  ;;  %v6634_v48 = vld [vmem:[%s7294_s10] sm:$0xff] }
 0x306   :  { %v7156_v61 = vpop.f32.mrf.mxu2  ;;  %v6031_v50 = vor.u32 %v6625_v49, %v6030_v44 }
 0x308   :  { %3841 = vmatpush.bf16.msrb.mxu3 %v5947_v9  ;;  %3862 = vmatpush.bf16.msra.mxu2 %v6031_v50  ;;  %v6611_v9 = vld [vmem:[#allocation8 + $0x14c] sm:$0xf]  ;;  %v6639_v50 = vld [vmem:[%s7294_s10 + $0x28] sm:$0xff] }
 0x309   :  { %3875 = vmatpush.bf16.msra.mxu1 %v5907_v62  ;;  %v6014_v62 = vld [vmem:[#allocation8 + $0x188] sm:$0xf]  ;;  %v5987_v21 = vor.u32 %v6611_v9, %v5984_v57  ;;  %v6651_v57 = vld [vmem:[%s7294_s10 + $0x88] sm:$0xff] }
 0x30a   :  { %v6015_v4 = vor.u32 %v6621_v63, %v6014_v62  ;;  %v6665_v62 = vld [vmem:[%s7294_s10 + $0xf8] sm:$0xff]  ;;  %v6644_v63 = vld [vmem:[%s7294_s10 + $0x50] sm:$0xff] }
 0x30c   :  { %3863 = vmatpush.bf16.msra.mxu2 %v6015_v4  ;;  %v6643_v4 = vld [vmem:[%s7294_s10 + $0x48] sm:$0xff] }
 0x30d   :  { %3876 = vmatpush.bf16.msra.mxu1 %v5891_v12  ;;  %v6617_v12 = vld [vmem:[#allocation8 + $0x174] sm:$0xf0] }
 0x30e   :  { %v3369_v30 = vpop.f32.mrf.mxu2  ;;  %v5999_v0 = vor.u32 %v6617_v12, %v5998_v10  ;;  %v6654_v10 = vld [vmem:[%s7294_s10 + $0xa0] sm:$0xff] }
 0x30f   :  { %v7158_v18 = vpop.f32.mrf.mxu1  ;;  %v6067_v30 = vor.u32 %v6631_v25, %v6064_v56  ;;  %v3316_v25 = vadd.f32 %v7154_v22, %v3303_v34  ;;  %v6607_v56 = vld [vmem:[#allocation8 + $0x12c] sm:$0xf]  ;;  %v6659_v34 = vld [vmem:[%s7294_s10 + $0xc8] sm:$0xff] }
 0x310   :  { %3864 = vmatpush.bf16.msra.mxu2 %v5999_v0  ;;  %v6662_v12 = vld [vmem:[%s7294_s10 + $0xe0] sm:$0xff]  ;;  %v6653_v0 = vld [vmem:[%s7294_s10 + $0x98] sm:$0xff] }
 0x311   :  { %3877 = vmatpush.bf16.msra.mxu1 %v5875_v53  ;;  %3886 = vmatpush.bf16.msra.mxu3 %v6067_v30  ;;  %v5968_v53 = vld [vmem:[#allocation8 + $0x138] sm:$0xf0]  ;;  %v3329_v30 = vadd.f32 %v7158_v18, %v3316_v25 }
 0x312   :  { %v5971_v32 = vor.u32 %v6607_v56, %v5968_v53 }
 0x314   :  { %3865 = vmatpush.bf16.msra.mxu2 %v5983_v19  ;;  %v3465_v19 = vld [vmem:[%s7293_s9] sm:$0xf] }
 0x315   :  { %3878 = vmatpush.bf16.msra.mxu1 %v5859_v38  ;;  %3887 = vmatpush.bf16.msra.mxu3 %v6051_v39  ;;  %v5955_v38 = vor.u32 %v6603_v28, %v5952_v36  ;;  %v3368_v39 = vadd.f32 %v7156_v61, %v3355_v42  ;;  %v6640_v61 = vld [vmem:[%s7294_s10 + $0x30] sm:$0xff]  ;;  %v3467_v24 = vperm.slane %v3465_v19, 0  ;;  %v3468_v25 = vperm.slane %v3465_v19, 1 }
 0x317   :  { %v3330_v47 = vpop.f32.mrf.mxu1 }
 0x318   :  { %v5839_v47 = vor.u32 %v6577_v46, %v5838_v45  ;;  %3866 = vmatpush.bf16.msra.mxu2 %v5967_v52 }
 0x319   :  { %3879 = vmatpush.bf16.msra.mxu1 %v5843_v51  ;;  %3888 = vmatpush.bf16.msra.mxu3 %v6035_v55  ;;  %v6647_v51 = vld [vmem:[%s7294_s10 + $0x68] sm:$0xff]  ;;  %v6637_v55 = vld [vmem:[%s7294_s10 + $0x18] sm:$0xff] }
 0x31a   :  { %3853 = vmatpush.bf16.msra.mxu0 %v5839_v47 }
 0x31c   :  { %3867 = vmatpush.bf16.msra.mxu2 %v5951_v40 }
 0x31d   :  { %3880 = vmatpush.bf16.msra.mxu1 %v5827_v5  ;;  %3889 = vmatpush.bf16.msra.mxu3 %v6019_v8  ;;  %v6655_v5 = vld [vmem:[%s7294_s10 + $0xa8] sm:$0xff]  ;;  %v6642_v8 = vld [vmem:[%s7294_s10 + $0x40] sm:$0xff] }
 0x31e   :  { %3854 = vmatpush.bf16.msra.mxu0 %v5823_v13  ;;  %v6636_v13 = vld [vmem:[%s7294_s10 + $0x10] sm:$0xff] }
 0x31f   :  { %v7160_v6 = vpop.f32.mrf.mxu1 }
 0x320   :  { %v3381_v45 = vadd.f32 %v7160_v6, %v3368_v39  ;;  %v6648_v6 = vld [vmem:[%s7294_s10 + $0x70] sm:$0xff] }
 0x321   :  { %3890 = vmatpush.bf16.msra.mxu3 %v6003_v17  ;;  %v6652_v17 = vld [vmem:[%s7294_s10 + $0x90] sm:$0xff] }
 0x325   :  { %3891 = vmatpush.bf16.msra.mxu3 %v5987_v21  ;;  %v6650_v21 = vld [vmem:[%s7294_s10 + $0x80] sm:$0xff] }
 0x327   :  { %v3382_v29 = vpop.f32.mrf.mxu1 }
 0x329   :  { %3892 = vmatpush.bf16.msra.mxu3 %v5971_v32  ;;  %v6845_v32 = vmov 0  }
 0x32a   :  { %6684 = vset.pattern.permute.xlu1 %v6845_v32  ;;  %6691 = vset.pattern.permute.xlu0 %v6845_v32 }
 0x32b   :  { %6690 = vset.pattern.permute.xlu2 %v6845_v32 }
 0x32d   :  { %3893 = vmatpush.bf16.msra.mxu3 %v5955_v38 }
 0x33f   :  { %v3341_v31 = vpop.f32.mrf.mxu3 }
 0x340   :  { %v3342_v35 = vadd.f32 %v3341_v31, %v3329_v30  ;;  %v108_v31 = vld [vmem:[%s7285_s1] sm:$0xff] }
 0x341   :  { %vm4229_vm4 = vcmp.eq.s32.totalorder %v108_v31, 1  ;;  %vm4243_vm5 = vcmp.eq.s32.totalorder %v108_v31, 2  ;;  %vm4219_vm6 = vcmp.eq.s32.totalorder %v108_v31, 0  ;;  %vm4257_vm7 = vcmp.eq.s32.totalorder %v108_v31, 3 }
 0x342   :  { %v3397_v29 = vmax.f32 %v3342_v35, 0.0  ;;  %v6197_v35 = vsel %vm4229_vm4, 1.0, %v6846_v33  ;;  %v6198_v27 = vsel %vm4243_vm5, 1.0, %v6846_v33  ;;  %v6196_v28 = vsel %vm4219_vm6, 1.0, %v6846_v33 }
 0x343   :  { %v6199_v36 = vsel %vm4257_vm7, 1.0, %v6846_v33  ;;  %v6685_v38 = vpack.i.bf16 %v6198_v27, %v6197_v35  ;;  %4224 = vperm.xlu0 %6691, %v6196_v28  }
 0x344   :  { %v3399_v22 = vpack.c.bf16 %v3397_v29, %v3397_v29  ;;  %4262 = vperm.xlu2 %6690, %v6199_v36  }
 0x345   :  { %6686 = vperm.xlu1 %6684, %v6685_v38  }
 0x346   :  { %3803 = vmatmul.bf16.vlgmr.msrb.gmra.mxu0 %v3399_v22  ;;  %3829 = vmatmul.bf16.vlgmr.msrb.gmra.mxu1 %v3399_v22 }
 0x347   :  { %v3343_v18 = vpop.f32.mrf.mxu3  ;;  %4167 = vmatpush.bf16.msrb.mxu0 %v6641_v43  ;;  %4193 = vmatpush.bf16.msrb.mxu1 %v6657_v60 }
 0x34b   :  { %4168 = vmatpush.bf16.msrb.mxu0 %v6640_v61  ;;  %4194 = vmatpush.bf16.msrb.mxu1 %v6656_v58 }
 0x34f   :  { %v3393_v46 = vpop.f32.mrf.mxu3  ;;  %4169 = vmatpush.bf16.msrb.mxu0 %v6639_v50  ;;  %4195 = vmatpush.bf16.msrb.mxu1 %v6655_v5 }
 0x350   :  { %v3394_v44 = vadd.f32 %v3393_v46, %v3381_v45 }
 0x352   :  { %v3398_v47 = vmax.f32 %v3394_v44, 0.0 }
 0x353   :  { %4170 = vmatpush.bf16.msrb.mxu0 %v6638_v54  ;;  %4196 = vmatpush.bf16.msrb.mxu1 %v6654_v10 }
 0x354   :  { %v3400_v49 = vpack.c.bf16 %v3398_v47, %v3398_v47 }
 0x356   :  { %3816 = vmatmul.bf16.vlgmr.msrb.gmra.mxu2 %v3400_v49  ;;  %3842 = vmatmul.bf16.vlgmr.msrb.gmra.mxu3 %v3400_v49 }
 0x357   :  { %3855 = vmatmul.bf16.vlgmr.msra.gmra.mxu0 %v3399_v22  ;;  %3881 = vmatmul.bf16.vlgmr.msra.gmra.mxu1 %v3399_v22  ;;  %v3395_v37 = vpop.f32.mrf.mxu3 }
 0x358   :  { %4180 = vmatpush.bf16.msrb.mxu2 %v6649_v11  ;;  %4171 = vmatpush.bf16.msrb.mxu0 %v6637_v55  ;;  %v3470_v37 = vperm.slane %v3465_v19, 3 }
 0x359   :  { %4206 = vmatpush.bf16.msrb.mxu3 %v6665_v62  ;;  %4197 = vmatpush.bf16.msrb.mxu1 %v6653_v0 }
 0x35c   :  { %4181 = vmatpush.bf16.msrb.mxu2 %v6648_v6  ;;  %4172 = vmatpush.bf16.msrb.mxu0 %v6636_v13 }
 0x35d   :  { %4207 = vmatpush.bf16.msrb.mxu3 %v6664_v1  ;;  %4198 = vmatpush.bf16.msrb.mxu1 %v6652_v17 }
 0x360   :  { %4182 = vmatpush.bf16.msrb.mxu2 %v6647_v51  ;;  %4173 = vmatpush.bf16.msrb.mxu0 %v6635_v2  ;;  %v6692_v2 = vld [vmem:[%s7295_s11] ss:$0 sm:$0xff]  ;;  %s6849_s11 = smov 104  }
 0x361   :  { %4208 = vmatpush.bf16.msrb.mxu3 %v6663_v7  ;;  %4199 = vmatpush.bf16.msrb.mxu1 %v6651_v57 }
 0x364   :  { %4183 = vmatpush.bf16.msrb.mxu2 %v6646_v3  ;;  %4174 = vmatpush.bf16.msrb.mxu0 %v6634_v48 }
 0x365   :  { %4209 = vmatpush.bf16.msrb.mxu3 %v6662_v12  ;;  %4200 = vmatpush.bf16.msrb.mxu1 %v6650_v21  ;;  %v4271_v21 = vlaneseq }
 0x366   :  { %3868 = vmatmul.bf16.vlgmr.msra.gmra.mxu2 %v3400_v49  ;;  %3894 = vmatmul.bf16.vlgmr.msra.gmra.mxu3 %v3400_v49  ;;  %v3469_v49 = vperm.slane %v3465_v19, 2 }
 0x368   :  { %4184 = vmatpush.bf16.msrb.mxu2 %v6645_v59 }
 0x369   :  { %4210 = vmatpush.bf16.msrb.mxu3 %v6661_v15 }
 0x36c   :  { %4185 = vmatpush.bf16.msrb.mxu2 %v6644_v63 }
 0x36d   :  { %4211 = vmatpush.bf16.msrb.mxu3 %v6660_v20 }
 0x370   :  { %4186 = vmatpush.bf16.msrb.mxu2 %v6643_v4 }
 0x371   :  { %4212 = vmatpush.bf16.msrb.mxu3 %v6659_v34 }
 0x374   :  { %4187 = vmatpush.bf16.msrb.mxu2 %v6642_v8 }
 0x375   :  { %4213 = vmatpush.bf16.msrb.mxu3 %v6658_v23 }
 0x3b5   :  { %v4225_v34 = vpop.permute.xlu0 %4224 }
 0x3b7   :  { %v6687_v48 = vpop.permute.xlu1 %6686 }
 0x3b8   :  { %v6689_v12 = vunpack.i.h.bf16 %v6687_v48 }
 0x3c3   :  { %v3804_v14 = vpop.f32.mrf.mxu0  ;;  %v3830_v16 = vpop.f32.mrf.mxu1 }
 0x3c4   :  { %v3805_v30 = vadd.f32 %v3804_v14, %v3467_v24  ;;  %v3831_v52 = vadd.f32 %v3830_v16, %v3468_v25  ;;  %v6688_v14 = vunpack.i.l.bf16 %v6687_v48  ;;  %v4272_v25 = vand.u32 127, %v4271_v21 }
 0x3c6   :  { %vm4273_vm8 = vcmp.lt.s32.totalorder %v4272_v25, 7 }
 0x3cb   :  { %v3806_v26 = vpop.f32.mrf.mxu0  ;;  %v3832_v9 = vpop.f32.mrf.mxu1 }
 0x3cc   :  { %v4263_v26 = vpop.permute.xlu2 %4262 }
 0x3d4   :  { %v3856_v56 = vpop.f32.mrf.mxu0  ;;  %v3882_v53 = vpop.f32.mrf.mxu1 }
 0x3d5   :  { %v3857_v11 = vadd.f32 %v3856_v56, %v3469_v49  ;;  %v3883_v61 = vadd.f32 %v3882_v53, %v3470_v37 }
 0x3d9   :  { %v3817_v29 = vpop.f32.mrf.mxu2  ;;  %v3843_v40 = vpop.f32.mrf.mxu3 }
 0x3da   :  { %v3818_v22 = vadd.f32 %v3817_v29, %v3805_v30  ;;  %v3844_v41 = vadd.f32 %v3843_v40, %v3831_v52 }
 0x3dc   :  { %6693 = vtanh.f32 %v3818_v22  ;;  %v3858_v18 = vpop.f32.mrf.mxu0  ;;  %v3884_v42 = vpop.f32.mrf.mxu1 }
 0x3dd   :  { %6695 = vtanh.f32 %v3844_v41 }
 0x3e1   :  { %v3819_v39 = vpop.f32.mrf.mxu2  ;;  %v3845_v45 = vpop.f32.mrf.mxu3 }
 0x3e2   :  { %v6694_v46 = vpop.eup %6693 }
 0x3e3   :  { %v6696_v44 = vpop.eup %6695  ;;  %v3903_v47 = vpack.c.bf16 %v6694_v46, %v6694_v46 }
 0x3e4   :  { %v3904_v43 = vpack.c.bf16 %v6696_v44, %v6696_v44 }
 0x3e5   :  { %4175 = vmatmul.bf16.vlgmr.msrb.gmra.mxu0 %v3903_v47 }
 0x3e6   :  { %4188 = vmatmul.bf16.vlgmr.msrb.gmra.mxu2 %v3904_v43 }
 0x3e9   :  { %v3869_v6 = vpop.f32.mrf.mxu2  ;;  %v3895_v50 = vpop.f32.mrf.mxu3 }
 0x3ea   :  { %v3870_v51 = vadd.f32 %v3869_v6, %v3857_v11  ;;  %v3896_v54 = vadd.f32 %v3895_v50, %v3883_v61 }
 0x3ec   :  { %6697 = vtanh.f32 %v3870_v51 }
 0x3ed   :  { %6699 = vtanh.f32 %v3896_v54 }
 0x3f1   :  { %v3871_v3 = vpop.f32.mrf.mxu2  ;;  %v3897_v55 = vpop.f32.mrf.mxu3 }
 0x3f2   :  { %v6698_v59 = vpop.eup %6697 }
 0x3f3   :  { %v6700_v60 = vpop.eup %6699  ;;  %v3905_v62 = vpack.c.bf16 %v6698_v59, %v6698_v59 }
 0x3f4   :  { %v3906_v13 = vpack.c.bf16 %v6700_v60, %v6700_v60 }
 0x3f5   :  { %4201 = vmatmul.bf16.vlgmr.msrb.gmra.mxu1 %v3905_v62 }
 0x3f6   :  { %4214 = vmatmul.bf16.vlgmr.msrb.gmra.mxu3 %v3906_v13 }
 0x462   :  { %v4176_v63 = vpop.f32.mrf.mxu0 }
 0x463   :  { %v4177_v7 = vadd.f32 %v6692_v2, %v4176_v63 }
 0x469   :  { %v4189_v58 = vpop.f32.mrf.mxu2 }
 0x46a   :  { %v4178_v1 = vpop.f32.mrf.mxu0  ;;  %v4190_v8 = vadd.f32 %v4189_v58, %v4177_v7 }
 0x471   :  { %v4191_v4 = vpop.f32.mrf.mxu2 }
 0x472   :  { %v4202_v5 = vpop.f32.mrf.mxu1 }
 0x473   :  { %v4203_v10 = vadd.f32 %v4202_v5, %v4190_v8 }
 0x479   :  { %v4215_v16 = vpop.f32.mrf.mxu3 }
 0x47a   :  { %v4216_v0 = vadd.f32 %v4215_v16, %v4203_v10  ;;  %v4204_v15 = vpop.f32.mrf.mxu1 }
 0x47c   :  { %v4251_v17 = vmul.f32 %v6689_v12, %v4216_v0  ;;  %v4237_v20 = vmul.f32 %v6688_v14, %v4216_v0  ;;  %v4265_v57 = vmul.f32 %v4263_v26, %v4216_v0  ;;  %v4227_v23 = vmul.f32 %v4225_v34, %v4216_v0 }
 0x47e   :  { %4253 = vrot.lane.b32.xlu2 %v4251_v17, %s6847_s6  ;;  %4239 = vrot.lane.b32.xlu1 %v4237_v20, %s6848_s8 }
 0x481   :  { %v4217_v9 = vpop.f32.mrf.mxu3 }
 0x486   :  { %4267 = vrot.lane.b32.xlu1 %v4265_v57, %s6849_s11 }
 0x4d8   :  { %v4254_v56 = vpop.permute.xlu2 %4253 }
 0x4f0   :  { %v4240_v19 = vpop.permute.xlu1 %4239 }
 0x4f1   :  { %v4242_v24 = vadd.f32 %v4240_v19, %v4227_v23 }
 0x4f3   :  { %v4256_v53 = vadd.f32 %v4254_v56, %v4242_v24 }
 0x4f8   :  { %v4268_v30 = vpop.permute.xlu1 %4267 }
 0x4f9   :  { %v4270_v52 = vadd.f32 %v4268_v30, %v4256_v53 }
 0x4fb   :  { %v4274_v31 = vsel %vm4273_vm8, %v4270_v52, -1e+30 }
 0x4fc   :  { %v4276_v32 = vsel %vm4275_vm9, %v4274_v31, -inf }
 0x4fd   :  { %4277 = vmax.xlane.f32.xlu2 %v4276_v32 }
 0x570   :  { %v4278_v33 = vpop.xlane.xlu2 %4277 }
 0x571   :  { %v4279_v35 = vsub.f32 %v4274_v31, %v4278_v33 }
 0x573   :  { %v4280_v27 = vmul.f32 1.442695, %v4279_v35 }
 0x575   :  { %6701 = vpow2.f32 %v4280_v27 }
 0x57b   :  { %v6702_v28 = vpop.eup %6701 }
 0x57c   :  { %v4282_v36 = vsel %vm4275_vm9, %v6702_v28, 0.0 }
 0x57d   :  { %4283 = vadd.xlane.f32.xlu0 %v4282_v36 }
 0x5f0   :  { %v4284_v29 = vpop.xlane.xlu0 %4283 }
 0x5f1   :  { %6703 = vlog2.f32 %v4284_v29 }
 0x5f7   :  { %v6704_v40 = vpop.eup %6703 }
 0x5f8   :  { %v4286_v38 = vmul.f32 0.6931472, %v6704_v40 }
 0x5fa   :  { %v4287_v22 = vadd.f32 %v4286_v38, %v4278_v33 }
 0x5fc   :  { %v4288_v41 = vsub.f32 %v4270_v52, %v4287_v22 }
 0x5fe   :  { %v4289_v18 = vsel %vm4273_vm8, %v4288_v41, %v4270_v52 }
 0x5ff   :  { %4290 = vst.msk [vmem:[#allocation10] sm:$0xff] %vm4275_vm9, %v4289_v18 }
 0x600   :  { %4301 = dma.vmem_to_hbm [thread:$0]  %s4297_s28, 128, %s4299_s30, [#allocation4]  }
 0x601   :  { %6831 = dma.done.wait [#allocation4], 128  }
 0x602   :  { %6832 = vsyncadd [#allocation4], 4294967168 }
 0x603   :  { %4306 = vsyncpa [#allocation3], 1 }
 0x604   :  { %4307 = vsyncpa [#allocation6], 1 }
 0x605   :  { %4308 = vsyncpa [#allocation9], 1 }
 0x606   :  { %4309 = vsyncpa [#allocation4], 1 }

</bundles_post_ra>
